<compile_context>
chip_gen: v5e
topology: v5e:2x2
jax: 0.10.0
libtpu: 0.0.40
codegen_flags: <defaults>
</compile_context>

<pallas_src>
import functools

import jax
import jax.numpy as jnp
import numpy as np
from jax import lax
from jax.experimental import pallas as pl
from jax.experimental.pallas import tpu as pltpu

BN_EPS = 1e-5
LANE = 128
SUB = 8


def _round_up(x, m):
    return (x + m - 1) // m * m


def _pick_divisor_tile(total, max_tile, multiple):
    """Largest t <= max_tile with t % multiple == 0 and total % t == 0, else None."""
    t = (min(total, max_tile) // multiple) * multiple
    while t >= multiple:
        if total % t == 0:
            return t
        t -= multiple
    return None


# ---------------------------------------------------------------------------
# Phase 1: one (TM, Kp) x (Kp, Cp) MXU matmul per tile (K = packed conv taps)
#          + per-tile partial channel sum / sum-of-squares from the accumulator.
# Grid: (num_m_tiles,), fully parallel.
# ---------------------------------------------------------------------------
def _matmul_stats_kernel(lhs_ref, w_ref, conv_ref, sum_ref, sumsq_ref):
    acc = jnp.dot(lhs_ref[...], w_ref[...],
                  preferred_element_type=jnp.float32)          # (TM, Cp) f32
    conv_ref[...] = acc.astype(conv_ref.dtype)                 # bf16 intermediate
    sum_ref[...] = jnp.sum(acc, axis=0)[None, None, :]
    sumsq_ref[...] = jnp.sum(acc * acc, axis=0)[None, None, :]


# ---------------------------------------------------------------------------
# Phase 2: folded (BN affine + FiLM) FMA + SiLU.  Optionally transposes the
# tile in-kernel so the output is written channel-major with only
# round_up(Cout, 8) channels (no 16x padded write, no trailing XLA transpose).
# ---------------------------------------------------------------------------
def _affine_silu_kernel(conv_ref, scale_ref, offset_ref, out_ref, *, transpose_out):
    y = conv_ref[...].astype(jnp.float32) * scale_ref[0] + offset_ref[0]  # (TM2, Cp)
    y = y * jax.nn.sigmoid(y)                                             # SiLU
    if transpose_out:
        out_ref[0] = y.T[: out_ref.shape[1], :]                # (Cout_p, TM2)
    else:
        out_ref[...] = y


def base_block_3d(x_ncdhw, weight, gamma, beta, scale_shift_list=None):
    """x_ncdhw: (N, Cin, D, H, W) f32; weight: (Cout, Cin, kd, kh, kw) f32;
    gamma/beta: (Cout,) f32; scale_shift_list: list of ((N, Cout), (N, Cout)) pairs.
    Returns (N, Cout, D, H, W) f32.  Conv: stride=1, padding='same', bias=False."""
    N, Cin, D, H, W = x_ncdhw.shape
    Cout, Cin_w, kd, kh, kw = weight.shape
    assert Cin_w == Cin
    assert kd % 2 == 1 and kh % 2 == 1 and kw % 2 == 1, "odd kernel for 'same' padding"
    pd, ph, pw = kd // 2, kh // 2, kw // 2

    M_per_n = D * H * W
    M = N * M_per_n
    K = kd * kh * kw * Cin
    Kp = _round_up(K, LANE)                       # lane-dense contraction dim
    Cp = _round_up(max(Cout, LANE), LANE)         # lane-dense output channels
    Cout_p = _round_up(Cout, SUB)                 # compact sublane-aligned channel count

    # ---- glue: im2col-lite pack in bf16 (taps in the minor dim) ----
    x_cl = jnp.transpose(x_ncdhw, (0, 2, 3, 4, 1)).astype(jnp.bfloat16)  # (N,D,H,W,Cin)
    x_pad = jnp.pad(x_cl, ((0, 0), (pd, pd), (ph, ph), (pw, pw), (0, 0)))
    taps = [x_pad[:, dz:dz + D, dy:dy + H, dx:dx + W, :]
            for dz in range(kd) for dy in range(kh) for dx in range(kw)]
    lhs = jnp.concatenate(taps, axis=-1).reshape(M, K)                   # (M, K) bf16

    TM = min(512, _round_up(M, SUB))
    Mp = _round_up(M, TM)
    lhs = jnp.pad(lhs, ((0, Mp - M), (0, Kp - K)))                       # zero rows/cols

    # weight (Cout,Cin,kd,kh,kw) -> (K, Cout) matching the tap ordering, padded, bf16
    w = jnp.transpose(weight, (2, 3, 4, 1, 0)).reshape(K, Cout)
    w = jnp.pad(w, ((0, Kp - K), (0, Cp - Cout))).astype(jnp.bfloat16)

    num_tiles = Mp // TM

    # ---- phase 1: conv matmul + per-tile partial BN statistics ----
    conv_flat, psum, psumsq = pl.pallas_call(
        _matmul_stats_kernel,
        grid=(num_tiles,),
        in_specs=[
            pl.BlockSpec((TM, Kp), lambda t: (t, 0)),
            pl.BlockSpec((Kp, Cp), lambda t: (0, 0)),          # resident weight
        ],
        out_specs=(
            pl.BlockSpec((TM, Cp), lambda t: (t, 0)),
            pl.BlockSpec((1, 1, Cp), lambda t: (t, 0, 0)),
            pl.BlockSpec((1, 1, Cp), lambda t: (t, 0, 0)),
        ),
        out_shape=(
            jax.ShapeDtypeStruct((Mp, Cp), jnp.bfloat16),
            jax.ShapeDtypeStruct((num_tiles, 1, Cp), jnp.float32),
            jax.ShapeDtypeStruct((num_tiles, 1, Cp), jnp.float32),
        ),
        compiler_params=pltpu.CompilerParams(
            dimension_semantics=("parallel",),
            vmem_limit_bytes=32 * 1024 * 1024),
        cost_estimate=pl.CostEstimate(
            flops=2 * Mp * Kp * Cp,
            transcendentals=0,
            bytes_accessed=(Mp * Kp * 2 + Kp * Cp * 2 + Mp * Cp * 2
                            + 2 * num_tiles * Cp * 4)),
    )(lhs, w)

    # ---- glue (tiny): finalize stats, fold BN affine + FiLM into one (n,c) FMA ----
    count = jnp.float32(M)                       # true element count (padded rows are zero)
    mean = jnp.sum(psum[:, 0, :], axis=0) / count          # (Cp,)
    ex2 = jnp.sum(psumsq[:, 0, :], axis=0) / count
    var = jnp.maximum(ex2 - mean * mean, 0.0)              # biased (train-mode BN)
    rstd = lax.rsqrt(var + BN_EPS)

    gamma_p = jnp.pad(gamma.astype(jnp.float32), (0, Cp - Cout))
    beta_p = jnp.pad(beta.astype(jnp.float32), (0, Cp - Cout))
    bn_scale = gamma_p * rstd
    bn_offset = beta_p - mean * bn_scale

    mul = jnp.ones((N, Cout), jnp.float32)
    add = jnp.zeros((N, Cout), jnp.float32)
    if scale_shift_list is not None:
        for scale, shift in scale_shift_list:
            scale = scale.reshape(N, Cout).astype(jnp.float32)
            shift = shift.reshape(N, Cout).astype(jnp.float32)
            mul = mul * (scale + 1.0)
            add = add * (scale + 1.0) + shift
    mul = jnp.pad(mul, ((0, 0), (0, Cp - Cout)))
    add = jnp.pad(add, ((0, 0), (0, Cp - Cout)))

    scale_nc = (bn_scale[None, :] * mul).reshape(N, 1, Cp)
    offset_nc = (bn_offset[None, :] * mul + add).reshape(N, 1, Cp)

    # ---- phase 2: large-block fused FMA + SiLU (channel-major compact output) ----
    TM2 = _pick_divisor_tile(M_per_n, 1024, LANE)
    transpose_out = TM2 is not None
    if TM2 is None:
        # TODO(synk): no lane-aligned depth tile -> fall back to a channels-last padded
        #             output and a trailing XLA transpose.
        TM2 = _pick_divisor_tile(M_per_n, 1024, SUB) or M_per_n
    MT2 = M_per_n // TM2

    kern = functools.partial(_affine_silu_kernel, transpose_out=transpose_out)
    in_specs2 = [
        pl.BlockSpec((TM2, Cp), lambda n, mt: (n * MT2 + mt, 0)),
        pl.BlockSpec((1, 1, Cp), lambda n, mt: (n, 0, 0)),
        pl.BlockSpec((1, 1, Cp), lambda n, mt: (n, 0, 0)),
    ]
    cparams2 = pltpu.CompilerParams(
        dimension_semantics=("parallel", "parallel"),
        vmem_limit_bytes=32 * 1024 * 1024)

    if transpose_out:
        out_cm = pl.pallas_call(
            kern,
            grid=(N, MT2),
            in_specs=in_specs2,
            out_specs=pl.BlockSpec((1, Cout_p, TM2), lambda n, mt: (n, 0, mt)),
            out_shape=jax.ShapeDtypeStruct((N, Cout_p, M_per_n), jnp.float32),
            compiler_params=cparams2,
        )(conv_flat, scale_nc, offset_nc)
        out = out_cm.reshape(N, Cout_p, D, H, W)[:, :Cout]
    else:
        out_cl = pl.pallas_call(
            kern,
            grid=(N, MT2),
            in_specs=in_specs2,
            out_specs=pl.BlockSpec((TM2, Cp), lambda n, mt: (n * MT2 + mt, 0)),
            out_shape=jax.ShapeDtypeStruct((M, Cp), jnp.float32),
            compiler_params=cparams2,
        )(conv_flat, scale_nc, offset_nc)
        out = jnp.transpose(out_cl.reshape(N, D, H, W, Cp)[..., :Cout], (0, 4, 1, 2, 3))
    return out


def _reference(x_ncdhw, weight, gamma, beta, scale_shift_list):
    """Pure-JAX reference mirroring the PyTorch forward (train-mode BatchNorm)."""
    conv = lax.conv_general_dilated(
        x_ncdhw, weight, window_strides=(1, 1, 1), padding="SAME",
        dimension_numbers=("NCDHW", "OIDHW", "NCDHW"))
    mean = jnp.mean(conv, axis=(0, 2, 3, 4), keepdims=True)
    var = jnp.mean(jnp.square(conv - mean), axis=(0, 2, 3, 4), keepdims=True)
    norm = (conv - mean) * lax.rsqrt(var + BN_EPS)
    norm = norm * gamma.reshape(1, -1, 1, 1, 1) + beta.reshape(1, -1, 1, 1, 1)
    if scale_shift_list is not None:
        for scale, shift in scale_shift_list:
            s = scale[:, :, None, None, None]
            sh = shift[:, :, None, None, None]
            norm = norm * (s + 1.0) + sh
    return norm * jax.nn.sigmoid(norm)


if __name__ == "__main__":
    key = jax.random.PRNGKey(0)
    k_x, k_w, k_g, k_b, k_s, k_sh = jax.random.split(key, 6)

    # small shapes consistent with the module: N=2, Cin=4, Cout=8, D=H=W=8, k=3
    N, Cin, Cout, D, H, W, ksz = 2, 4, 8, 8, 8, 8, 3

    x = jax.random.normal(k_x, (N, Cin, D, H, W), jnp.float32)
    fan_in = Cin * ksz ** 3
    weight = jax.random.uniform(
        k_w, (Cout, Cin, ksz, ksz, ksz), jnp.float32,
        minval=-1.0 / np.sqrt(fan_in), maxval=1.0 / np.sqrt(fan_in))
    gamma = jnp.ones((Cout,), jnp.float32) + 0.1 * jax.random.normal(k_g, (Cout,))
    beta = 0.1 * jax.random.normal(k_b, (Cout,), jnp.float32)

    # one FiLM (scale, shift) pair per (batch, channel), as from a time-embedding MLP
    scale = 0.5 * jax.random.normal(k_s, (N, Cout), jnp.float32)
    shift = 0.5 * jax.random.normal(k_sh, (N, Cout), jnp.float32)
    scale_shift_list = [(scale, shift)]

    fwd = jax.jit(base_block_3d)
    out = jax.block_until_ready(fwd(x, weight, gamma, beta, scale_shift_list))

    # structural check vs a reference using the same bf16-rounded matmul operands
    # (remaining difference = the bf16 conv intermediate rounding in the kernel)
    x_r = x.astype(jnp.bfloat16).astype(jnp.float32)
    w_r = weight.astype(jnp.bfloat16).astype(jnp.float32)
    ref_tight = jax.block_until_ready(
        _reference(x_r, w_r, gamma, beta, scale_shift_list))
    np.testing.assert_allclose(np.asarray(out), np.asarray(ref_tight),
                               rtol=2e-2, atol=2e-2)

    # loose check vs the pure-f32 reference (difference is just bf16 rounding)
    ref_f32 = jax.block_until_ready(
        _reference(x, weight, gamma, beta, scale_shift_list))
    np.testing.assert_allclose(np.asarray(out), np.asarray(ref_f32),
                               rtol=5e-2, atol=5e-2)

    print("KERNEL_OK")
</pallas_src>

<mosaic_0001>
module attributes {stable_mosaic.version = 11 : i64} {
  func.func @_matmul_stats_kernel(%arg0: i32, %arg1: memref<512x128xbf16, #tpu.memory_space<vmem>>, %arg2: memref<128x128xbf16, #tpu.memory_space<vmem>>, %arg3: memref<512x128xbf16, #tpu.memory_space<vmem>>, %arg4: memref<1x1x128xf32, #tpu.memory_space<vmem>>, %arg5: memref<1x1x128xf32, #tpu.memory_space<vmem>>) attributes {dimension_semantics = [#tpu.dimension_semantics<parallel>], iteration_bounds = array<i64: 2>, scalar_prefetch = 0 : i64, scratch_operands = 0 : i64, tpu.core_type = #tpu.core_type<tc>, window_params = [{transform_indices = @transform_0, window_bounds = array<i64: 512, 128>}, {pipeline_mode = #tpu.pipeline_mode<synchronous>, transform_indices = @transform_1, window_bounds = array<i64: 128, 128>}, {transform_indices = @transform_2, window_bounds = array<i64: 512, 128>}, {transform_indices = @transform_3, window_bounds = array<i64: 1, 1, 128>}, {transform_indices = @transform_4, window_bounds = array<i64: 1, 1, 128>}]} {
    %c0 = arith.constant 0 : index
    %c0_0 = arith.constant 0 : index
    %0 = vector.load %arg1[%c0, %c0_0] : memref<512x128xbf16, #tpu.memory_space<vmem>>, vector<512x128xbf16>
    %c0_1 = arith.constant 0 : index
    %c0_2 = arith.constant 0 : index
    %1 = vector.load %arg2[%c0_1, %c0_2] : memref<128x128xbf16, #tpu.memory_space<vmem>>, vector<128x128xbf16>
    %cst = arith.constant dense<0.000000e+00> : vector<512x128xf32>
    %2 = tpu.matmul %0, %1, %cst {dimension_numbers = #tpu.dot_dimension_numbers<[1], [0], [0], [1], [0, 0, 1, 1], [], []>} : vector<512x128xbf16>, vector<128x128xbf16>, vector<512x128xf32> -> vector<512x128xf32>
    %3 = arith.truncf %2 : vector<512x128xf32> to vector<512x128xbf16>
    %c0_3 = arith.constant 0 : index
    %c0_4 = arith.constant 0 : index
    %4 = vector.load %arg3[%c0_3, %c0_4] : memref<512x128xbf16, #tpu.memory_space<vmem>>, vector<512x128xbf16>
    tpu.vector_store %arg3[%c0_3, %c0_4], %3 {strides = array<i32>} : memref<512x128xbf16, #tpu.memory_space<vmem>>, vector<512x128xbf16>,
    %cst_5 = arith.constant dense<0.000000e+00> : vector<128xf32>
    %5 = vector.multi_reduction <add>, %2, %cst_5 [0] : vector<512x128xf32> to vector<128xf32>
    %6 = vector.shape_cast %5 : vector<128xf32> to vector<1x1x128xf32>
    %c0_6 = arith.constant 0 : index
    %c0_7 = arith.constant 0 : index
    %c0_8 = arith.constant 0 : index
    %7 = vector.load %arg4[%c0_6, %c0_7, %c0_8] : memref<1x1x128xf32, #tpu.memory_space<vmem>>, vector<1x1x128xf32>
    tpu.vector_store %arg4[%c0_6, %c0_7, %c0_8], %6 {strides = array<i32>} : memref<1x1x128xf32, #tpu.memory_space<vmem>>, vector<1x1x128xf32>,
    %8 = arith.mulf %2, %2 : vector<512x128xf32>
    %cst_9 = arith.constant dense<0.000000e+00> : vector<128xf32>
    %9 = vector.multi_reduction <add>, %8, %cst_9 [0] : vector<512x128xf32> to vector<128xf32>
    %10 = vector.shape_cast %9 : vector<128xf32> to vector<1x1x128xf32>
    %c0_10 = arith.constant 0 : index
    %c0_11 = arith.constant 0 : index
    %c0_12 = arith.constant 0 : index
    %11 = vector.load %arg5[%c0_10, %c0_11, %c0_12] : memref<1x1x128xf32, #tpu.memory_space<vmem>>, vector<1x1x128xf32>
    tpu.vector_store %arg5[%c0_10, %c0_11, %c0_12], %10 {strides = array<i32>} : memref<1x1x128xf32, #tpu.memory_space<vmem>>, vector<1x1x128xf32>,
    return
  }
  func.func @transform_0(%arg0: i32) -> (i32, i32) {
    %c0_i32 = arith.constant 0 : i32
    %c0_i32_0 = arith.constant 0 : i32
    return %arg0, %c0_i32 : i32, i32
  }
  func.func @transform_1(%arg0: i32) -> (i32, i32) {
    %c0_i32 = arith.constant 0 : i32
    %c0_i32_0 = arith.constant 0 : i32
    %c0_i32_1 = arith.constant 0 : i32
    return %c0_i32, %c0_i32_0 : i32, i32
  }
  func.func @transform_2(%arg0: i32) -> (i32, i32) {
    %c0_i32 = arith.constant 0 : i32
    %c0_i32_0 = arith.constant 0 : i32
    return %arg0, %c0_i32 : i32, i32
  }
  func.func @transform_3(%arg0: i32) -> (i32, i32, i32) {
    %c0_i32 = arith.constant 0 : i32
    %c0_i32_0 = arith.constant 0 : i32
    %c0_i32_1 = arith.constant 0 : i32
    return %arg0, %c0_i32, %c0_i32_0 : i32, i32, i32
  }
  func.func @transform_4(%arg0: i32) -> (i32, i32, i32) {
    %c0_i32 = arith.constant 0 : i32
    %c0_i32_0 = arith.constant 0 : i32
    %c0_i32_1 = arith.constant 0 : i32
    return %arg0, %c0_i32, %c0_i32_0 : i32, i32, i32
  }
}

module attributes {stable_mosaic.version = 11 : i64} {
  func.func @_affine_silu_kernel(%arg0: i32, %arg1: i32, %arg2: memref<512x128xbf16, #tpu.memory_space<vmem>>, %arg3: memref<1x1x128xf32, #tpu.memory_space<vmem>>, %arg4: memref<1x1x128xf32, #tpu.memory_space<vmem>>, %arg5: memref<1x8x512xf32, #tpu.memory_space<vmem>>) attributes {dimension_semantics = [#tpu.dimension_semantics<parallel>, #tpu.dimension_semantics<parallel>], iteration_bounds = array<i64: 2, 1>, scalar_prefetch = 0 : i64, scratch_operands = 0 : i64, tpu.core_type = #tpu.core_type<tc>, window_params = [{transform_indices = @transform_0, window_bounds = array<i64: 512, 128>}, {transform_indices = @transform_1, window_bounds = array<i64: 1, 1, 128>}, {transform_indices = @transform_2, window_bounds = array<i64: 1, 1, 128>}, {transform_indices = @transform_3, window_bounds = array<i64: 1, 8, 512>}]} {
    %c0 = arith.constant 0 : index
    %c0_0 = arith.constant 0 : index
    %0 = vector.load %arg2[%c0, %c0_0] : memref<512x128xbf16, #tpu.memory_space<vmem>>, vector<512x128xbf16>
    %1 = arith.extf %0 : vector<512x128xbf16> to vector<512x128xf32>
    %c0_1 = arith.constant 0 : index
    %c0_2 = arith.constant 0 : index
    %c0_3 = arith.constant 0 : index
    %2 = vector.load %arg3[%c0_1, %c0_2, %c0_3] : memref<1x1x128xf32, #tpu.memory_space<vmem>>, vector<1x1x128xf32>
    %3 = vector.shape_cast %2 : vector<1x1x128xf32> to vector<1x128xf32>
    %4 = vector.broadcast %3 : vector<1x128xf32> to vector<512x128xf32>
    %5 = arith.mulf %1, %4 : vector<512x128xf32>
    %c0_4 = arith.constant 0 : index
    %c0_5 = arith.constant 0 : index
    %c0_6 = arith.constant 0 : index
    %6 = vector.load %arg4[%c0_4, %c0_5, %c0_6] : memref<1x1x128xf32, #tpu.memory_space<vmem>>, vector<1x1x128xf32>
    %7 = vector.shape_cast %6 : vector<1x1x128xf32> to vector<1x128xf32>
    %8 = vector.broadcast %7 : vector<1x128xf32> to vector<512x128xf32>
    %9 = arith.addf %5, %8 : vector<512x128xf32>
    %10 = arith.negf %9 : vector<512x128xf32>
    %11 = math.exp %10 : vector<512x128xf32>
    %cst = arith.constant 1.000000e+00 : f32
    %12 = vector.broadcast %cst : f32 to vector<512x128xf32>
    %13 = arith.addf %12, %11 : vector<512x128xf32>
    %14 = arith.divf %12, %13 : vector<512x128xf32>
    %15 = arith.mulf %9, %14 : vector<512x128xf32>
    %16 = tpu.transpose %15, [1, 0] : vector<512x128xf32> -> vector<128x512xf32>
    %17 = vector.extract_strided_slice %16 {offsets = [0, 0], sizes = [8, 512], strides = [1, 1]} : vector<128x512xf32> to vector<8x512xf32>
    %c0_7 = arith.constant 0 : index
    %c0_8 = arith.constant 0 : index
    %c0_9 = arith.constant 0 : index
    %18 = vector.load %arg5[%c0_7, %c0_8, %c0_9] : memref<1x8x512xf32, #tpu.memory_space<vmem>>, vector<1x8x512xf32>
    %19 = vector.shape_cast %18 : vector<1x8x512xf32> to vector<8x512xf32>
    %20 = vector.shape_cast %17 : vector<8x512xf32> to vector<1x8x512xf32>
    tpu.vector_store %arg5[%c0_7, %c0_8, %c0_9], %20 {strides = array<i32>} : memref<1x8x512xf32, #tpu.memory_space<vmem>>, vector<1x8x512xf32>,
    return
  }
  func.func @transform_0(%arg0: i32, %arg1: i32) -> (i32, i32) {
    %c1_i32 = arith.constant 1 : i32
    %0 = arith.muli %arg0, %c1_i32 : i32
    %1 = arith.addi %0, %arg1 : i32
    %c0_i32 = arith.constant 0 : i32
    %c0_i32_0 = arith.constant 0 : i32
    return %1, %c0_i32 : i32, i32
  }
  func.func @transform_1(%arg0: i32, %arg1: i32) -> (i32, i32, i32) {
    %c0_i32 = arith.constant 0 : i32
    %c0_i32_0 = arith.constant 0 : i32
    %c0_i32_1 = arith.constant 0 : i32
    return %arg0, %c0_i32, %c0_i32_0 : i32, i32, i32
  }
  func.func @transform_2(%arg0: i32, %arg1: i32) -> (i32, i32, i32) {
    %c0_i32 = arith.constant 0 : i32
    %c0_i32_0 = arith.constant 0 : i32
    %c0_i32_1 = arith.constant 0 : i32
    return %arg0, %c0_i32, %c0_i32_0 : i32, i32, i32
  }
  func.func @transform_3(%arg0: i32, %arg1: i32) -> (i32, i32, i32) {
    %c0_i32 = arith.constant 0 : i32
    %c0_i32_0 = arith.constant 0 : i32
    return %arg0, %c0_i32, %arg1 : i32, i32, i32
  }
}

</mosaic_0001>

<bundles_post_ra>
// kernel: base_block_3d.3
= control target key start
LH: loop header
LB: loop body
LE: loop exit
PB: predicated region body
PF: predicated region fallthrough
CT: control target
= control target key end

     0   :  { %s2571_s12 = smov 0   ;;  %s2573_s13 = smov 0   ;;  %s4467_s0 = inlined_call_operand.vmem [shape: bf16[1024,128], index: 0, kind: input, shape index: {}]   ;;  %s4468_s1 = inlined_call_operand.vmem [shape: f32[2,1,128], index: 1, kind: input, shape index: {}]   ;;  %s4469_s2 = inlined_call_operand.vmem [shape: f32[2,1,128], index: 2, kind: input, shape index: {}]   ;;  %s4470_s3 = inlined_call_operand.vmem [shape: f32[2,8,512], index: 3, kind: output, shape index: {}]  }
   0x1   :  { %s2575_s14 = smov 0  }
   0x2 LB: > { %s25_s15 = sadd.s32 1, %s2545_s13  ;;  %p2010_p0 = scmp.ge.s32.totalorder %s2549_s14, 1  ;;  %s2549_s14 = sphi %s2575_s14, %s13_s14   ;;  %s2545_s13 = sphi %s2573_s13, %s4684_s13   ;;  %s2541_s12 = sphi %s2571_s12, %s4683_s12  }
   0x3   : > { %p27_p1 = scmp.ge.s32.totalorder %s25_s15, 2  ;;  %p172_p2 = scmp.lt.s32.totalorder %s2549_s14, 3 }
   0x5   : > { %s4686_s15 = smov (%p27_p1, %s25_s15), 0  ;;  %p173_p3 = pnand %p2010_p0, %p172_p2 }
   0x6   : > { %s2011_s16 = sshll.u32 (!%p173_p3), %s2541_s12, 6  ;;  %p215_p4 = scmp.lt.s32.totalorder (!%p173_p3), %s2541_s12, 1 }
   0x7   : > { %176 = sbr.rel (%p173_p3) target bundleno = 417 (0x1a1), region = 32  ;;  %p209_p5 = scmp.lt.s32.totalorder (!%p173_p3), %s2011_s16, 127 }
   0xc   : > { %s4688_s12 = smov (!%p215_p4, %s2541_s12), 1  ;;  %s4690_s16 = smov (!%p209_p5, %s2011_s16), 127 }
   0xd   : > { %s2595_s19 = scalar_lea.vmem %s4468_s1, %s4688_s12  ;;  %s2012_s20 = sshll.u32 %s4690_s16, 2 }
   0xe   : > { %s2601_s23 = scalar_lea.vmem %s4469_s2, %s4688_s12  ;;  %s2606_s26 = scalar_lea.vmem %s4467_s0, %s2012_s20  ;;  %v2609_v0 = vld [vmem:[%s2595_s19] ss:$0 sm:$0xff] }
   0xf   : > { %v2083_v1 = vld [vmem:[%s2606_s26] sm:$0xff]   ;;  %v2210_v2 = vld [vmem:[%s2606_s26 + $0x8] sm:$0xff]   ;;  %v2211_v8 = vld [vmem:[%s2606_s26 + $0x10] sm:$0xff]   ;;  %s2081_s27 = sshll.u32 %s4688_s12, 5 }
  0x10   : > { %v2084_v3 = vunpack.c.l.bf16 %v2083_v1  ;;  %v2614_v4 = vld [vmem:[%s2601_s23] ss:$0 sm:$0xff]  ;;  %v2085_v5 = vunpack.c.h.bf16 %v2083_v1  ;;  %v2088_v6 = vunpack.c.l.bf16 %v2210_v2  ;;  %v2089_v7 = vunpack.c.h.bf16 %v2210_v2  ;;  %v2647_v33 = vld [vmem:[%s2606_s26 + $0x18] sm:$0xff]   ;;  %s4437_s30 = scalar_lea.vmem %s4470_s3, %s2081_s27 }
  0x11   : > { %v2092_v13 = vunpack.c.l.bf16 %v2211_v8  ;;  %v2093_v23 = vunpack.c.h.bf16 %v2211_v8  ;;  %v2096_v36 = vunpack.c.l.bf16 %v2647_v33 }
  0x12   : > { %v363_v9 = vmul.f32 %v2609_v0, %v2084_v3  ;;  %v364_v10 = vmul.f32 %v2609_v0, %v2085_v5  ;;  %v365_v11 = vmul.f32 %v2609_v0, %v2088_v6  ;;  %v366_v12 = vmul.f32 %v2609_v0, %v2089_v7 }
  0x13   : > { %v367_v21 = vmul.f32 %v2609_v0, %v2092_v13  ;;  %v368_v25 = vmul.f32 %v2609_v0, %v2093_v23  ;;  %v369_v40 = vmul.f32 %v2609_v0, %v2096_v36 }
  0x14   : > { %v2622_v14 = vadd.f32 %v2614_v4, %v363_v9  ;;  %v2625_v15 = vadd.f32 %v2614_v4, %v364_v10  ;;  %v2628_v16 = vadd.f32 %v2614_v4, %v365_v11  ;;  %v2631_v17 = vadd.f32 %v2614_v4, %v366_v12 }
  0x15   : > { %v2639_v24 = vadd.f32 %v2614_v4, %v367_v21  ;;  %v2644_v32 = vadd.f32 %v2614_v4, %v368_v25  ;;  %v2661_v50 = vadd.f32 %v2614_v4, %v369_v40  ;;  %v2097_v12 = vunpack.c.h.bf16 %v2647_v33 }
  0x16   : > { %v2015_v18 = vmul.f32 -1.442695, %v2622_v14  ;;  %v2016_v19 = vmul.f32 -1.442695, %v2625_v15  ;;  %v2017_v20 = vmul.f32 -1.442695, %v2628_v16 }
  0x17   : > { %v2018_v22 = vmul.f32 -1.442695, %v2631_v17  ;;  %v2019_v29 = vmul.f32 -1.442695, %v2639_v24  ;;  %v2020_v37 = vmul.f32 -1.442695, %v2644_v32 }
  0x18   : > { %2267 = vpow2.f32 %v2015_v18  ;;  %v2021_v2 = vmul.f32 -1.442695, %v2661_v50 }
  0x19   : > { %2269 = vpow2.f32 %v2016_v19  ;;  %v2213_v19 = vld [vmem:[%s2606_s26 + $0x20] sm:$0xff]  }
  0x1a   : > { %2271 = vpow2.f32 %v2017_v20 }
  0x1b   : > { %2273 = vpow2.f32 %v2018_v22 }
  0x1e   : > { %v2268_v26 = vpop.eup %2267 }
  0x1f   : > { %v2270_v27 = vpop.eup %2269  ;;  %v687_v28 = vadd.f32 1.0, %v2268_v26  ;;  %v370_v26 = vmul.f32 %v2609_v0, %v2097_v12 }
  0x20   : > { %v2272_v30 = vpop.eup %2271  ;;  %v688_v31 = vadd.f32 1.0, %v2270_v27  ;;  %v2100_v27 = vunpack.c.l.bf16 %v2213_v19 }
  0x21   : > { %2275 = vrcp.f32 %v687_v28  ;;  %v2274_v34 = vpop.eup %2273  ;;  %v2649_v35 = vadd.f32 1.0, %v2272_v30  ;;  %v762_v44 = vand.u32 2147483648, %v687_v28  ;;  %vm756_vm0 = vweird.f32 %v687_v28 }
  0x22   : > { %2277 = vrcp.f32 %v688_v31  ;;  %v2654_v38 = vadd.f32 1.0, %v2274_v34  ;;  %v760_v47 = vand.u32 2147483647, %v687_v28  ;;  %vm771_vm2 = vweird.f32 %v688_v31 }
  0x23   : > { %2279 = vpow2.f32 %v2019_v29  ;;  %v763_v55 = vor.u32 1.1754944e-38, %v762_v44  ;;  %v775_v57 = vand.u32 2147483647, %v688_v31  ;;  %v777_v58 = vand.u32 2147483648, %v688_v31 }
  0x24   : > { %2281 = vrcp.f32 %v2649_v35  ;;  %vm761_vm5 = vcmp.eq.f32.partialorder %v760_v47, 8.507059e+37  ;;  %vm786_vm8 = vweird.f32 %v2649_v35  ;;  %v792_v18 = vand.u32 2147483648, %v2649_v35 }
  0x25   : > { %2283 = vpow2.f32 %v2020_v37  ;;  %vm776_vm7 = vcmp.eq.f32.partialorder %v775_v57, 8.507059e+37  ;;  %v778_v6 = vor.u32 1.1754944e-38, %v777_v58  ;;  %vm801_vm12 = vweird.f32 %v2654_v38 }
  0x26   : > { %2285 = vrcp.f32 %v2654_v38  ;;  %v793_v29 = vor.u32 1.1754944e-38, %v792_v18  ;;  %v807_v37 = vand.u32 2147483648, %v2654_v38 }
  0x27   : > { %v2276_v39 = vpop.eup %2275 }
  0x28   : > { %v2278_v41 = vpop.eup %2277  ;;  %v752_v42 = vmul.f32 %v2276_v39, %v687_v28  ;;  %vm757_vm1 = vweird.f32 %v2276_v39 }
  0x29   : > { %v2280_v43 = vpop.eup %2279  ;;  %v767_v45 = vmul.f32 %v2278_v41, %v688_v31  ;;  %vm772_vm3 = vweird.f32 %v2278_v41  ;;  %vm2667_vm4 = vmor %vm756_vm0, %vm757_vm1  ;;  %v2101_v31 = vunpack.c.h.bf16 %v2213_v19 }
  0x2a   : > { %v753_v46 = vsub.f32 1.0, %v752_v42  ;;  %v2658_v48 = vpop.eup %2281  ;;  %v2665_v53 = vadd.f32 1.0, %v2280_v43  ;;  %vm2674_vm6 = vmor %vm771_vm2, %vm772_vm3 }
  0x2b   : > { %v768_v49 = vsub.f32 1.0, %v767_v45  ;;  %v782_v52 = vmul.f32 %v2658_v48, %v2649_v35  ;;  %v2284_v59 = vpop.eup %2283  ;;  %vm787_vm9 = vweird.f32 %v2658_v48  ;;  %v372_v36 = vmul.f32 %v2609_v0, %v2101_v31 }
  0x2c   : > { %v754_v51 = vmul.f32 %v2276_v39, %v753_v46  ;;  %v2671_v62 = vpop.eup %2285  ;;  %2287 = vrcp.f32 %v2665_v53  ;;  %v2688_v11 = vadd.f32 1.0, %v2284_v59  ;;  %vm2699_vm10 = vmor %vm786_vm8, %vm787_vm9  ;;  %v805_v46 = vand.u32 2147483647, %v2654_v38 }
  0x2d   : > { %v769_v56 = vmul.f32 %v2278_v41, %v768_v49  ;;  %v783_v61 = vsub.f32 1.0, %v782_v52  ;;  %v797_v10 = vmul.f32 %v2671_v62, %v2654_v38  ;;  %2289 = vpow2.f32 %v2021_v2 }
  0x2e   : > { %v755_v60 = vadd.f32 %v2276_v39, %v754_v51  ;;  %2291 = vrcp.f32 %v2688_v11  ;;  %vm802_vm13 = vweird.f32 %v2671_v62  ;;  %v2729_v44 = vadd.f32 %v2614_v4, %v372_v36  ;;  %v2214_v51 = vld [vmem:[%s2606_s26 + $0x28] sm:$0xff]  }
  0x2f   : > { %v770_v63 = vadd.f32 %v2278_v41, %v769_v56  ;;  %v784_v9 = vmul.f32 %v2658_v48, %v783_v61  ;;  %v798_v22 = vsub.f32 1.0, %v797_v10  ;;  %vm2733_vm14 = vmor %vm801_vm12, %vm802_vm13  ;;  %v808_v56 = vor.u32 1.1754944e-38, %v807_v37 }
  0x30   : > { %v759_v3 = vsel %vm2667_vm4, %v2276_v39, %v755_v60  ;;  %v2024_v38 = vmul.f32 -1.442695, %v2729_v44  ;;  %vm806_vm15 = vcmp.eq.f32.partialorder %v805_v46, 8.507059e+37  ;;  %vm816_vm0 = vweird.f32 %v2665_v53 }
  0x31   : > { %v764_v5 = vsel %vm761_vm5, %v763_v55, %v759_v3  ;;  %v774_v8 = vsel %vm2674_vm6, %v2278_v41, %v770_v63  ;;  %v785_v21 = vadd.f32 %v2658_v48, %v784_v9  ;;  %v799_v34 = vmul.f32 %v2671_v62, %v798_v22 }
  0x32   : > { %v1711_v7 = vmul.f32 %v764_v5, %v2622_v14  ;;  %v779_v13 = vsel %vm776_vm7, %v778_v6, %v774_v8  ;;  %v790_v14 = vand.u32 2147483647, %v2649_v35  ;;  %v2696_v20 = vpop.eup %2287  ;;  %v2713_v35 = vadd.f32 %v2614_v4, %v370_v26 }
  0x33   : > { %v1712_v25 = vmul.f32 %v779_v13, %v2625_v15  ;;  %v2290_v28 = vpop.eup %2289  ;;  %v812_v30 = vmul.f32 %v2696_v20, %v2665_v53  ;;  %v789_v33 = vsel %vm2699_vm10, %v2658_v48, %v785_v21  ;;  %v371_v15 = vmul.f32 %v2609_v0, %v2100_v27 }
  0x34   : > { %1775 = vxpose.xlu0.b32.start [1/16] (narrow) %v1711_v7, 8  ;;  %vm791_vm11 = vcmp.eq.f32.partialorder %v790_v14, 8.507059e+37  ;;  %v2720_v39 = vadd.f32 1.0, %v2290_v28  ;;  %v2722_v40 = vpop.eup %2291  ;;  %v2022_v42 = vmul.f32 -1.442695, %v2713_v35  ;;  %v800_v45 = vadd.f32 %v2671_v62, %v799_v34 }
  0x35   : > { %v794_v41 = vsel %vm791_vm11, %v793_v29, %v789_v33  ;;  %v2726_v43 = vadd.f32 %v2614_v4, %v371_v15  ;;  %v813_v47 = vsub.f32 1.0, %v812_v30  ;;  %v827_v54 = vmul.f32 %v2722_v40, %v2688_v11  ;;  %v2215_v33 = vld [vmem:[%s2606_s26 + $0x30] sm:$0xff]  }
  0x36   : > { %2293 = vpow2.f32 %v2022_v42  ;;  %v1713_v52 = vmul.f32 %v794_v41, %v2628_v16  ;;  %v2104_v55 = vunpack.c.l.bf16 %v2214_v51  ;;  %v804_v57 = vsel %vm2733_vm14, %v2671_v62, %v800_v45 }
  0x37   : > { %v2023_v49 = vmul.f32 -1.442695, %v2726_v43  ;;  %2295 = vrcp.f32 %v2720_v39  ;;  %v814_v58 = vmul.f32 %v2696_v20, %v813_v47  ;;  %vm817_vm1 = vweird.f32 %v2696_v20 }
  0x38   : > { %v373_v59 = vmul.f32 %v2609_v0, %v2104_v55  ;;  %v820_v16 = vand.u32 2147483647, %v2665_v53  ;;  %v828_v60 = vsub.f32 1.0, %v827_v54  ;;  %v809_v1 = vsel %vm806_vm15, %v808_v56, %v804_v57  ;;  %vm2764_vm2 = vmor %vm816_vm0, %vm817_vm1 }
  0x39   : > { %2297 = vpow2.f32 %v2023_v49  ;;  %v822_v62 = vand.u32 2147483648, %v2665_v53  ;;  %v815_v3 = vadd.f32 %v2696_v20, %v814_v58  ;;  %v1714_v9 = vmul.f32 %v809_v1, %v2631_v17 }
  0x3a   : > { %v2753_v61 = vadd.f32 %v2614_v4, %v373_v59  ;;  %2299 = vpow2.f32 %v2024_v38  ;;  %vm2769_vm3 = vcmp.eq.f32.partialorder %v820_v16, 8.507059e+37  ;;  %v829_v12 = vmul.f32 %v2722_v40, %v828_v60 }
  0x3b   : > { %v823_v13 = vor.u32 1.1754944e-38, %v822_v62  ;;  %v819_v53 = vsel %vm2764_vm2, %v2696_v20, %v815_v3  ;;  %vm831_vm4 = vweird.f32 %v2688_v11  ;;  %vm832_vm5 = vweird.f32 %v2722_v40 }
  0x3c   : > { %1776 = vxpose.xlu0.b32.cont [2/16] (narrow) %v1712_v25, 8  ;;  %v2294_v63 = vpop.eup %2293  ;;  %v2025_v6 = vmul.f32 -1.442695, %v2753_v61  ;;  %v2105_v17 = vunpack.c.h.bf16 %v2214_v51  ;;  %v835_v21 = vand.u32 2147483647, %v2688_v11  ;;  %v830_v22 = vadd.f32 %v2722_v40, %v829_v12  ;;  %vm2789_vm6 = vmor %vm831_vm4, %vm832_vm5 }
  0x3d   : > { %v2756_v2 = vpop.eup %2295  ;;  %v2759_v5 = vadd.f32 1.0, %v2294_v63  ;;  %v837_v23 = vand.u32 2147483648, %v2688_v11  ;;  %v824_v25 = vsel %vm2769_vm3, %v823_v13, %v819_v53  ;;  %v2108_v37 = vunpack.c.l.bf16 %v2215_v33 }
  0x3e   : > { %v842_v14 = vmul.f32 %v2756_v2, %v2720_v39  ;;  %v374_v27 = vmul.f32 %v2609_v0, %v2105_v17  ;;  %vm2799_vm7 = vcmp.eq.f32.partialorder %v835_v21, 8.507059e+37  ;;  %v1715_v34 = vmul.f32 %v824_v25, %v2639_v24  ;;  %v2216_v21 = vld [vmem:[%s2606_s26 + $0x38] sm:$0xff]  }
  0x3f   : > { %v2298_v7 = vpop.eup %2297  ;;  %2301 = vrcp.f32 %v2759_v5  ;;  %v834_v15 = vsel %vm2789_vm6, %v2722_v40, %v830_v22  ;;  %v838_v36 = vor.u32 1.1754944e-38, %v837_v23  ;;  %v375_v47 = vmul.f32 %v2609_v0, %v2108_v37 }
  0x40   : > { %v2777_v18 = vadd.f32 1.0, %v2298_v7  ;;  %2303 = vpow2.f32 %v2025_v6  ;;  %v2300_v19 = vpop.eup %2299  ;;  %v843_v20 = vsub.f32 1.0, %v842_v14  ;;  %v2804_v11 = vadd.f32 %v2614_v4, %v374_v27 }
  0x41   : > { %v2797_v29 = vadd.f32 1.0, %v2300_v19  ;;  %vm846_vm8 = vweird.f32 %v2720_v39  ;;  %vm847_vm9 = vweird.f32 %v2756_v2  ;;  %v839_v40 = vsel %vm2799_vm7, %v838_v36, %v834_v15 }
  0x42   : > { %2305 = vrcp.f32 %v2777_v18  ;;  %v844_v41 = vmul.f32 %v2756_v2, %v843_v20  ;;  %v2026_v46 = vmul.f32 -1.442695, %v2804_v11  ;;  %v850_v48 = vand.u32 2147483647, %v2720_v39  ;;  %vm2832_vm10 = vmor %vm846_vm8, %vm847_vm9 }
  0x43   : > { %2307 = vrcp.f32 %v2797_v29  ;;  %v852_v49 = vand.u32 2147483648, %v2720_v39  ;;  %v2830_v54 = vadd.f32 %v2614_v4, %v375_v47  ;;  %v1716_v39 = vmul.f32 %v839_v40, %v2644_v32 }
  0x44   : > { %1777 = vxpose.xlu0.b32.cont [3/16] (narrow) %v1713_v52, 8  ;;  %2309 = vpow2.f32 %v2026_v46  ;;  %v845_v51 = vadd.f32 %v2756_v2, %v844_v41  ;;  %v2109_v59 = vunpack.c.h.bf16 %v2215_v33  ;;  %vm851_vm11 = vcmp.eq.f32.partialorder %v850_v48, 8.507059e+37 }
  0x45   : > { %v2795_v28 = vpop.eup %2301  ;;  %v2027_v38 = vmul.f32 -1.442695, %v2830_v54  ;;  %v853_v58 = vor.u32 1.1754944e-38, %v852_v49  ;;  %vm861_vm12 = vweird.f32 %v2759_v5  ;;  %v867_v32 = vand.u32 2147483648, %v2759_v5 }
  0x46   : > { %v2304_v30 = vpop.eup %2303  ;;  %v857_v42 = vmul.f32 %v2795_v28, %v2759_v5  ;;  %v849_v60 = vsel %vm2832_vm10, %v2756_v2, %v845_v51  ;;  %v376_v3 = vmul.f32 %v2609_v0, %v2109_v59  ;;  %vm862_vm13 = vweird.f32 %v2795_v28 }
  0x47   : > { %v2814_v45 = vadd.f32 1.0, %v2304_v30  ;;  %v854_v7 = vsel %vm851_vm11, %v853_v58, %v849_v60  ;;  %vm2858_vm14 = vmor %vm861_vm12, %vm862_vm13  ;;  %v868_v19 = vor.u32 1.1754944e-38, %v867_v32  ;;  %vm876_vm15 = vweird.f32 %v2777_v18 }
  0x48   : > { %v2819_v24 = vpop.eup %2305  ;;  %v858_v52 = vsub.f32 1.0, %v857_v42  ;;  %v2867_v14 = vadd.f32 %v2614_v4, %v376_v3  ;;  %v1717_v17 = vmul.f32 %v854_v7, %v2661_v50  ;;  %v2112_v25 = vunpack.c.l.bf16 %v2216_v21 }
  0x49   : > { %2311 = vrcp.f32 %v2814_v45  ;;  %v872_v56 = vmul.f32 %v2819_v24, %v2777_v18  ;;  %v2839_v57 = vpop.eup %2307  ;;  %vm877_vm0 = vweird.f32 %v2819_v24  ;;  %v880_v20 = vand.u32 2147483647, %v2777_v18 }
  0x4a   : > { %v2310_v16 = vpop.eup %2309  ;;  %v859_v63 = vmul.f32 %v2795_v28, %v858_v52  ;;  %2313 = vpow2.f32 %v2027_v38  ;;  %v887_v2 = vmul.f32 %v2839_v57, %v2797_v29  ;;  %v2028_v23 = vmul.f32 -1.442695, %v2867_v14  ;;  %vm2886_vm2 = vmor %vm876_vm15, %vm877_vm0 }
  0x4b   : > { %v873_v1 = vsub.f32 1.0, %v872_v56  ;;  %v2846_v62 = vadd.f32 1.0, %v2310_v16  ;;  %v882_v50 = vand.u32 2147483648, %v2777_v18  ;;  %v377_v31 = vmul.f32 %v2609_v0, %v2112_v25 }
  0x4c   : > { %1778 = vxpose.xlu0.b32.cont [4/16] (narrow) %v1714_v9, 8  ;;  %v860_v8 = vadd.f32 %v2795_v28, %v859_v63  ;;  %v865_v9 = vand.u32 2147483647, %v2759_v5  ;;  %v888_v5 = vsub.f32 1.0, %v887_v2  ;;  %vm891_vm3 = vweird.f32 %v2797_v29 }
  0x4d   : > { %v874_v12 = vmul.f32 %v2819_v24, %v873_v1  ;;  %2315 = vrcp.f32 %v2846_v62  ;;  %v2895_v37 = vadd.f32 %v2614_v4, %v377_v31  ;;  %v883_v41 = vor.u32 1.1754944e-38, %v882_v50  ;;  %v3026_v1 = vld [vmem:[%s2606_s26 + $0x80] sm:$0xff]  }
  0x4e   : > { %v864_v26 = vsel %vm2858_vm14, %v2795_v28, %v860_v8  ;;  %vm866_vm1 = vcmp.eq.f32.partialorder %v865_v9, 8.507059e+37  ;;  %v889_v28 = vmul.f32 %v2839_v57, %v888_v5  ;;  %vm892_vm4 = vweird.f32 %v2839_v57 }
  0x4f   : > { %v2849_v6 = vpop.eup %2311  ;;  %v875_v27 = vadd.f32 %v2819_v24, %v874_v12  ;;  %v869_v36 = vsel %vm866_vm1, %v868_v19, %v864_v26  ;;  %vm881_vm5 = vcmp.eq.f32.partialorder %v880_v20, 8.507059e+37  ;;  %v2029_v47 = vmul.f32 -1.442695, %v2895_v37  ;;  %vm2911_vm6 = vmor %vm891_vm3, %vm892_vm4 }
  0x50   : > { %v902_v13 = vmul.f32 %v2849_v6, %v2814_v45  ;;  %v2314_v53 = vpop.eup %2313  ;;  %v1718_v40 = vmul.f32 %v869_v36, %v2713_v35  ;;  %v890_v48 = vadd.f32 %v2839_v57, %v889_v28  ;;  %v895_v49 = vand.u32 2147483647, %v2797_v29 }
  0x51   : > { %v2873_v22 = vadd.f32 1.0, %v2314_v53  ;;  %v879_v42 = vsel %vm2886_vm2, %v2819_v24, %v875_v27  ;;  %vm906_vm7 = vweird.f32 %v2814_v45  ;;  %vm907_vm8 = vweird.f32 %v2849_v6  ;;  %v2233_v53 = vld [vmem:[%s2606_s26 + $0xc0] sm:$0xff]  }
  0x52   : > { %v903_v30 = vsub.f32 1.0, %v902_v13  ;;  %v2113_v24 = vunpack.c.h.bf16 %v2216_v21  ;;  %v884_v38 = vsel %vm881_vm5, %v883_v41, %v879_v42  ;;  %v910_v35 = vand.u32 2147483647, %v2814_v45  ;;  %vm2930_vm10 = vmor %vm906_vm7, %vm907_vm8  ;;  %v2217_v13 = vld [vmem:[%s2606_s26 + $0x40] sm:$0xff]  }
  0x53   : > { %2317 = vrcp.f32 %v2873_v22  ;;  %v2892_v15 = vpop.eup %2315  ;;  %v912_v59 = vand.u32 2147483648, %v2814_v45  ;;  %v894_v63 = vsel %vm2911_vm6, %v2839_v57, %v890_v48  ;;  %vm896_vm9 = vcmp.eq.f32.partialorder %v895_v49, 8.507059e+37 }
  0x54   : > { %1779 = vxpose.xlu0.b32.cont [5/16] (narrow) %v1715_v34, 8  ;;  %v897_v34 = vand.u32 2147483648, %v2797_v29  ;;  %2319 = vpow2.f32 %v2028_v23  ;;  %v917_v18 = vmul.f32 %v2892_v15, %v2846_v62  ;;  %v904_v46 = vmul.f32 %v2849_v6, %v903_v30 }
  0x55   : > { %2321 = vpow2.f32 %v2029_v47  ;;  %v378_v60 = vmul.f32 %v2609_v0, %v2113_v24  ;;  %v1719_v3 = vmul.f32 %v884_v38, %v2726_v43  ;;  %vm2943_vm11 = vcmp.eq.f32.partialorder %v910_v35, 8.507059e+37 }
  0x56   : > { %v898_v51 = vor.u32 1.1754944e-38, %v897_v34  ;;  %v905_v58 = vadd.f32 %v2849_v6, %v904_v46  ;;  %v913_v10 = vor.u32 1.1754944e-38, %v912_v59  ;;  %vm921_vm12 = vweird.f32 %v2846_v62 }
  0x57   : > { %v2938_v7 = vadd.f32 %v2614_v4, %v378_v60  ;;  %vm922_vm13 = vweird.f32 %v2892_v15  ;;  %v927_v19 = vand.u32 2147483648, %v2846_v62  ;;  %v2180_v5 = vunpack.c.l.bf16 %v2233_v53 }
  0x58   : > { %v899_v8 = vsel %vm896_vm9, %v898_v51, %v894_v63  ;;  %v909_v45 = vsel %vm2930_vm10, %v2849_v6, %v905_v58  ;;  %v2116_v6 = vunpack.c.l.bf16 %v2217_v13  ;;  %vm2961_vm14 = vmor %vm921_vm12, %vm922_vm13  ;;  %v940_v26 = vand.u32 2147483647, %v2873_v22 }
  0x59   : > { %v2909_v52 = vpop.eup %2317  ;;  %v2030_v12 = vmul.f32 -1.442695, %v2938_v7  ;;  %v1720_v27 = vmul.f32 %v899_v8, %v2729_v44  ;;  %v914_v30 = vsel %vm2943_vm11, %v913_v10, %v909_v45  ;;  %vm936_vm15 = vweird.f32 %v2873_v22 }
  0x5a   : > { %v2320_v56 = vpop.eup %2319  ;;  %v932_v29 = vmul.f32 %v2909_v52, %v2873_v22  ;;  %v379_v20 = vmul.f32 %v2609_v0, %v2116_v6  ;;  %vm937_vm0 = vweird.f32 %v2909_v52  ;;  %v928_v33 = vor.u32 1.1754944e-38, %v927_v19 }
  0x5b   : > { %v2922_v16 = vadd.f32 1.0, %v2320_v56  ;;  %v2322_v57 = vpop.eup %2321  ;;  %v942_v28 = vand.u32 2147483648, %v2873_v22  ;;  %vm2993_vm2 = vmor %vm936_vm15, %vm937_vm0  ;;  %vm2997_vm3 = vcmp.eq.f32.partialorder %v940_v26, 8.507059e+37  ;;  %v2181_v56 = vunpack.c.h.bf16 %v2233_v53 }
  0x5c   : > { %1780 = vxpose.xlu0.b32.cont [6/16] (narrow) %v1716_v39, 8  ;;  %v918_v39 = vsub.f32 1.0, %v917_v18  ;;  %v933_v2 = vsub.f32 1.0, %v932_v29  ;;  %v2949_v43 = vadd.f32 1.0, %v2322_v57  ;;  %v2988_v41 = vadd.f32 %v2614_v4, %v379_v20 }
  0x5d   : > { %2323 = vrcp.f32 %v2922_v16  ;;  %vm951_vm4 = vweird.f32 %v2922_v16  ;;  %v2117_v38 = vunpack.c.h.bf16 %v2217_v13 }
  0x5e   : > { %v919_v32 = vmul.f32 %v2892_v15, %v918_v39  ;;  %v934_v23 = vmul.f32 %v2909_v52, %v933_v2  ;;  %2325 = vrcp.f32 %v2949_v43  ;;  %v2031_v48 = vmul.f32 -1.442695, %v2988_v41 }
  0x5f   : > { %2327 = vpow2.f32 %v2030_v12  ;;  %v943_v39 = vor.u32 1.1754944e-38, %v942_v28  ;;  %v380_v63 = vmul.f32 %v2609_v0, %v2117_v38  ;;  %vm966_vm8 = vweird.f32 %v2949_v43 }
  0x60   : > { %v2957_v21 = vadd.f32 %v2892_v15, %v919_v32  ;;  %v935_v36 = vadd.f32 %v2909_v52, %v934_v23  ;;  %2329 = vpow2.f32 %v2031_v48  ;;  %v970_v8 = vand.u32 2147483647, %v2949_v43 }
  0x61   : > { %v972_v45 = vand.u32 2147483648, %v2949_v43  ;;  %v3044_v9 = vadd.f32 %v2614_v4, %v380_v63  ;;  %v2149_v48 = vunpack.c.h.bf16 %v3026_v1 }
  0x62   : > { %v924_v44 = vsel %vm2961_vm14, %v2892_v15, %v2957_v21  ;;  %v955_v15 = vand.u32 2147483647, %v2922_v16  ;;  %v939_v35 = vsel %vm2993_vm2, %v2909_v52, %v935_v36  ;;  %v3062_v21 = vld [vmem:[%s2606_s26 + $0x48] sm:$0xff]   ;;  %vm3066_vm11 = vcmp.eq.f32.partialorder %v970_v8, 8.507059e+37 }
  0x63   : > { %v2968_v50 = vpop.eup %2323  ;;  %v2120_v31 = vunpack.c.l.bf16 %v3062_v21 }
  0x64   : > { %1781 = vxpose.xlu0.b32.cont [7/16] (narrow) %v1717_v17, 8  ;;  %v925_v17 = vand.u32 2147483647, %v2846_v62  ;;  %v411_v62 = vmul.f32 %v2609_v0, %v2180_v5  ;;  %v947_v34 = vmul.f32 %v2968_v50, %v2922_v16  ;;  %v3003_v47 = vpop.eup %2325  ;;  %vm952_vm5 = vweird.f32 %v2968_v50 }
  0x65   : > { %v2328_v51 = vpop.eup %2327  ;;  %v962_v24 = vmul.f32 %v3003_v47, %v2949_v43  ;;  %vm3020_vm6 = vmor %vm951_vm4, %vm952_vm5  ;;  %vm3028_vm7 = vcmp.eq.f32.partialorder %v955_v15, 8.507059e+37  ;;  %vm967_vm9 = vweird.f32 %v3003_v47  ;;  %v944_v43 = vsel %vm2997_vm3, %v943_v39, %v939_v35 }
  0x66   : > { %vm2975_vm1 = vcmp.eq.f32.partialorder %v925_v17, 8.507059e+37  ;;  %v2991_v18 = vadd.f32 %v2614_v4, %v411_v62  ;;  %v948_v46 = vsub.f32 1.0, %v947_v34  ;;  %v3015_v29 = vadd.f32 1.0, %v2328_v51  ;;  %v2330_v53 = vpop.eup %2329  ;;  %vm3056_vm10 = vmor %vm966_vm8, %vm967_vm9  ;;  %v3076_v62 = vld [vmem:[%s2606_s26 + $0xc8] sm:$0xff]  }
  0x67   : > { %v963_v60 = vsub.f32 1.0, %v962_v24  ;;  %v1721_v17 = vmul.f32 %v914_v30, %v2753_v61  ;;  %v929_v19 = vsel %vm2975_vm1, %v928_v33, %v924_v44  ;;  %v2032_v5 = vmul.f32 -1.442695, %v3044_v9 }
  0x68   : > { %v2063_v49 = vmul.f32 -1.442695, %v2991_v18  ;;  %v949_v55 = vmul.f32 %v2968_v50, %v948_v46  ;;  %v3070_v26 = vadd.f32 1.0, %v2330_v53  ;;  %v381_v36 = vmul.f32 %v2609_v0, %v2120_v31 }
  0x69   : > { %v964_v2 = vmul.f32 %v3003_v47, %v963_v60  ;;  %v2184_v42 = vunpack.c.l.bf16 %v3076_v62  ;;  %v1722_v22 = vmul.f32 %v929_v19, %v2804_v11  ;;  %v3096_v15 = vmul.f32 %v944_v43, %v2830_v54 }
  0x6a   : > { %v950_v58 = vadd.f32 %v2968_v50, %v949_v55  ;;  %2331 = vpow2.f32 %v2063_v49  ;;  %v985_v54 = vand.u32 2147483647, %v3015_v29  ;;  %vm981_vm12 = vweird.f32 %v3015_v29 }
  0x6b   : > { %2333 = vrcp.f32 %v3015_v29  ;;  %v965_v10 = vadd.f32 %v3003_v47, %v964_v2  ;;  %v396_v60 = vmul.f32 %v2609_v0, %v2149_v48  ;;  %vm996_vm0 = vweird.f32 %v3070_v26 }
  0x6c   : > { %1782 = vxpose.xlu0.b32.cont [8/16] (narrow) %v1718_v40, 8  ;;  %v957_v40 = vand.u32 2147483648, %v2922_v16  ;;  %v2148_v16 = vunpack.c.l.bf16 %v3026_v1  ;;  %v954_v57 = vsel %vm3020_vm6, %v2968_v50, %v950_v58  ;;  %2335 = vpow2.f32 %v2032_v5 }
  0x6d   : > { %v969_v33 = vsel %vm3056_vm10, %v3003_v47, %v965_v10  ;;  %2337 = vrcp.f32 %v3070_v26  ;;  %v3099_v47 = vadd.f32 %v2614_v4, %v381_v36  ;;  %vm3136_vm15 = vcmp.eq.f32.partialorder %v985_v54, 8.507059e+37 }
  0x6e   : > { %v958_v32 = vor.u32 1.1754944e-38, %v957_v40  ;;  %v395_v13 = vmul.f32 %v2609_v0, %v2148_v16  ;;  %v413_v40 = vmul.f32 %v2609_v0, %v2184_v42  ;;  %v1000_v8 = vand.u32 2147483647, %v3070_v26 }
  0x6f   : > { %v2033_v24 = vmul.f32 -1.442695, %v3099_v47  ;;  %v1002_v10 = vand.u32 2147483648, %v3070_v26  ;;  %v3144_v53 = vadd.f32 %v2614_v4, %v396_v60 }
  0x70   : > { %v2332_v23 = vpop.eup %2331  ;;  %v959_v25 = vsel %vm3028_vm7, %v958_v32, %v954_v57  ;;  %v3073_v20 = vadd.f32 %v2614_v4, %v395_v13  ;;  %vm3153_vm3 = vcmp.eq.f32.partialorder %v1000_v8, 8.507059e+37 }
  0x71   : > { %v3078_v50 = vpop.eup %2333  ;;  %v3080_v30 = vadd.f32 1.0, %v2332_v23  ;;  %v3104_v49 = vmul.f32 %v959_v25, %v2867_v14  ;;  %v987_v14 = vand.u32 2147483648, %v3015_v29  ;;  %v1003_v23 = vor.u32 1.1754944e-38, %v1002_v10 }
  0x72   : > { %v977_v28 = vmul.f32 %v3078_v50, %v3015_v29  ;;  %v2047_v44 = vmul.f32 -1.442695, %v3073_v20  ;;  %v2336_v11 = vpop.eup %2335  ;;  %vm982_vm13 = vweird.f32 %v3078_v50  ;;  %v2121_v29 = vunpack.c.h.bf16 %v3062_v21 }
  0x73   : > { %2339 = vrcp.f32 %v3080_v30  ;;  %v2338_v38 = vpop.eup %2337  ;;  %v3117_v35 = vadd.f32 1.0, %v2336_v11  ;;  %vm3132_vm14 = vmor %vm981_vm12, %vm982_vm13  ;;  %v988_v57 = vor.u32 1.1754944e-38, %v987_v14  ;;  %vm1476_vm4 = vweird.f32 %v3080_v30 }
  0x74   : > { %1783 = vxpose.xlu0.b32.cont [9/16] (narrow) %v1719_v3, 8  ;;  %v412_v3 = vmul.f32 %v2609_v0, %v2181_v56  ;;  %v978_v46 = vsub.f32 1.0, %v977_v28  ;;  %v3112_v56 = vadd.f32 %v2614_v4, %v413_v40  ;;  %v992_v58 = vmul.f32 %v2338_v38, %v3070_v26 }
  0x75   : > { %vm997_vm1 = vweird.f32 %v2338_v38  ;;  %v382_v6 = vmul.f32 %v2609_v0, %v2121_v29  ;;  %v1482_v28 = vand.u32 2147483648, %v3080_v30  ;;  %vm1011_vm7 = vweird.f32 %v3117_v35 }
  0x76   : > { %v3048_v12 = vadd.f32 %v2614_v4, %v412_v3  ;;  %v979_v55 = vmul.f32 %v3078_v50, %v978_v46  ;;  %v2065_v59 = vmul.f32 -1.442695, %v3112_v56  ;;  %v993_v32 = vsub.f32 1.0, %v992_v58  ;;  %vm3149_vm2 = vmor %vm996_vm0, %vm997_vm1 }
  0x77   : > { %v3190_v48 = vadd.f32 %v2614_v4, %v382_v6  ;;  %v1017_v11 = vand.u32 2147483648, %v3117_v35  ;;  %v2185_v4 = vunpack.c.h.bf16 %v3076_v62 }
  0x78   : > { %v2064_v34 = vmul.f32 -1.442695, %v3048_v12  ;;  %v980_v63 = vadd.f32 %v3078_v50, %v979_v55 }
  0x79   : > { %v3119_v39 = vpop.eup %2339  ;;  %v1018_v58 = vor.u32 1.1754944e-38, %v1017_v11 }
  0x7a   : > { %2341 = vpow2.f32 %v2064_v34  ;;  %v1472_v1 = vmul.f32 %v3119_v39, %v3080_v30  ;;  %vm1477_vm5 = vweird.f32 %v3119_v39 }
  0x7b   : > { %2343 = vpow2.f32 %v2047_v44  ;;  %vm3184_vm6 = vmor %vm1476_vm4, %vm1477_vm5 }
  0x7c   : > { %1784 = vxpose.xlu0.b32.cont [10/16] (narrow) %v1720_v27, 8  ;;  %v973_v27 = vor.u32 1.1754944e-38, %v972_v45  ;;  %2345 = vpow2.f32 %v2033_v24  ;;  %v994_v45 = vmul.f32 %v2338_v38, %v993_v32  ;;  %v1473_v13 = vsub.f32 1.0, %v1472_v1 }
  0x7d   : > { %2347 = vrcp.f32 %v3117_v35  ;;  %v1483_v24 = vor.u32 1.1754944e-38, %v1482_v28 }
  0x7e   : > { %v974_v51 = vsel %vm3066_vm11, %v973_v27, %v969_v33  ;;  %2349 = vpow2.f32 %v2065_v59  ;;  %v995_v21 = vadd.f32 %v2338_v38, %v994_v45  ;;  %v1474_v25 = vmul.f32 %v3119_v39, %v1473_v13 }
  0x7f   : > { %v3130_v52 = vmul.f32 %v974_v51, %v2895_v37  ;;  %v1015_v51 = vand.u32 2147483647, %v3117_v35  ;;  %v2034_v59 = vmul.f32 -1.442695, %v3190_v48 }
  0x80   : > { %v2342_v2 = vpop.eup %2341  ;;  %v999_v0 = vsel %vm3149_vm2, %v2338_v38, %v995_v21  ;;  %v3176_v36 = vadd.f32 %v3119_v39, %v1474_v25 }
  0x81   : > { %v2344_v37 = vpop.eup %2343  ;;  %v3160_v61 = vadd.f32 1.0, %v2342_v2  ;;  %v1004_v44 = vsel %vm3153_vm3, %v1003_v23, %v999_v0  ;;  %vm1016_vm11 = vcmp.eq.f32.partialorder %v1015_v51, 8.507059e+37 }
  0x82   : > { %v2346_v5 = vpop.eup %2345  ;;  %v3164_v27 = vadd.f32 1.0, %v2344_v37 }
  0x83   : > { %v2348_v26 = vpop.eup %2347  ;;  %v3166_v31 = vadd.f32 1.0, %v2346_v5  ;;  %2351 = vrcp.f32 %v3160_v61  ;;  %vm1491_vm12 = vweird.f32 %v3160_v61 }
  0x84   : > { %1785 = vxpose.xlu0.b32.cont [11/16] (narrow) %v1721_v17, 8  ;;  %v984_v17 = vsel %vm3132_vm14, %v3078_v50, %v980_v63  ;;  %v1480_v50 = vand.u32 2147483647, %v3080_v30  ;;  %v2350_v33 = vpop.eup %2349  ;;  %v1007_v34 = vmul.f32 %v2348_v26, %v3117_v35  ;;  %2353 = vrcp.f32 %v3164_v27 }
  0x85   : > { %v3179_v42 = vadd.f32 1.0, %v2350_v33  ;;  %2355 = vrcp.f32 %v3166_v31  ;;  %vm1012_vm8 = vweird.f32 %v2348_v26  ;;  %v3198_v30 = vsel %vm3136_vm15, %v988_v57, %v984_v17 }
  0x86   : > { %v1008_v40 = vsub.f32 1.0, %v1007_v34  ;;  %vm3206_vm9 = vcmp.eq.f32.partialorder %v1480_v50, 8.507059e+37  ;;  %vm3210_vm10 = vmor %vm1011_vm7, %vm1012_vm8  ;;  %v1495_v63 = vand.u32 2147483647, %v3160_v61  ;;  %vm1236_vm13 = vweird.f32 %v3164_v27 }
  0x87   : > { %2357 = vrcp.f32 %v3179_v42  ;;  %v1240_v2 = vand.u32 2147483647, %v3164_v27  ;;  %v1242_v57 = vand.u32 2147483648, %v3164_v27  ;;  %v1497_v17 = vand.u32 2147483648, %v3160_v61 }
  0x88   : > { %v1009_v55 = vmul.f32 %v2348_v26, %v1008_v40  ;;  %vm1026_vm0 = vweird.f32 %v3166_v31  ;;  %v1032_v23 = vand.u32 2147483648, %v3166_v31  ;;  %vm3259_vm5 = vcmp.eq.f32.partialorder %v1495_v63, 8.507059e+37 }
  0x89   : > { %v3215_v14 = vpop.eup %2351  ;;  %v1243_v21 = vor.u32 1.1754944e-38, %v1242_v57  ;;  %vm1241_vm4 = vcmp.eq.f32.partialorder %v1240_v2, 8.507059e+37  ;;  %vm1506_vm7 = vweird.f32 %v3179_v42  ;;  %v1498_v46 = vor.u32 1.1754944e-38, %v1497_v17 }
  0x8a   : > { %v1010_v35 = vadd.f32 %v2348_v26, %v1009_v55  ;;  %v2354_v60 = vpop.eup %2353  ;;  %vm1492_vm15 = vweird.f32 %v3215_v14  ;;  %v1033_v34 = vor.u32 1.1754944e-38, %v1032_v23  ;;  %v1512_v11 = vand.u32 2147483648, %v3179_v42 }
  0x8b   : > { %v2356_v1 = vpop.eup %2355  ;;  %v1232_v3 = vmul.f32 %v2354_v60, %v3164_v27  ;;  %vm1237_vm14 = vweird.f32 %v2354_v60  ;;  %vm3255_vm3 = vmor %vm1491_vm12, %vm1492_vm15 }
  0x8c   : > { %1786 = vxpose.xlu0.b32.cont [12/16] (narrow) %v1722_v22, 8  ;;  %v1727_v22 = vmul.f32 %v1004_v44, %v2988_v41  ;;  %v2048_v41 = vmul.f32 -1.442695, %v3144_v53  ;;  %v1014_v29 = vsel %vm3210_vm10, %v2348_v26, %v1010_v35  ;;  %v1022_v45 = vmul.f32 %v2356_v1, %v3166_v31  ;;  %vm3242_vm2 = vmor %vm1236_vm13, %vm1237_vm14 }
  0x8d   : > { %v1019_v16 = vsel %vm1016_vm11, %v1018_v58, %v1014_v29  ;;  %v1233_v37 = vsub.f32 1.0, %v1232_v3  ;;  %v3230_v10 = vpop.eup %2357  ;;  %vm1027_vm1 = vweird.f32 %v2356_v1  ;;  %v1726_v35 = vmul.f32 %v3198_v30, %v2938_v7  ;;  %v2219_v7 = vld [vmem:[%s2606_s26 + $0x50] sm:$0xff]  }
  0x8e   : > { %1807 = vxpose.xlu1.b32.start [1/16] (narrow) %v1727_v22, 8  ;;  %2359 = vpow2.f32 %v2048_v41  ;;  %v1728_v8 = vmul.f32 %v1019_v16, %v3044_v9  ;;  %v1023_v43 = vsub.f32 1.0, %v1022_v45  ;;  %v1030_v9 = vand.u32 2147483647, %v3166_v31  ;;  %v2235_v30 = vld [vmem:[%s2606_s26 + $0xd0] sm:$0xff]  }
  0x8f   : > { %2361 = vpow2.f32 %v2034_v59  ;;  %v1234_v19 = vmul.f32 %v2354_v60, %v1233_v37  ;;  %v1502_v25 = vmul.f32 %v3230_v10, %v3179_v42  ;;  %v1510_v59 = vand.u32 2147483647, %v3179_v42  ;;  %v3333_v16 = vld [vmem:[%s2606_s26 + $0x90] sm:$0xff]  }
  0x90   : > { %v1024_v33 = vmul.f32 %v2356_v1, %v1023_v43  ;;  %vm1031_vm8 = vcmp.eq.f32.partialorder %v1030_v9, 8.507059e+37  ;;  %v1513_v42 = vor.u32 1.1754944e-38, %v1512_v11  ;;  %v2188_v37 = vunpack.c.l.bf16 %v2235_v30 }
  0x91   : > { %v1235_v27 = vadd.f32 %v2354_v60, %v1234_v19  ;;  %v1503_v44 = vsub.f32 1.0, %v1502_v25  ;;  %vm3335_vm13 = vcmp.eq.f32.partialorder %v1510_v59, 8.507059e+37  ;;  %v2125_v43 = vunpack.c.h.bf16 %v2219_v7 }
  0x92   : > { %v1025_v22 = vadd.f32 %v2356_v1, %v1024_v33 }
  0x93   : > { %v1504_v51 = vmul.f32 %v3230_v10, %v1503_v44 }
  0x94   : > { %1787 = vxpose.xlu0.b32.cont [13/16] (narrow) %v3096_v15, 8  ;;  %v1479_v15 = vsel %vm3184_vm6, %v3119_v39, %v3176_v36  ;;  %v1487_v39 = vmul.f32 %v3215_v14, %v3160_v61  ;;  %v2360_v6 = vpop.eup %2359  ;;  %vm3265_vm6 = vmor %vm1026_vm0, %vm1027_vm1  ;;  %v1239_v36 = vsel %vm3242_vm2, %v2354_v60, %v1235_v27  ;;  %v2226_v60 = vld [vmem:[%s2606_s26 + $0x88] sm:$0xff]  }
  0x95   : > { %v1484_v26 = vsel %vm3206_vm9, %v1483_v24, %v1479_v15  ;;  %v2362_v61 = vpop.eup %2361  ;;  %vm1507_vm9 = vweird.f32 %v3230_v10  ;;  %v1244_v40 = vsel %vm1241_vm4, %v1243_v21, %v1239_v36  ;;  %v1029_v55 = vsel %vm3265_vm6, %v2356_v1, %v1025_v22  ;;  %v3327_v1 = vld [vmem:[%s2601_s23] ss:$0 sm:$0xff] }
  0x96   : > { %v1488_v32 = vsub.f32 1.0, %v1487_v39  ;;  %1808 = vxpose.xlu1.b32.cont [2/16] (narrow) %v1728_v8, 8  ;;  %v1743_v41 = vmul.f32 %v1244_v40, %v3073_v20  ;;  %v3281_v15 = vadd.f32 1.0, %v2360_v6  ;;  %v1034_v54 = vsel %vm1031_vm8, %v1033_v34, %v1029_v55  ;;  %vm3289_vm10 = vmor %vm1506_vm7, %vm1507_vm9 }
  0x97   : > { %v3285_v24 = vadd.f32 %v3230_v10, %v1504_v51  ;;  %v3293_v38 = vadd.f32 1.0, %v2362_v61  ;;  %v1729_v58 = vmul.f32 %v1034_v54, %v3099_v47  ;;  %v3308_v39 = vmul.f32 %v1484_v26, %v2991_v18 }
  0x98   : > { %v1489_v13 = vmul.f32 %v3215_v14, %v1488_v32  ;;  %1839 = vxpose.xlu2.b32.start [1/16] (narrow) %v1743_v41, 8  ;;  %2363 = vrcp.f32 %v3281_v15  ;;  %v1255_v62 = vand.u32 2147483647, %v3281_v15  ;;  %vm1251_vm11 = vweird.f32 %v3281_v15  ;;  %v3420_v32 = vld [vmem:[%s2606_s26 + $0xd8] sm:$0xff]  }
  0x99   : > { %2365 = vrcp.f32 %v3293_v38  ;;  %v1509_v18 = vsel %vm3289_vm10, %v3230_v10, %v3285_v24  ;;  %vm1041_vm12 = vweird.f32 %v3293_v38  ;;  %v1045_v63 = vand.u32 2147483647, %v3293_v38 }
  0x9a   : > { %v1490_v5 = vadd.f32 %v3215_v14, %v1489_v13  ;;  %v2152_v3 = vunpack.c.l.bf16 %v2226_v60  ;;  %v1047_v57 = vand.u32 2147483648, %v3293_v38  ;;  %v2124_v8 = vunpack.c.l.bf16 %v2219_v7 }
  0x9b   : > { %vm3340_vm14 = vcmp.eq.f32.partialorder %v1255_v62, 8.507059e+37  ;;  %v2153_v19 = vunpack.c.h.bf16 %v2226_v60  ;;  %v2156_v21 = vunpack.c.l.bf16 %v3333_v16 }
  0x9c   : > { %1788 = vxpose.xlu0.b32.cont [14/16] (narrow) %v3104_v49, 8  ;;  %v1494_v31 = vsel %vm3255_vm3, %v3215_v14, %v1490_v5  ;;  %v3296_v14 = vld [vmem:[%s2595_s19] ss:$0 sm:$0xff]  ;;  %v2189_v49 = vunpack.c.h.bf16 %v2235_v30  ;;  %v1048_v11 = vor.u32 1.1754944e-38, %v1047_v57  ;;  %vm1046_vm3 = vcmp.eq.f32.partialorder %v1045_v63, 8.507059e+37 }
  0x9d   : > { %v3317_v47 = vsel %vm3259_vm5, %v1498_v46, %v1494_v31  ;;  %v397_v17 = vmul.f32 %v3296_v14, %v2152_v3  ;;  %v383_v6 = vmul.f32 %v3296_v14, %v2124_v8  ;;  %v415_v5 = vmul.f32 %v3296_v14, %v2188_v37  ;;  %v3417_v3 = vld [vmem:[%s2606_s26 + $0x58] sm:$0xff]  }
  0x9e   : > { %1809 = vxpose.xlu1.b32.cont [3/16] (narrow) %v1729_v58, 8  ;;  %v2364_v9 = vpop.eup %2363  ;;  %v398_v34 = vmul.f32 %v3296_v14, %v2153_v19  ;;  %v384_v44 = vmul.f32 %v3296_v14, %v2125_v43  ;;  %v416_v31 = vmul.f32 %v3296_v14, %v2189_v49  ;;  %v399_v59 = vmul.f32 %v3296_v14, %v2156_v21 }
  0x9f   : > { %v2366_v23 = vpop.eup %2365  ;;  %v1247_v25 = vmul.f32 %v2364_v9, %v3281_v15  ;;  %vm1252_vm15 = vweird.f32 %v2364_v9  ;;  %v3351_v26 = vadd.f32 %v3327_v1, %v397_v17  ;;  %v3355_v27 = vadd.f32 %v3327_v1, %v383_v6 }
  0xa0   : > { %v1037_v50 = vmul.f32 %v2366_v23, %v3293_v38  ;;  %vm1042_vm0 = vweird.f32 %v2366_v23  ;;  %v3358_v33 = vadd.f32 %v3327_v1, %v415_v5  ;;  %v3367_v40 = vadd.f32 %v3327_v1, %v398_v34  ;;  %vm3375_vm1 = vmor %vm1251_vm11, %vm1252_vm15 }
  0xa1   : > { %v1248_v0 = vsub.f32 1.0, %v1247_v25  ;;  %v2049_v28 = vmul.f32 -1.442695, %v3351_v26  ;;  %v2035_v36 = vmul.f32 -1.442695, %v3355_v27  ;;  %v3370_v51 = vadd.f32 %v3327_v1, %v384_v44  ;;  %vm3385_vm2 = vmor %vm1041_vm12, %vm1042_vm0 }
  0xa2   : > { %v1038_v61 = vsub.f32 1.0, %v1037_v50  ;;  %v2067_v22 = vmul.f32 -1.442695, %v3358_v33  ;;  %v3380_v54 = vadd.f32 %v3327_v1, %v416_v31  ;;  %v1514_v38 = vsel %vm3335_vm13, %v1513_v42, %v1509_v18 }
  0xa3   : > { %v1249_v46 = vmul.f32 %v2364_v9, %v1248_v0  ;;  %v1760_v10 = vmul.f32 %v3317_v47, %v3048_v12  ;;  %v3414_v42 = vadd.f32 %v3327_v1, %v399_v59  ;;  %v3423_v57 = vmul.f32 %v1514_v38, %v3112_v56 }
  0xa4   : > { %1789 = vxpose.xlu0.b32.cont [15/16] (narrow) %v3130_v52, 8  ;;  %v414_v52 = vmul.f32 %v3296_v14, %v2185_v4  ;;  %v1257_v4 = vand.u32 2147483648, %v3281_v15  ;;  %v1039_v55 = vmul.f32 %v2366_v23, %v1038_v61  ;;  %v2050_v15 = vmul.f32 -1.442695, %v3367_v40 }
  0xa5   : > { %v2068_v30 = vmul.f32 -1.442695, %v3380_v54  ;;  %v2051_v43 = vmul.f32 -1.442695, %v3414_v42 }
  0xa6   : > { %v3330_v29 = vadd.f32 %v3327_v1, %v414_v52  ;;  %v1258_v2 = vor.u32 1.1754944e-38, %v1257_v4  ;;  %v1040_v60 = vadd.f32 %v2366_v23, %v1039_v55  ;;  %v2036_v4 = vmul.f32 -1.442695, %v3370_v51 }
  0xa8   : > { %v2066_v13 = vmul.f32 -1.442695, %v3330_v29 }
  0xaa   : > { %2367 = vpow2.f32 %v2066_v13  ;;  %v2128_v13 = vunpack.c.l.bf16 %v3417_v3 }
  0xab   : > { %2369 = vpow2.f32 %v2049_v28 }
  0xac   : > { %1790 = vxpose.xlu0.b32.end [16/16] (narrow) %v1726_v35, 8  ;;  %2371 = vpow2.f32 %v2035_v36  ;;  %v1250_v35 = vadd.f32 %v2364_v9, %v1249_v46 }
  0xad   : > { %2373 = vpow2.f32 %v2067_v22 }
  0xae   : > { %v1254_v7 = vsel %vm3375_vm1, %v2364_v9, %v1250_v35  ;;  %2375 = vpow2.f32 %v2050_v15 }
  0xaf   : > { %v1259_v63 = vsel %vm3340_vm14, %v1258_v2, %v1254_v7 }
  0xb0   : > { %v2368_v52 = vpop.eup %2367  ;;  %v1744_v24 = vmul.f32 %v1259_v63, %v3144_v53 }
  0xb1   : > { %v3391_v62 = vadd.f32 1.0, %v2368_v52  ;;  %v2370_v20 = vpop.eup %2369 }
  0xb2   : > { %v2372_v2 = vpop.eup %2371  ;;  %v3426_v37 = vadd.f32 1.0, %v2370_v20  ;;  %1840 = vxpose.xlu2.b32.cont [2/16] (narrow) %v1744_v24, 8 }
  0xb3   : > { %2377 = vrcp.f32 %v3391_v62  ;;  %v2374_v12 = vpop.eup %2373  ;;  %v1525_v53 = vand.u32 2147483647, %v3391_v62  ;;  %v1527_v47 = vand.u32 2147483648, %v3391_v62  ;;  %v3430_v45 = vadd.f32 1.0, %v2372_v2 }
  0xb4   : > { %1871 = vxpose.xlu0.b32.start [1/16] (narrow) %v3308_v39, 8  ;;  %v1044_v39 = vsel %vm3385_vm2, %v2366_v23, %v1040_v60  ;;  %2379 = vpow2.f32 %v2036_v4  ;;  %v1272_v56 = vand.u32 2147483648, %v3426_v37  ;;  %v2376_v17 = vpop.eup %2375  ;;  %vm1521_vm4 = vweird.f32 %v3391_v62 }
  0xb5   : > { %v1049_v18 = vsel %vm1046_vm3, %v1048_v11, %v1044_v39  ;;  %2381 = vpow2.f32 %v2068_v30  ;;  %v1270_v19 = vand.u32 2147483647, %v3426_v37  ;;  %v1060_v6 = vand.u32 2147483647, %v3430_v45 }
  0xb6   : > { %v1730_v8 = vmul.f32 %v1049_v18, %v3190_v48  ;;  %2383 = vrcp.f32 %v3426_v37  ;;  %v2192_v48 = vunpack.c.l.bf16 %v3420_v32  ;;  %v1062_v5 = vand.u32 2147483648, %v3430_v45 }
  0xb7   : > { %2385 = vrcp.f32 %v3430_v45  ;;  %v3442_v49 = vadd.f32 1.0, %v2374_v12  ;;  %v3444_v21 = vadd.f32 1.0, %v2376_v17  ;;  %vm3447_vm5 = vcmp.eq.f32.partialorder %v1525_v53, 8.507059e+37 }
  0xb8   : > { %1810 = vxpose.xlu1.b32.cont [4/16] (narrow) %v1730_v8, 8  ;;  %v1528_v50 = vor.u32 1.1754944e-38, %v1527_v47  ;;  %vm1266_vm6 = vweird.f32 %v3426_v37  ;;  %v3452_v28 = vor.u32 1.1754944e-38, %v1272_v56  ;;  %vm1056_vm7 = vweird.f32 %v3430_v45 }
  0xb9   : > { %v2378_v9 = vpop.eup %2377  ;;  %2387 = vrcp.f32 %v3442_v49  ;;  %v1542_v34 = vand.u32 2147483648, %v3442_v49  ;;  %vm3457_vm9 = vcmp.eq.f32.partialorder %v1270_v19, 8.507059e+37  ;;  %v1540_v22 = vand.u32 2147483647, %v3442_v49 }
  0xba   : > { %v1517_v23 = vmul.f32 %v2378_v9, %v3391_v62  ;;  %v2380_v0 = vpop.eup %2379  ;;  %vm1522_vm8 = vweird.f32 %v2378_v9  ;;  %2389 = vrcp.f32 %v3444_v21  ;;  %vm3463_vm10 = vcmp.eq.f32.partialorder %v1060_v6, 8.507059e+37 }
  0xbb   : > { %v2382_v44 = vpop.eup %2381  ;;  %v1063_v41 = vor.u32 1.1754944e-38, %v1062_v5  ;;  %v1285_v55 = vand.u32 2147483647, %v3444_v21  ;;  %v1287_v11 = vand.u32 2147483648, %v3444_v21  ;;  %v3469_v52 = vadd.f32 1.0, %v2380_v0  ;;  %vm3477_vm13 = vmor %vm1521_vm4, %vm1522_vm8 }
  0xbc   : > { %1872 = vxpose.xlu0.b32.cont [2/16] (narrow) %v1760_v10, 8  ;;  %v1518_v61 = vsub.f32 1.0, %v1517_v23  ;;  %v2384_v31 = vpop.eup %2383  ;;  %vm1536_vm11 = vweird.f32 %v3442_v49  ;;  %vm1281_vm12 = vweird.f32 %v3444_v21  ;;  %v1543_v4 = vor.u32 1.1754944e-38, %v1542_v34 }
  0xbd   : > { %v2386_v35 = vpop.eup %2385  ;;  %v1262_v15 = vmul.f32 %v2384_v31, %v3426_v37  ;;  %vm1267_vm14 = vweird.f32 %v2384_v31  ;;  %2391 = vrcp.f32 %v3469_v52  ;;  %vm3483_vm0 = vcmp.eq.f32.partialorder %v1540_v22, 8.507059e+37 }
  0xbe   : > { %v1519_v58 = vmul.f32 %v2378_v9, %v1518_v61  ;;  %v1052_v60 = vmul.f32 %v2386_v35, %v3430_v45  ;;  %vm1057_vm15 = vweird.f32 %v2386_v35  ;;  %v1288_v63 = vor.u32 1.1754944e-38, %v1287_v11  ;;  %vm3504_vm3 = vmor %vm1266_vm6, %vm1267_vm14 }
  0xbf   : > { %v1263_v7 = vsub.f32 1.0, %v1262_v15  ;;  %v2388_v39 = vpop.eup %2387  ;;  %vm3487_vm1 = vcmp.eq.f32.partialorder %v1285_v55, 8.507059e+37  ;;  %vm1071_vm2 = vweird.f32 %v3469_v52  ;;  %v3492_v10 = vadd.f32 1.0, %v2382_v44  ;;  %vm3513_vm4 = vmor %vm1056_vm7, %vm1057_vm15 }
  0xc0   : > { %v1520_v38 = vadd.f32 %v2378_v9, %v1519_v58  ;;  %v1053_v62 = vsub.f32 1.0, %v1052_v60  ;;  %2393 = vpow2.f32 %v2051_v43  ;;  %v2390_v24 = vpop.eup %2389  ;;  %v1532_v8 = vmul.f32 %v2388_v39, %v3442_v49 }
  0xc1   : > { %v1264_v2 = vmul.f32 %v2384_v31, %v1263_v7  ;;  %v1075_v12 = vand.u32 2147483647, %v3469_v52  ;;  %v1077_v17 = vand.u32 2147483648, %v3469_v52  ;;  %vm1282_vm8 = vweird.f32 %v2390_v24 }
  0xc2   : > { %v1524_v18 = vsel %vm3477_vm13, %v2378_v9, %v1520_v38  ;;  %v1054_v56 = vmul.f32 %v2386_v35, %v1053_v62  ;;  %v1533_v9 = vsub.f32 1.0, %v1532_v8  ;;  %2395 = vrcp.f32 %v3492_v10  ;;  %v3592_v8 = vld [vmem:[%s2606_s26 + $0x98] sm:$0xff]  }
  0xc3   : > { %v1529_v53 = vsel %vm3447_vm5, %v1528_v50, %v1524_v18  ;;  %v1265_v19 = vadd.f32 %v2384_v31, %v1264_v2  ;;  %vm1537_vm5 = vweird.f32 %v2388_v39  ;;  %v2392_v37 = vpop.eup %2391  ;;  %vm3522_vm6 = vcmp.eq.f32.partialorder %v1075_v12, 8.507059e+37  ;;  %v3595_v12 = vld [vmem:[%s2606_s26 + $0x60] sm:$0xff]  }
  0xc4   : > { %1873 = vxpose.xlu0.b32.cont [3/16] (narrow) %v3423_v57, 8  ;;  %v1277_v57 = vmul.f32 %v2390_v24, %v3444_v21  ;;  %v1762_v6 = vmul.f32 %v1529_v53, %v3330_v29  ;;  %v1055_v5 = vadd.f32 %v2386_v35, %v1054_v56  ;;  %v1534_v50 = vmul.f32 %v2388_v39, %v1533_v9  ;;  %vm3533_vm7 = vmor %vm1536_vm11, %vm1537_vm5 }
  0xc5   : > { %v1269_v25 = vsel %vm3504_vm3, %v2384_v31, %v1265_v19  ;;  %v1067_v45 = vmul.f32 %v2392_v37, %v3469_v52  ;;  %vm1072_vm13 = vweird.f32 %v2392_v37  ;;  %v1555_v58 = vand.u32 2147483647, %v3492_v10 }
  0xc6   : > { %v1278_v23 = vsub.f32 1.0, %v1277_v57  ;;  %v2394_v34 = vpop.eup %2393  ;;  %v1274_v44 = vsel %vm3457_vm9, %v3452_v28, %v1269_v25  ;;  %v1059_v29 = vsel %vm3513_vm4, %v2386_v35, %v1055_v5  ;;  %v1535_v11 = vadd.f32 %v2388_v39, %v1534_v50  ;;  %vm3543_vm9 = vmor %vm1281_vm12, %vm1282_vm8 }
  0xc7   : > { %v1745_v31 = vmul.f32 %v1274_v44, %v3351_v26  ;;  %v1064_v55 = vsel %vm3463_vm10, %v1063_v41, %v1059_v29  ;;  %v1068_v49 = vsub.f32 1.0, %v1067_v45  ;;  %v1557_v15 = vand.u32 2147483648, %v3492_v10  ;;  %vm3561_vm10 = vmor %vm1071_vm2, %vm1072_vm13  ;;  %v3625_v45 = vld [vmem:[%s2606_s26 + $0xe0] sm:$0xff]  }
  0xc8   : > { %v1279_v22 = vmul.f32 %v2390_v24, %v1278_v23  ;;  %v1731_v36 = vmul.f32 %v1064_v55, %v3355_v27  ;;  %v1539_v26 = vsel %vm3533_vm7, %v2388_v39, %v1535_v11  ;;  %v1078_v41 = vor.u32 1.1754944e-38, %v1077_v17  ;;  %v2396_v59 = vpop.eup %2395 }
  0xc9   : > { %1841 = vxpose.xlu2.b32.cont [3/16] (narrow) %v1745_v31, 8  ;;  %v1069_v46 = vmul.f32 %v2392_v37, %v1068_v49  ;;  %v3552_v21 = vadd.f32 1.0, %v2394_v34  ;;  %v1544_v60 = vsel %vm3483_vm0, %v1543_v4, %v1539_v26  ;;  %vm1551_vm11 = vweird.f32 %v3492_v10 }
  0xca   : > { %v1280_v35 = vadd.f32 %v2390_v24, %v1279_v22  ;;  %1811 = vxpose.xlu1.b32.cont [5/16] (narrow) %v1731_v36, 8  ;;  %v385_v7 = vmul.f32 %v3296_v14, %v2128_v13  ;;  %v1547_v39 = vmul.f32 %v2396_v59, %v3492_v10  ;;  %vm3572_vm12 = vcmp.eq.f32.partialorder %v1555_v58, 8.507059e+37 }
  0xcb   : > { %v1070_v4 = vadd.f32 %v2392_v37, %v1069_v46  ;;  %v1763_v62 = vmul.f32 %v1544_v60, %v3358_v33  ;;  %v1558_v18 = vor.u32 1.1754944e-38, %v1557_v15  ;;  %2397 = vrcp.f32 %v3552_v21 }
  0xcc   : > { %1874 = vxpose.xlu0.b32.cont [4/16] (narrow) %v1762_v6, 8  ;;  %v1284_v27 = vsel %vm3543_vm9, %v2390_v24, %v1280_v35  ;;  %vm1552_vm14 = vweird.f32 %v2396_v59  ;;  %vm1296_vm15 = vweird.f32 %v3552_v21  ;;  %v3585_v2 = vadd.f32 %v3327_v1, %v385_v7 }
  0xcd   : > { %v1289_v30 = vsel %vm3487_vm1, %v1288_v63, %v1284_v27  ;;  %v1074_v13 = vsel %vm3561_vm10, %v2392_v37, %v1070_v4  ;;  %v1548_v63 = vsub.f32 1.0, %v1547_v39  ;;  %v417_v33 = vmul.f32 %v3296_v14, %v2192_v48  ;;  %vm3602_vm0 = vmor %vm1551_vm11, %vm1552_vm14 }
  0xce   : > { %v1746_v24 = vmul.f32 %v1289_v30, %v3367_v40  ;;  %v1079_v20 = vsel %vm3522_vm6, %v1078_v41, %v1074_v13  ;;  %v2157_v40 = vunpack.c.h.bf16 %v3333_v16  ;;  %v1300_v56 = vand.u32 2147483647, %v3552_v21 }
  0xcf   : > { %v1732_v53 = vmul.f32 %v1079_v20, %v3370_v51  ;;  %v1549_v47 = vmul.f32 %v2396_v59, %v1548_v63  ;;  %v1302_v57 = vand.u32 2147483648, %v3552_v21  ;;  %v2037_v48 = vmul.f32 -1.442695, %v3585_v2 }
  0xd0   : > { %v3608_v16 = vadd.f32 %v3327_v1, %v417_v33  ;;  %v400_v19 = vmul.f32 %v3296_v14, %v2157_v40  ;;  %v2129_v51 = vunpack.c.h.bf16 %v3417_v3  ;;  %v2193_v9 = vunpack.c.h.bf16 %v3420_v32 }
  0xd1   : > { %1842 = vxpose.xlu2.b32.cont [4/16] (narrow) %v1746_v24, 8  ;;  %v1550_v43 = vadd.f32 %v2396_v59, %v1549_v47  ;;  %v2160_v10 = vunpack.c.l.bf16 %v3592_v8  ;;  %v2132_v37 = vunpack.c.l.bf16 %v3595_v12  ;;  %v2398_v6 = vpop.eup %2397  ;;  %2399 = vpow2.f32 %v2037_v48 }
  0xd2   : > { %1812 = vxpose.xlu1.b32.cont [6/16] (narrow) %v1732_v53, 8  ;;  %v2069_v5 = vmul.f32 -1.442695, %v3608_v16  ;;  %v3617_v23 = vadd.f32 %v3327_v1, %v400_v19  ;;  %v386_v3 = vmul.f32 %v3296_v14, %v2129_v51  ;;  %v1292_v50 = vmul.f32 %v2398_v6, %v3552_v21 }
  0xd3   : > { %v1554_v25 = vsel %vm3602_vm0, %v2396_v59, %v1550_v43  ;;  %vm1297_vm1 = vweird.f32 %v2398_v6  ;;  %v418_v32 = vmul.f32 %v3296_v14, %v2193_v9  ;;  %v401_v31 = vmul.f32 %v3296_v14, %v2160_v10 }
  0xd4   : > { %1875 = vxpose.xlu0.b32.cont [5/16] (narrow) %v1763_v62, 8  ;;  %v1559_v0 = vsel %vm3572_vm12, %v1558_v18, %v1554_v25  ;;  %2401 = vpow2.f32 %v2069_v5  ;;  %v2052_v34 = vmul.f32 -1.442695, %v3617_v23  ;;  %v3631_v44 = vadd.f32 %v3327_v1, %v386_v3  ;;  %vm3648_vm2 = vmor %vm1296_vm15, %vm1297_vm1 }
  0xd5   : > { %v1764_v29 = vmul.f32 %v1559_v0, %v3380_v54  ;;  %v1293_v61 = vsub.f32 1.0, %v1292_v50  ;;  %v3635_v22 = vadd.f32 %v3327_v1, %v418_v32  ;;  %v387_v11 = vmul.f32 %v3296_v14, %v2132_v37 }
  0xd6   : > { %2403 = vpow2.f32 %v2052_v34  ;;  %v2038_v55 = vmul.f32 -1.442695, %v3631_v44  ;;  %v2196_v28 = vunpack.c.l.bf16 %v3625_v45  ;;  %v3643_v35 = vadd.f32 %v3327_v1, %v401_v31 }
  0xd7   : > { %v1294_v49 = vmul.f32 %v2398_v6, %v1293_v61  ;;  %v2070_v36 = vmul.f32 -1.442695, %v3635_v22  ;;  %v2400_v54 = vpop.eup %2399  ;;  %vm3652_vm3 = vcmp.eq.f32.partialorder %v1300_v56, 8.507059e+37  ;;  %v1303_v26 = vor.u32 1.1754944e-38, %v1302_v57 }
  0xd8   : > { %2405 = vpow2.f32 %v2038_v55  ;;  %v3657_v46 = vadd.f32 %v3327_v1, %v387_v11  ;;  %v3659_v59 = vadd.f32 1.0, %v2400_v54  ;;  %v2053_v21 = vmul.f32 -1.442695, %v3643_v35 }
  0xd9   : > { %v1295_v41 = vadd.f32 %v2398_v6, %v1294_v49  ;;  %2407 = vpow2.f32 %v2070_v36  ;;  %v419_v27 = vmul.f32 %v3296_v14, %v2196_v28  ;;  %v2161_v38 = vunpack.c.h.bf16 %v3592_v8 }
  0xda   : > { %v2402_v60 = vpop.eup %2401  ;;  %v2133_v7 = vunpack.c.h.bf16 %v3595_v12  ;;  %2409 = vrcp.f32 %v3659_v59  ;;  %v1090_v52 = vand.u32 2147483647, %v3659_v59  ;;  %v2039_v24 = vmul.f32 -1.442695, %v3657_v46 }
  0xdb   : > { %v1299_v30 = vsel %vm3648_vm2, %v2398_v6, %v1295_v41  ;;  %v3671_v62 = vadd.f32 1.0, %v2402_v60  ;;  %v1092_v13 = vand.u32 2147483648, %v3659_v59  ;;  %2411 = vpow2.f32 %v2053_v21 }
  0xdc   : > { %1876 = vxpose.xlu0.b32.cont [6/16] (narrow) %v1764_v29, 8  ;;  %v2404_v4 = vpop.eup %2403  ;;  %v1304_v39 = vsel %vm3652_vm3, %v1303_v26, %v1299_v30  ;;  %v3680_v33 = vadd.f32 %v3327_v1, %v419_v27  ;;  %v402_v40 = vmul.f32 %v3296_v14, %v2161_v38  ;;  %v3684_v8 = vmul.f32 %v3296_v14, %v2133_v7  ;;  %v3828_v27 = vld [vmem:[%s2606_s26 + $0x68] sm:$0xff]  }
  0xdd   : > { %v1747_v18 = vmul.f32 %v1304_v39, %v3414_v42  ;;  %v3676_v63 = vadd.f32 1.0, %v2404_v4  ;;  %2413 = vrcp.f32 %v3671_v62  ;;  %vm1086_vm4 = vweird.f32 %v3659_v59 }
  0xde   : > { %v2406_v20 = vpop.eup %2405  ;;  %v1570_v42 = vand.u32 2147483647, %v3671_v62  ;;  %v1572_v53 = vand.u32 2147483648, %v3671_v62  ;;  %vm3695_vm5 = vcmp.eq.f32.partialorder %v1090_v52, 8.507059e+37  ;;  %v1093_v19 = vor.u32 1.1754944e-38, %v1092_v13 }
  0xdf   : > { %v2408_v12 = vpop.eup %2407  ;;  %1843 = vxpose.xlu2.b32.cont [5/16] (narrow) %v1747_v18, 8  ;;  %2415 = vrcp.f32 %v3676_v63  ;;  %v1315_v47 = vand.u32 2147483647, %v3676_v63  ;;  %v3691_v56 = vadd.f32 1.0, %v2406_v20  ;;  %vm1566_vm8 = vweird.f32 %v3671_v62 }
  0xe0   : > { %v3693_v57 = vadd.f32 1.0, %v2408_v12  ;;  %2417 = vpow2.f32 %v2039_v24  ;;  %v2410_v17 = vpop.eup %2409  ;;  %v1317_v51 = vand.u32 2147483648, %v3676_v63  ;;  %v1573_v9 = vor.u32 1.1754944e-38, %v1572_v53 }
  0xe1   : > { %v1082_v43 = vmul.f32 %v2410_v17, %v3659_v59  ;;  %vm1311_vm6 = vweird.f32 %v3676_v63  ;;  %2419 = vrcp.f32 %v3691_v56  ;;  %v2412_v10 = vpop.eup %2411  ;;  %vm3704_vm7 = vcmp.eq.f32.partialorder %v1570_v42, 8.507059e+37 }
  0xe2   : > { %v1105_v6 = vand.u32 2147483647, %v3691_v56  ;;  %v1107_v5 = vand.u32 2147483648, %v3691_v56  ;;  %2421 = vrcp.f32 %v3693_v57  ;;  %v2071_v3 = vmul.f32 -1.442695, %v3680_v33 }
  0xe3   : > { %v2414_v25 = vpop.eup %2413  ;;  %v1083_v50 = vsub.f32 1.0, %v1082_v43  ;;  %vm1087_vm13 = vweird.f32 %v2410_v17  ;;  %vm3712_vm9 = vcmp.eq.f32.partialorder %v1315_v47, 8.507059e+37  ;;  %v1585_v0 = vand.u32 2147483647, %v3693_v57 }
  0xe4   : > { %v3718_v34 = vadd.f32 %v3327_v1, %v402_v40  ;;  %v1562_v61 = vmul.f32 %v2414_v25, %v3671_v62  ;;  %v1318_v31 = vor.u32 1.1754944e-38, %v1317_v51  ;;  %vm1101_vm10 = vweird.f32 %v3691_v56  ;;  %vm3727_vm14 = vmor %vm1086_vm4, %vm1087_vm13 }
  0xe5   : > { %v2416_v29 = vpop.eup %2415  ;;  %vm1581_vm11 = vweird.f32 %v3693_v57  ;;  %v1084_v11 = vmul.f32 %v2410_v17, %v1083_v50  ;;  %vm1567_vm12 = vweird.f32 %v2414_v25  ;;  %v1587_v49 = vand.u32 2147483648, %v3693_v57 }
  0xe6   : > { %v2418_v55 = vpop.eup %2417  ;;  %v1307_v28 = vmul.f32 %v2416_v29, %v3676_v63  ;;  %v1563_v54 = vsub.f32 1.0, %v1562_v61  ;;  %vm1312_vm15 = vweird.f32 %v2416_v29  ;;  %vm3731_vm0 = vcmp.eq.f32.partialorder %v1105_v6, 8.507059e+37  ;;  %vm3750_vm2 = vmor %vm1566_vm8, %vm1567_vm12 }
  0xe7   : > { %v1108_v15 = vor.u32 1.1754944e-38, %v1107_v5  ;;  %v3735_v26 = vadd.f32 1.0, %v2412_v10  ;;  %v2420_v41 = vpop.eup %2419  ;;  %v1085_v21 = vadd.f32 %v2410_v17, %v1084_v11  ;;  %vm3737_vm1 = vcmp.eq.f32.partialorder %v1585_v0, 8.507059e+37  ;;  %vm3760_vm3 = vmor %vm1311_vm6, %vm1312_vm15 }
  0xe8   : > { %v1308_v60 = vsub.f32 1.0, %v1307_v28  ;;  %2423 = vpow2.f32 %v2071_v3  ;;  %v2422_v59 = vpop.eup %2421  ;;  %v1564_v38 = vmul.f32 %v2414_v25, %v1563_v54  ;;  %v1097_v7 = vmul.f32 %v2420_v41, %v3691_v56 }
  0xe9   : > { %2425 = vrcp.f32 %v3735_v26  ;;  %v3743_v30 = vadd.f32 1.0, %v2418_v55  ;;  %v1089_v4 = vsel %vm3727_vm14, %v2410_v17, %v1085_v21  ;;  %v1577_v24 = vmul.f32 %v2422_v59, %v3693_v57 }
  0xea   : > { %v1309_v52 = vmul.f32 %v2416_v29, %v1308_v60  ;;  %v1588_v18 = vor.u32 1.1754944e-38, %v1587_v49  ;;  %v1094_v13 = vsel %vm3695_vm5, %v1093_v19, %v1089_v4  ;;  %v1565_v20 = vadd.f32 %v2414_v25, %v1564_v38 }
  0xeb   : > { %v1098_v62 = vsub.f32 1.0, %v1097_v7  ;;  %vm1102_vm4 = vweird.f32 %v2420_v41  ;;  %v1733_v12 = vmul.f32 %v1094_v13, %v3585_v2  ;;  %v1578_v53 = vsub.f32 1.0, %v1577_v24 }
  0xec   : > { %v1310_v42 = vadd.f32 %v2416_v29, %v1309_v52  ;;  %vm1582_vm8 = vweird.f32 %v2422_v59  ;;  %v1569_v47 = vsel %vm3750_vm2, %v2414_v25, %v1565_v20  ;;  %2427 = vrcp.f32 %v3743_v30  ;;  %vm3775_vm5 = vmor %vm1101_vm10, %vm1102_vm4 }
  0xed   : > { %v1099_v17 = vmul.f32 %v2420_v41, %v1098_v62  ;;  %v2054_v48 = vmul.f32 -1.442695, %v3718_v34  ;;  %1813 = vxpose.xlu1.b32.cont [7/16] (narrow) %v1733_v12, 8  ;;  %v1574_v19 = vsel %vm3704_vm7, %v1573_v9, %v1569_v47  ;;  %v1579_v43 = vmul.f32 %v2422_v59, %v1578_v53  ;;  %vm3786_vm6 = vmor %vm1581_vm11, %vm1582_vm8 }
  0xee   : > { %v2424_v63 = vpop.eup %2423  ;;  %v1314_v51 = vsel %vm3760_vm3, %v2416_v29, %v1310_v42  ;;  %v1330_v10 = vand.u32 2147483647, %v3735_v26  ;;  %v1765_v5 = vmul.f32 %v1574_v19, %v3608_v16  ;;  %v1332_v56 = vand.u32 2147483648, %v3735_v26 }
  0xef   : > { %v2426_v6 = vpop.eup %2425  ;;  %v1319_v3 = vsel %vm3712_vm9, %v1318_v31, %v1314_v51  ;;  %v1100_v37 = vadd.f32 %v2420_v41, %v1099_v17  ;;  %v1580_v50 = vadd.f32 %v2422_v59, %v1579_v43  ;;  %vm1326_vm7 = vweird.f32 %v3735_v26 }
  0xf0   : > { %v1748_v25 = vmul.f32 %v1319_v3, %v3617_v23  ;;  %v1322_v0 = vmul.f32 %v2426_v6, %v3735_v26  ;;  %1877 = vxpose.xlu0.b32.cont [7/16] (narrow) %v1765_v5, 8  ;;  %vm1327_vm13 = vweird.f32 %v2426_v6  ;;  %v1120_v57 = vand.u32 2147483647, %v3743_v30  ;;  %v3836_v26 = vld [vmem:[%s2606_s26 + $0xe8] sm:$0xff]  }
  0xf1   : > { %v1104_v16 = vsel %vm3775_vm5, %v2420_v41, %v1100_v37  ;;  %v1122_v32 = vand.u32 2147483648, %v3743_v30  ;;  %v1584_v23 = vsel %vm3786_vm6, %v2422_v59, %v1580_v50  ;;  %v3802_v31 = vadd.f32 1.0, %v2424_v63  ;;  %v2229_v41 = vld [vmem:[%s2606_s26 + $0xa0] sm:$0xff]   ;;  %vm3822_vm12 = vmor %vm1326_vm7, %vm1327_vm13 }
  0xf2   : > { %1844 = vxpose.xlu2.b32.cont [6/16] (narrow) %v1748_v25, 8  ;;  %v1109_v29 = vsel %vm3731_vm0, %v1108_v15, %v1104_v16  ;;  %v1323_v61 = vsub.f32 1.0, %v1322_v0  ;;  %v2428_v55 = vpop.eup %2427  ;;  %v1589_v28 = vsel %vm3737_vm1, %v1588_v18, %v1584_v23  ;;  %vm3807_vm9 = vcmp.eq.f32.partialorder %v1330_v10, 8.507059e+37 }
  0xf3   : > { %v1734_v11 = vmul.f32 %v1109_v29, %v3631_v44  ;;  %v1333_v36 = vor.u32 1.1754944e-38, %v1332_v56  ;;  %v1112_v58 = vmul.f32 %v2428_v55, %v3743_v30  ;;  %vm1116_vm10 = vweird.f32 %v3743_v30 }
  0xf4   : > { %v1324_v54 = vmul.f32 %v2426_v6, %v1323_v61  ;;  %vm3813_vm11 = vcmp.eq.f32.partialorder %v1120_v57, 8.507059e+37  ;;  %v1766_v44 = vmul.f32 %v1589_v28, %v3635_v22  ;;  %vm1117_vm14 = vweird.f32 %v2428_v55 }
  0xf5   : > { %v1123_v60 = vor.u32 1.1754944e-38, %v1122_v32  ;;  %2429 = vrcp.f32 %v3802_v31  ;;  %1814 = vxpose.xlu1.b32.cont [8/16] (narrow) %v1734_v11, 8  ;;  %v1113_v38 = vsub.f32 1.0, %v1112_v58  ;;  %vm1596_vm15 = vweird.f32 %v3802_v31  ;;  %vm3850_vm0 = vmor %vm1116_vm10, %vm1117_vm14 }
  0xf6   : > { %v1325_v59 = vadd.f32 %v2426_v6, %v1324_v54  ;;  %2431 = vpow2.f32 %v2054_v48  ;;  %v3833_v22 = vadd.f32 %v3327_v1, %v3684_v8  ;;  %v1600_v7 = vand.u32 2147483647, %v3802_v31 }
  0xf7   : > { %v1602_v4 = vand.u32 2147483648, %v3802_v31  ;;  %v2197_v39 = vunpack.c.h.bf16 %v3625_v45  ;;  %v2164_v52 = vunpack.c.l.bf16 %v2229_v41  ;;  %v1114_v18 = vmul.f32 %v2428_v55, %v1113_v38 }
  0xf8   : > { %v1329_v24 = vsel %vm3822_vm12, %v2426_v6, %v1325_v59  ;;  %v2040_v13 = vmul.f32 -1.442695, %v3833_v22  ;;  %v2136_v20 = vunpack.c.l.bf16 %v3828_v27  ;;  %1878 = vxpose.xlu0.b32.cont [8/16] (narrow) %v1766_v44, 8  ;;  %v2200_v12 = vunpack.c.l.bf16 %v3836_v26 }
  0xf9   : > { %v1334_v8 = vsel %vm3807_vm9, %v1333_v36, %v1329_v24  ;;  %v420_v45 = vmul.f32 %v3296_v14, %v2197_v39  ;;  %v403_v62 = vmul.f32 %v3296_v14, %v2164_v52  ;;  %v1115_v53 = vadd.f32 %v2428_v55, %v1114_v18  ;;  %v3932_v18 = vld [vmem:[%s2606_s26 + $0xa8] sm:$0xff]  }
  0xfa   : > { %v1749_v42 = vmul.f32 %v1334_v8, %v3643_v35  ;;  %2433 = vpow2.f32 %v2040_v13  ;;  %v389_v47 = vmul.f32 %v3296_v14, %v2136_v20  ;;  %v421_v63 = vmul.f32 %v3296_v14, %v2200_v12  ;;  %v3935_v13 = vld [vmem:[%s2606_s26 + $0x70] sm:$0xff]  }
  0xfb   : > { %v2430_v17 = vpop.eup %2429  ;;  %v3860_v48 = vadd.f32 %v3327_v1, %v420_v45  ;;  %v3863_v30 = vadd.f32 %v3327_v1, %v403_v62  ;;  %v2165_v19 = vunpack.c.h.bf16 %v2229_v41  ;;  %v1119_v2 = vsel %vm3850_vm0, %v2428_v55, %v1115_v53  ;;  %v3943_v45 = vld [vmem:[%s2595_s19] ss:$0 sm:$0xff] }
  0xfc   : > { %v2432_v51 = vpop.eup %2431  ;;  %1845 = vxpose.xlu2.b32.cont [7/16] (narrow) %v1749_v42, 8  ;;  %v1592_v35 = vmul.f32 %v2430_v17, %v3802_v31  ;;  %vm1597_vm1 = vweird.f32 %v2430_v17  ;;  %v3870_v43 = vadd.f32 %v3327_v1, %v389_v47  ;;  %v1124_v10 = vsel %vm3813_vm11, %v1123_v60, %v1119_v2  ;;  %v3952_v47 = vld [vmem:[%s2606_s26 + $0xf0] sm:$0xff]  }
  0xfd   : > { %v3874_v6 = vadd.f32 1.0, %v2432_v51  ;;  %v2072_v5 = vmul.f32 -1.442695, %v3860_v48  ;;  %v2055_v3 = vmul.f32 -1.442695, %v3863_v30  ;;  %v1735_v37 = vmul.f32 %v1124_v10, %v3657_v46  ;;  %vm3892_vm3 = vmor %vm1596_vm15, %vm1597_vm1 }
  0xfe   : > { %v1593_v9 = vsub.f32 1.0, %v1592_v35  ;;  %v2041_v56 = vmul.f32 -1.442695, %v3870_v43  ;;  %v3881_v25 = vadd.f32 %v3327_v1, %v421_v63  ;;  %vm3884_vm2 = vcmp.eq.f32.partialorder %v1600_v7, 8.507059e+37 }
  0xff   : > { %2435 = vrcp.f32 %v3874_v6  ;;  %1815 = vxpose.xlu1.b32.cont [9/16] (narrow) %v1735_v37, 8  ;;  %v404_v57 = vmul.f32 %v3296_v14, %v2165_v19  ;;  %v1603_v32 = vor.u32 1.1754944e-38, %v1602_v4  ;;  %v2137_v11 = vunpack.c.h.bf16 %v3828_v27 }
 0x100   : > { %v2434_v50 = vpop.eup %2433  ;;  %v1594_v0 = vmul.f32 %v2430_v17, %v1593_v9  ;;  %2437 = vpow2.f32 %v2072_v5  ;;  %v2073_v23 = vmul.f32 -1.442695, %v3881_v25  ;;  %v1345_v28 = vand.u32 2147483647, %v3874_v6 }
 0x101   : > { %v3896_v29 = vadd.f32 1.0, %v2434_v50  ;;  %2439 = vpow2.f32 %v2055_v3  ;;  %v3900_v55 = vadd.f32 %v3327_v1, %v404_v57  ;;  %v1347_v31 = vand.u32 2147483648, %v3874_v6 }
 0x102   : > { %v1595_v61 = vadd.f32 %v2430_v17, %v1594_v0  ;;  %2441 = vpow2.f32 %v2041_v56  ;;  %v390_v44 = vmul.f32 %v3296_v14, %v2137_v11  ;;  %v2201_v21 = vunpack.c.h.bf16 %v3836_v26 }
 0x103   : > { %2443 = vrcp.f32 %v3896_v29  ;;  %v1135_v36 = vand.u32 2147483647, %v3896_v29  ;;  %v1137_v54 = vand.u32 2147483648, %v3896_v29  ;;  %v2056_v58 = vmul.f32 -1.442695, %v3900_v55 }
 0x104   : > { %v1599_v49 = vsel %vm3892_vm3, %v2430_v17, %v1595_v61  ;;  %2445 = vpow2.f32 %v2073_v23  ;;  %vm1341_vm4 = vweird.f32 %v3874_v6  ;;  %vm3918_vm8 = vcmp.eq.f32.partialorder %v1345_v28, 8.507059e+37 }
 0x105   : > { %v2436_v15 = vpop.eup %2435  ;;  %v1604_v41 = vsel %vm3884_vm2, %v1603_v32, %v1599_v49  ;;  %2447 = vpow2.f32 %v2056_v58  ;;  %v1348_v4 = vor.u32 1.1754944e-38, %v1347_v31  ;;  %vm1131_vm5 = vweird.f32 %v3896_v29 }
 0x106   : > { %v2438_v60 = vpop.eup %2437  ;;  %v1767_v27 = vmul.f32 %v1604_v41, %v3680_v33  ;;  %v1337_v59 = vmul.f32 %v2436_v15, %v3874_v6  ;;  %vm1342_vm6 = vweird.f32 %v2436_v15  ;;  %vm3925_vm7 = vcmp.eq.f32.partialorder %v1135_v36, 8.507059e+37 }
 0x107   : > { %v2440_v38 = vpop.eup %2439  ;;  %v3923_v14 = vadd.f32 1.0, %v2438_v60  ;;  %v1138_v52 = vor.u32 1.1754944e-38, %v1137_v54  ;;  %v3940_v40 = vadd.f32 %v3327_v1, %v390_v44  ;;  %v3946_v62 = vmul.f32 %v3943_v45, %v2201_v21  ;;  %vm3957_vm13 = vmor %vm1341_vm4, %vm1342_vm6 }
 0x108   : > { %v2442_v26 = vpop.eup %2441  ;;  %1879 = vxpose.xlu0.b32.cont [9/16] (narrow) %v1767_v27, 8  ;;  %v1338_v33 = vsub.f32 1.0, %v1337_v59  ;;  %v3929_v24 = vadd.f32 1.0, %v2440_v38  ;;  %v2168_v19 = vunpack.c.l.bf16 %v3932_v18  ;;  %v2140_v51 = vunpack.c.l.bf16 %v3935_v13 }
 0x109   : > { %v2444_v20 = vpop.eup %2443  ;;  %2449 = vrcp.f32 %v3923_v14  ;;  %v1617_v8 = vand.u32 2147483648, %v3923_v14  ;;  %v1615_v53 = vand.u32 2147483647, %v3923_v14  ;;  %v3965_v3 = vadd.f32 1.0, %v2442_v26 }
 0x10a   : > { %v1339_v12 = vmul.f32 %v2436_v15, %v1338_v33  ;;  %v1127_v42 = vmul.f32 %v2444_v20, %v3896_v29  ;;  %2451 = vrcp.f32 %v3929_v24  ;;  %v2446_v17 = vpop.eup %2445  ;;  %vm1132_vm9 = vweird.f32 %v2444_v20 }
 0x10b   : > { %v1360_v63 = vand.u32 2147483647, %v3929_v24  ;;  %v2448_v2 = vpop.eup %2447  ;;  %v1362_v5 = vand.u32 2147483648, %v3929_v24  ;;  %vm1611_vm10 = vweird.f32 %v3923_v14  ;;  %v1618_v6 = vor.u32 1.1754944e-38, %v1617_v8  ;;  %vm3984_vm14 = vmor %vm1131_vm5, %vm1132_vm9 }
 0x10c   : > { %v1340_v35 = vadd.f32 %v2436_v15, %v1339_v12  ;;  %v1128_v10 = vsub.f32 1.0, %v1127_v42  ;;  %vm1356_vm11 = vweird.f32 %v3929_v24  ;;  %v2204_v37 = vunpack.c.l.bf16 %v3952_v47  ;;  %v4036_v42 = vld [vmem:[%s2601_s23] ss:$0 sm:$0xff] }
 0x10d   : > { %vm3972_vm12 = vcmp.eq.f32.partialorder %v1615_v53, 8.507059e+37  ;;  %2453 = vrcp.f32 %v3965_v3  ;;  %v3977_v0 = vadd.f32 1.0, %v2446_v17  ;;  %vm3988_vm15 = vcmp.eq.f32.partialorder %v1360_v63, 8.507059e+37 }
 0x10e   : > { %v1344_v9 = vsel %vm3957_vm13, %v2436_v15, %v1340_v35  ;;  %v1129_v56 = vmul.f32 %v2444_v20, %v1128_v10  ;;  %v1363_v23 = vor.u32 1.1754944e-38, %v1362_v5  ;;  %v3992_v61 = vadd.f32 1.0, %v2448_v2 }
 0x10f   : > { %v2450_v16 = vpop.eup %2449  ;;  %v1349_v57 = vsel %vm3918_vm8, %v1348_v4, %v1344_v9  ;;  %v2042_v11 = vmul.f32 -1.442695, %v3940_v40  ;;  %v1150_v29 = vand.u32 2147483647, %v3965_v3  ;;  %vm1146_vm1 = vweird.f32 %v3965_v3 }
 0x110   : > { %v2452_v28 = vpop.eup %2451  ;;  %v1750_v31 = vmul.f32 %v1349_v57, %v3718_v34  ;;  %v1130_v49 = vadd.f32 %v2444_v20, %v1129_v56  ;;  %v1607_v36 = vmul.f32 %v2450_v16, %v3923_v14  ;;  %vm1612_vm0 = vweird.f32 %v2450_v16 }
 0x111   : > { %v1352_v54 = vmul.f32 %v2452_v28, %v3929_v24  ;;  %v1152_v58 = vand.u32 2147483648, %v3965_v3  ;;  %vm1357_vm2 = vweird.f32 %v2452_v28  ;;  %2455 = vrcp.f32 %v3977_v0  ;;  %vm4017_vm4 = vmor %vm1611_vm10, %vm1612_vm0 }
 0x112   : > { %1846 = vxpose.xlu2.b32.cont [8/16] (narrow) %v1750_v31, 8  ;;  %v1134_v15 = vsel %vm3984_vm14, %v2444_v20, %v1130_v49  ;;  %v1608_v41 = vsub.f32 1.0, %v1607_v36  ;;  %v1630_v21 = vand.u32 2147483647, %v3977_v0  ;;  %v1632_v60 = vand.u32 2147483648, %v3977_v0  ;;  %vm4026_vm5 = vmor %vm1356_vm11, %vm1357_vm2 }
 0x113   : > { %v1139_v34 = vsel %vm3925_vm7, %v1138_v52, %v1134_v15  ;;  %v1353_v44 = vsub.f32 1.0, %v1352_v54  ;;  %v2454_v27 = vpop.eup %2453  ;;  %vm4009_vm3 = vcmp.eq.f32.partialorder %v1150_v29, 8.507059e+37  ;;  %2457 = vrcp.f32 %v3992_v61 }
 0x114   : > { %v1736_v59 = vmul.f32 %v1139_v34, %v3833_v22  ;;  %v1609_v38 = vmul.f32 %v2450_v16, %v1608_v41  ;;  %v1142_v33 = vmul.f32 %v2454_v27, %v3965_v3  ;;  %v1153_v39 = vor.u32 1.1754944e-38, %v1152_v58 }
 0x115   : > { %v1354_v26 = vmul.f32 %v2452_v28, %v1353_v44  ;;  %vm1626_vm8 = vweird.f32 %v3977_v0  ;;  %vm1147_vm6 = vweird.f32 %v2454_v27  ;;  %v1633_v14 = vor.u32 1.1754944e-38, %v1632_v60 }
 0x116   : > { %1816 = vxpose.xlu1.b32.cont [10/16] (narrow) %v1736_v59, 8  ;;  %v1610_v22 = vadd.f32 %v2450_v16, %v1609_v38  ;;  %vm1371_vm7 = vweird.f32 %v3992_v61  ;;  %v1143_v8 = vsub.f32 1.0, %v1142_v33  ;;  %vm4031_vm13 = vcmp.eq.f32.partialorder %v1630_v21, 8.507059e+37  ;;  %vm4060_vm9 = vmor %vm1146_vm1, %vm1147_vm6 }
 0x117   : > { %v1355_v20 = vadd.f32 %v2452_v28, %v1354_v26  ;;  %2459 = vpow2.f32 %v2042_v11  ;;  %v4040_v24 = vadd.f32 %v4036_v42, %v3946_v62  ;;  %v2456_v53 = vpop.eup %2455  ;;  %v1375_v1 = vand.u32 2147483647, %v3992_v61 }
 0x118   : > { %v1614_v17 = vsel %vm4017_vm4, %v2450_v16, %v1610_v22  ;;  %v1377_v63 = vand.u32 2147483648, %v3992_v61  ;;  %v405_v2 = vmul.f32 %v3943_v45, %v2168_v19  ;;  %v1144_v62 = vmul.f32 %v2454_v27, %v1143_v8 }
 0x119   : > { %v1619_v35 = vsel %vm3972_vm12, %v1618_v6, %v1614_v17  ;;  %v1359_v10 = vsel %vm4026_vm5, %v2452_v28, %v1355_v20  ;;  %v1622_v5 = vmul.f32 %v2456_v53, %v3977_v0  ;;  %v2458_v9 = vpop.eup %2457  ;;  %vm1627_vm10 = vweird.f32 %v2456_v53 }
 0x11a   : > { %v1768_v56 = vmul.f32 %v1619_v35, %v3860_v48  ;;  %v1364_v16 = vsel %vm3988_vm15, %v1363_v23, %v1359_v10  ;;  %v2074_v6 = vmul.f32 -1.442695, %v4040_v24  ;;  %v1145_v57 = vadd.f32 %v2454_v27, %v1144_v62  ;;  %vm4083_vm12 = vmor %vm1626_vm8, %vm1627_vm10 }
 0x11b   : > { %v1751_v50 = vmul.f32 %v1364_v16, %v3863_v30  ;;  %v1623_v46 = vsub.f32 1.0, %v1622_v5  ;;  %v1367_v11 = vmul.f32 %v2458_v9, %v3992_v61  ;;  %vm1372_vm11 = vweird.f32 %v2458_v9 }
 0x11c   : > { %1880 = vxpose.xlu0.b32.cont [10/16] (narrow) %v1768_v56, 8  ;;  %2461 = vpow2.f32 %v2074_v6  ;;  %v4068_v48 = vadd.f32 %v4036_v42, %v405_v2  ;;  %v391_v3 = vmul.f32 %v3943_v45, %v2140_v51  ;;  %v1149_v23 = vsel %vm4060_vm9, %v2454_v27, %v1145_v57  ;;  %vm4100_vm14 = vmor %vm1371_vm7, %vm1372_vm11  ;;  %v4159_v6 = vld [vmem:[%s2606_s26 + $0x78] sm:$0xff]  }
 0x11d   : > { %v2460_v32 = vpop.eup %2459  ;;  %1847 = vxpose.xlu2.b32.cont [9/16] (narrow) %v1751_v50, 8  ;;  %v1624_v30 = vmul.f32 %v2456_v53, %v1623_v46  ;;  %v1368_v28 = vsub.f32 1.0, %v1367_v11  ;;  %v423_v31 = vmul.f32 %v3943_v45, %v2204_v37  ;;  %v1154_v49 = vsel %vm4009_vm3, %v1153_v39, %v1149_v23 }
 0x11e   : > { %v4087_v51 = vadd.f32 1.0, %v2460_v32  ;;  %v2057_v29 = vmul.f32 -1.442695, %v4068_v48  ;;  %v4091_v54 = vadd.f32 %v4036_v42, %v391_v3  ;;  %v1737_v58 = vmul.f32 %v1154_v49, %v3870_v43 }
 0x11f   : > { %v1625_v37 = vadd.f32 %v2456_v53, %v1624_v30  ;;  %v1369_v15 = vmul.f32 %v2458_v9, %v1368_v28  ;;  %v4095_v41 = vadd.f32 %v4036_v42, %v423_v31  ;;  %vm4104_vm15 = vcmp.eq.f32.partialorder %v1375_v1, 8.507059e+37 }
 0x120   : > { %v1378_v44 = vor.u32 1.1754944e-38, %v1377_v63  ;;  %2463 = vrcp.f32 %v4087_v51  ;;  %1817 = vxpose.xlu1.b32.cont [11/16] (narrow) %v1737_v58, 8  ;;  %v2043_v60 = vmul.f32 -1.442695, %v4091_v54  ;;  %v1165_v59 = vand.u32 2147483647, %v4087_v51 }
 0x121   : > { %v1629_v43 = vsel %vm4083_vm12, %v2456_v53, %v1625_v37  ;;  %v1370_v21 = vadd.f32 %v2458_v9, %v1369_v15  ;;  %2465 = vpow2.f32 %v2057_v29  ;;  %v2075_v38 = vmul.f32 -1.442695, %v4095_v41 }
 0x122   : > { %v2462_v61 = vpop.eup %2461  ;;  %v1634_v27 = vsel %vm4031_vm13, %v1633_v14, %v1629_v43  ;;  %2467 = vpow2.f32 %v2043_v60  ;;  %v2169_v39 = vunpack.c.h.bf16 %v3932_v18  ;;  %v2141_v22 = vunpack.c.h.bf16 %v3935_v13 }
 0x123   : > { %v1769_v7 = vmul.f32 %v1634_v27, %v3881_v25  ;;  %v1374_v4 = vsel %vm4100_vm14, %v2458_v9, %v1370_v21  ;;  %v4119_v26 = vadd.f32 1.0, %v2462_v61  ;;  %2469 = vpow2.f32 %v2075_v38  ;;  %v4129_v25 = vld [vmem:[%s2606_s26 + $0xb0] sm:$0xff]  }
 0x124   : > { %v1379_v33 = vsel %vm4104_vm15, %v1378_v44, %v1374_v4  ;;  %v1167_v14 = vand.u32 2147483648, %v4087_v51  ;;  %v406_v53 = vmul.f32 %v3943_v45, %v2169_v39  ;;  %v392_v18 = vmul.f32 %v3943_v45, %v2141_v22 }
 0x125   : > { %1881 = vxpose.xlu0.b32.cont [11/16] (narrow) %v1769_v7, 8  ;;  %v1752_v52 = vmul.f32 %v1379_v33, %v3900_v55  ;;  %2471 = vrcp.f32 %v4119_v26  ;;  %v1645_v8 = vand.u32 2147483647, %v4119_v26  ;;  %v1647_v12 = vand.u32 2147483648, %v4119_v26 }
 0x126   : > { %v2464_v20 = vpop.eup %2463  ;;  %vm1161_vm0 = vweird.f32 %v4087_v51  ;;  %vm4137_vm1 = vcmp.eq.f32.partialorder %v1165_v59, 8.507059e+37  ;;  %v4144_v63 = vadd.f32 %v4036_v42, %v406_v53  ;;  %v2205_v2 = vunpack.c.h.bf16 %v3952_v47  ;;  %v4203_v59 = vld [vmem:[%s2606_s26 + $0xf8] sm:$0xff]  }
 0x127   : > { %v2466_v17 = vpop.eup %2465  ;;  %1848 = vxpose.xlu2.b32.cont [10/16] (narrow) %v1752_v52, 8  ;;  %v1157_v13 = vmul.f32 %v2464_v20, %v4087_v51  ;;  %v2172_v35 = vunpack.c.l.bf16 %v4129_v25  ;;  %vm1162_vm2 = vweird.f32 %v2464_v20  ;;  %v1168_v5 = vor.u32 1.1754944e-38, %v1167_v14 }
 0x128   : > { %v4141_v1 = vadd.f32 1.0, %v2466_v17  ;;  %v2468_v10 = vpop.eup %2467  ;;  %vm1641_vm3 = vweird.f32 %v4119_v26  ;;  %vm4149_vm4 = vcmp.eq.f32.partialorder %v1645_v8, 8.507059e+37  ;;  %v1648_v16 = vor.u32 1.1754944e-38, %v1647_v12  ;;  %vm4169_vm8 = vmor %vm1161_vm0, %vm1162_vm2 }
 0x129   : > { %v1158_v62 = vsub.f32 1.0, %v1157_v13  ;;  %v2470_v9 = vpop.eup %2469  ;;  %v4156_v47 = vadd.f32 %v4036_v42, %v392_v18  ;;  %v4162_v11 = vadd.f32 1.0, %v2468_v10  ;;  %v2058_v30 = vmul.f32 -1.442695, %v4144_v63 }
 0x12a   : > { %2473 = vrcp.f32 %v4141_v1  ;;  %v1390_v19 = vand.u32 2147483647, %v4141_v1  ;;  %v1392_v46 = vand.u32 2147483648, %v4141_v1  ;;  %v4164_v3 = vadd.f32 1.0, %v2470_v9 }
 0x12b   : > { %v2472_v50 = vpop.eup %2471  ;;  %v1159_v57 = vmul.f32 %v2464_v20, %v1158_v62  ;;  %v424_v28 = vmul.f32 %v3943_v45, %v2205_v2  ;;  %v407_v31 = vmul.f32 %v3943_v45, %v2172_v35  ;;  %vm1386_vm5 = vweird.f32 %v4141_v1 }
 0x12c   : > { %v1637_v23 = vmul.f32 %v2472_v50, %v4119_v26  ;;  %2475 = vrcp.f32 %v4162_v11  ;;  %v2144_v36 = vunpack.c.l.bf16 %v4159_v6  ;;  %vm1642_vm6 = vweird.f32 %v2472_v50 }
 0x12d   : > { %v1160_v49 = vadd.f32 %v2464_v20, %v1159_v57  ;;  %v1180_v29 = vand.u32 2147483647, %v4162_v11  ;;  %2477 = vrcp.f32 %v4164_v3  ;;  %vm4184_vm7 = vcmp.eq.f32.partialorder %v1390_v19, 8.507059e+37  ;;  %vm4195_vm9 = vmor %vm1641_vm3, %vm1642_vm6 }
 0x12e   : > { %v1638_v51 = vsub.f32 1.0, %v1637_v23  ;;  %v1393_v15 = vor.u32 1.1754944e-38, %v1392_v46  ;;  %vm1176_vm13 = vweird.f32 %v4162_v11  ;;  %v1182_v43 = vand.u32 2147483648, %v4162_v11 }
 0x12f   : > { %v1164_v58 = vsel %vm4169_vm8, %v2464_v20, %v1160_v49  ;;  %2479 = vpow2.f32 %v2058_v30  ;;  %vm1656_vm10 = vweird.f32 %v4164_v3  ;;  %v1660_v27 = vand.u32 2147483647, %v4164_v3 }
 0x130   : > { %v2474_v0 = vpop.eup %2473  ;;  %v1169_v34 = vsel %vm4137_vm1, %v1168_v5, %v1164_v58  ;;  %v1639_v44 = vmul.f32 %v2472_v50, %v1638_v51  ;;  %vm4205_vm11 = vcmp.eq.f32.partialorder %v1180_v29, 8.507059e+37  ;;  %v2044_v4 = vmul.f32 -1.442695, %v4156_v47 }
 0x131   : > { %v1738_v21 = vmul.f32 %v1169_v34, %v3940_v40  ;;  %v1382_v61 = vmul.f32 %v2474_v0, %v4141_v1  ;;  %v1662_v40 = vand.u32 2147483648, %v4164_v3  ;;  %v4212_v26 = vadd.f32 %v4036_v42, %v424_v28 }
 0x132   : > { %v1640_v38 = vadd.f32 %v2472_v50, %v1639_v44  ;;  %v2476_v33 = vpop.eup %2475  ;;  %vm1387_vm12 = vweird.f32 %v2474_v0  ;;  %v4215_v22 = vadd.f32 %v4036_v42, %v407_v31  ;;  %v393_v52 = vmul.f32 %v3943_v45, %v2144_v36 }
 0x133   : > { %1818 = vxpose.xlu1.b32.cont [12/16] (narrow) %v1738_v21, 8  ;;  %v1383_v39 = vsub.f32 1.0, %v1382_v61  ;;  %v2478_v14 = vpop.eup %2477  ;;  %v1172_v8 = vmul.f32 %v2476_v33, %v4162_v11  ;;  %2481 = vpow2.f32 %v2044_v4  ;;  %v2208_v12 = vunpack.c.l.bf16 %v4203_v59  ;;  %vm4228_vm15 = vmor %vm1386_vm5, %vm1387_vm12 }
 0x134   : > { %v1644_v20 = vsel %vm4195_vm9, %v2472_v50, %v1640_v38  ;;  %vm1177_vm14 = vweird.f32 %v2476_v33  ;;  %v1652_v17 = vmul.f32 %v2478_v14, %v4164_v3  ;;  %vm1657_vm0 = vweird.f32 %v2478_v14 }
 0x135   : > { %v1649_v53 = vsel %vm4149_vm4, %v1648_v16, %v1644_v20  ;;  %v1384_v18 = vmul.f32 %v2474_v0, %v1383_v39  ;;  %v2480_v13 = vpop.eup %2479  ;;  %v1173_v35 = vsub.f32 1.0, %v1172_v8  ;;  %v2076_v10 = vmul.f32 -1.442695, %v4212_v26  ;;  %vm4244_vm1 = vmor %vm1176_vm13, %vm1177_vm14 }
 0x136   : > { %v1770_v55 = vmul.f32 %v1649_v53, %v4040_v24  ;;  %v1653_v5 = vsub.f32 1.0, %v1652_v17  ;;  %v4233_v9 = vadd.f32 1.0, %v2480_v13  ;;  %v2059_v56 = vmul.f32 -1.442695, %v4215_v22  ;;  %vm4258_vm3 = vmor %vm1656_vm10, %vm1657_vm0 }
 0x137   : > { %v1385_v62 = vadd.f32 %v2474_v0, %v1384_v18  ;;  %v1174_v16 = vmul.f32 %v2476_v33, %v1173_v35  ;;  %v1183_v19 = vor.u32 1.1754944e-38, %v1182_v43  ;;  %2483 = vpow2.f32 %v2076_v10 }
 0x138   : > { %1882 = vxpose.xlu0.b32.cont [12/16] (narrow) %v1770_v55, 8  ;;  %v4237_v24 = vadd.f32 %v4036_v42, %v393_v52  ;;  %v1654_v57 = vmul.f32 %v2478_v14, %v1653_v5  ;;  %vm4248_vm2 = vcmp.eq.f32.partialorder %v1660_v27, 8.507059e+37  ;;  %2485 = vrcp.f32 %v4233_v9 }
 0x139   : > { %v1389_v1 = vsel %vm4228_vm15, %v2474_v0, %v1385_v62  ;;  %v2482_v32 = vpop.eup %2481  ;;  %v1175_v30 = vadd.f32 %v2476_v33, %v1174_v16  ;;  %v1663_v28 = vor.u32 1.1754944e-38, %v1662_v40  ;;  %v425_v31 = vmul.f32 %v3943_v45, %v2208_v12 }
 0x13a   : > { %v1394_v23 = vsel %vm4184_vm7, %v1393_v15, %v1389_v1  ;;  %v1655_v36 = vadd.f32 %v2478_v14, %v1654_v57  ;;  %v4264_v51 = vadd.f32 1.0, %v2482_v32  ;;  %2487 = vpow2.f32 %v2059_v56 }
 0x13b   : > { %v1753_v49 = vmul.f32 %v1394_v23, %v4068_v48  ;;  %v1179_v29 = vsel %vm4244_vm1, %v2476_v33, %v1175_v30  ;;  %v2045_v58 = vmul.f32 -1.442695, %v4237_v24  ;;  %v1405_v15 = vand.u32 2147483647, %v4233_v9 }
 0x13c   : > { %v1184_v3 = vsel %vm4205_vm11, %v1183_v19, %v1179_v29  ;;  %v1659_v37 = vsel %vm4258_vm3, %v2478_v14, %v1655_v36  ;;  %2489 = vrcp.f32 %v4264_v51  ;;  %v1407_v44 = vand.u32 2147483648, %v4233_v9 }
 0x13d   : > { %1849 = vxpose.xlu2.b32.cont [11/16] (narrow) %v1753_v49, 8  ;;  %v2484_v48 = vpop.eup %2483  ;;  %v1739_v0 = vmul.f32 %v1184_v3, %v4091_v54  ;;  %v1664_v34 = vsel %vm4248_vm2, %v1663_v28, %v1659_v37  ;;  %v2173_v43 = vunpack.c.h.bf16 %v4129_v25  ;;  %2491 = vpow2.f32 %v2045_v58 }
 0x13e   : > { %v2486_v21 = vpop.eup %2485  ;;  %v1771_v60 = vmul.f32 %v1664_v34, %v4095_v41  ;;  %v4281_v61 = vadd.f32 1.0, %v2484_v48  ;;  %v4284_v27 = vadd.f32 %v4036_v42, %v425_v31  ;;  %vm1401_vm4 = vweird.f32 %v4233_v9 }
 0x13f   : > { %1819 = vxpose.xlu1.b32.cont [13/16] (narrow) %v1739_v0, 8  ;;  %v1397_v38 = vmul.f32 %v2486_v21, %v4233_v9  ;;  %v1195_v54 = vand.u32 2147483647, %v4264_v51  ;;  %vm1402_vm8 = vweird.f32 %v2486_v21  ;;  %vm4289_vm5 = vcmp.eq.f32.partialorder %v1405_v15, 8.507059e+37 }
 0x140   : > { %v2488_v7 = vpop.eup %2487  ;;  %1883 = vxpose.xlu0.b32.cont [13/16] (narrow) %v1771_v60, 8  ;;  %v1197_v41 = vand.u32 2147483648, %v4264_v51  ;;  %2493 = vrcp.f32 %v4281_v61  ;;  %v1675_v4 = vand.u32 2147483647, %v4281_v61  ;;  %v2077_v39 = vmul.f32 -1.442695, %v4284_v27  ;;  %vm4311_vm13 = vmor %vm1401_vm4, %vm1402_vm8 }
 0x141   : > { %v1398_v40 = vsub.f32 1.0, %v1397_v38  ;;  %v4296_v33 = vadd.f32 1.0, %v2488_v7  ;;  %v1408_v14 = vor.u32 1.1754944e-38, %v1407_v44  ;;  %vm1191_vm6 = vweird.f32 %v4264_v51 }
 0x142   : > { %v2490_v52 = vpop.eup %2489  ;;  %v1677_v20 = vand.u32 2147483648, %v4281_v61  ;;  %v408_v8 = vmul.f32 %v3943_v45, %v2173_v43  ;;  %vm4303_vm7 = vcmp.eq.f32.partialorder %v1195_v54, 8.507059e+37  ;;  %v1198_v55 = vor.u32 1.1754944e-38, %v1197_v41 }
 0x143   : > { %v1399_v12 = vmul.f32 %v2486_v21, %v1398_v40  ;;  %v1187_v53 = vmul.f32 %v2490_v52, %v4264_v51  ;;  %2495 = vrcp.f32 %v4296_v33  ;;  %v2492_v17 = vpop.eup %2491  ;;  %vm1671_vm9 = vweird.f32 %v4281_v61 }
 0x144   : > { %2497 = vpow2.f32 %v2077_v39  ;;  %v2145_v2 = vunpack.c.h.bf16 %v4159_v6  ;;  %vm1192_vm10 = vweird.f32 %v2490_v52  ;;  %vm4317_vm11 = vcmp.eq.f32.partialorder %v1675_v4, 8.507059e+37  ;;  %v2232_v4 = vld [vmem:[%s2606_s26 + $0xb8] sm:$0xff]  }
 0x145   : > { %v1400_v35 = vadd.f32 %v2486_v21, %v1399_v12  ;;  %v1188_v10 = vsub.f32 1.0, %v1187_v53  ;;  %v4321_v5 = vadd.f32 1.0, %v2492_v17  ;;  %v1678_v56 = vor.u32 1.1754944e-38, %v1677_v20  ;;  %vm4336_vm14 = vmor %vm1191_vm6, %vm1192_vm10 }
 0x146   : > { %v2494_v9 = vpop.eup %2493  ;;  %vm1416_vm12 = vweird.f32 %v4296_v33  ;;  %v4325_v16 = vadd.f32 %v4036_v42, %v408_v8  ;;  %v2209_v19 = vunpack.c.h.bf16 %v4203_v59  ;;  %v1420_v57 = vand.u32 2147483647, %v4296_v33 }
 0x147   : > { %v1404_v6 = vsel %vm4311_vm13, %v2486_v21, %v1400_v35  ;;  %v1189_v1 = vmul.f32 %v2490_v52, %v1188_v10  ;;  %v1667_v50 = vmul.f32 %v2494_v9, %v4281_v61  ;;  %v1422_v23 = vand.u32 2147483648, %v4296_v33 }
 0x148   : > { %v1409_v46 = vsel %vm4289_vm5, %v1408_v14, %v1404_v6  ;;  %2499 = vrcp.f32 %v4321_v5  ;;  %v394_v59 = vmul.f32 %v3943_v45, %v2145_v2  ;;  %vm1672_vm15 = vweird.f32 %v2494_v9 }
 0x149   : > { %v2496_v30 = vpop.eup %2495  ;;  %v1754_v11 = vmul.f32 %v1409_v46, %v4144_v63  ;;  %v1190_v28 = vadd.f32 %v2490_v52, %v1189_v1  ;;  %v1668_v31 = vsub.f32 1.0, %v1667_v50  ;;  %v1210_v51 = vand.u32 2147483647, %v4321_v5  ;;  %vm4356_vm1 = vmor %vm1671_vm9, %vm1672_vm15 }
 0x14a   : > { %v2498_v49 = vpop.eup %2497  ;;  %v1412_v36 = vmul.f32 %v2496_v30, %v4296_v33  ;;  %v2060_v29 = vmul.f32 -1.442695, %v4325_v16  ;;  %v426_v58 = vmul.f32 %v3943_v45, %v2209_v19  ;;  %vm1417_vm0 = vweird.f32 %v2496_v30 }
 0x14b   : > { %1850 = vxpose.xlu2.b32.cont [12/16] (narrow) %v1754_v11, 8  ;;  %v1194_v3 = vsel %vm4336_vm14, %v2490_v52, %v1190_v28  ;;  %v1669_v37 = vmul.f32 %v2494_v9, %v1668_v31  ;;  %v4350_v15 = vadd.f32 1.0, %v2498_v49  ;;  %v4361_v34 = vadd.f32 %v4036_v42, %v394_v59  ;;  %vm4376_vm3 = vmor %vm1416_vm12, %vm1417_vm0 }
 0x14c   : > { %v1199_v63 = vsel %vm4303_vm7, %v1198_v55, %v1194_v3  ;;  %v1413_v0 = vsub.f32 1.0, %v1412_v36  ;;  %2501 = vpow2.f32 %v2060_v29  ;;  %vm4364_vm2 = vcmp.eq.f32.partialorder %v1420_v57, 8.507059e+37 }
 0x14d   : > { %v1740_v44 = vmul.f32 %v1199_v63, %v4156_v47  ;;  %v1670_v43 = vadd.f32 %v2494_v9, %v1669_v37  ;;  %2503 = vrcp.f32 %v4350_v15  ;;  %v1423_v38 = vor.u32 1.1754944e-38, %v1422_v23 }
 0x14e   : > { %v2500_v60 = vpop.eup %2499  ;;  %v1414_v61 = vmul.f32 %v2496_v30, %v1413_v0  ;;  %v1212_v54 = vand.u32 2147483648, %v4321_v5  ;;  %v2046_v7 = vmul.f32 -1.442695, %v4361_v34  ;;  %vm1206_vm4 = vweird.f32 %v4321_v5 }
 0x14f   : > { %1820 = vxpose.xlu1.b32.cont [14/16] (narrow) %v1740_v44, 8  ;;  %v1674_v25 = vsel %vm4356_vm1, %v2494_v9, %v1670_v43  ;;  %v1202_v41 = vmul.f32 %v2500_v60, %v4321_v5  ;;  %v4383_v40 = vadd.f32 %v4036_v42, %v426_v58  ;;  %vm1207_vm8 = vweird.f32 %v2500_v60  ;;  %v1791_v44 = vpop.trf.xlu0 }
 0x150   : > { %v1679_v39 = vsel %vm4317_vm11, %v1678_v56, %v1674_v25  ;;  %v1415_v52 = vadd.f32 %v2496_v30, %v1414_v61  ;;  %vm4388_vm5 = vcmp.eq.f32.partialorder %v1210_v51, 8.507059e+37  ;;  %2505 = vpow2.f32 %v2046_v7  ;;  %vm4402_vm6 = vmor %vm1206_vm4, %vm1207_vm8  ;;  %1903 = vst [vmem:[%s4437_s30] sm:$0xff] %v1791_v44 }
 0x151   : > { %v1772_v33 = vmul.f32 %v1679_v39, %v4212_v26  ;;  %v1203_v20 = vsub.f32 1.0, %v1202_v41  ;;  %v2078_v8 = vmul.f32 -1.442695, %v4383_v40  ;;  %v1213_v18 = vor.u32 1.1754944e-38, %v1212_v54 }
 0x152   : > { %v2502_v12 = vpop.eup %2501  ;;  %v1419_v53 = vsel %vm4376_vm3, %v2496_v30, %v1415_v52  ;;  %v2176_v17 = vunpack.c.l.bf16 %v2232_v4  ;;  %v2177_v13 = vunpack.c.h.bf16 %v2232_v4  ;;  %vm1686_vm7 = vweird.f32 %v4350_v15 }
 0x153   : > { %v2504_v55 = vpop.eup %2503  ;;  %1884 = vxpose.xlu0.b32.cont [14/16] (narrow) %v1772_v33, 8  ;;  %v1424_v2 = vsel %vm4364_vm2, %v1423_v38, %v1419_v53  ;;  %v1204_v35 = vmul.f32 %v2500_v60, %v1203_v20  ;;  %v732_v10 = vadd.f32 1.0, %v2502_v12  ;;  %2507 = vpow2.f32 %v2078_v8 }
 0x154   : > { %v1755_v26 = vmul.f32 %v1424_v2, %v4215_v22  ;;  %v1682_v9 = vmul.f32 %v2504_v55, %v4350_v15  ;;  %v409_v56 = vmul.f32 %v3943_v45, %v2176_v17  ;;  %v1690_v6 = vand.u32 2147483647, %v4350_v15 }
 0x155   : > { %v1205_v19 = vadd.f32 %v2500_v60, %v1204_v35  ;;  %v1692_v1 = vand.u32 2147483648, %v4350_v15  ;;  %2509 = vrcp.f32 %v732_v10  ;;  %vm1687_vm13 = vweird.f32 %v2504_v55 }
 0x156   : > { %1851 = vxpose.xlu2.b32.cont [13/16] (narrow) %v1755_v26, 8  ;;  %v1683_v22 = vsub.f32 1.0, %v1682_v9  ;;  %v4412_v5 = vadd.f32 %v4036_v42, %v409_v56  ;;  %v410_v50 = vmul.f32 %v3943_v45, %v2177_v13  ;;  %v2506_v57 = vpop.eup %2505  ;;  %vm4422_vm9 = vmor %vm1686_vm7, %vm1687_vm13  ;;  %vm1691_vm10 = vcmp.eq.f32.partialorder %v1690_v6, 8.507059e+37 }
 0x157   : > { %v1209_v46 = vsel %vm4402_vm6, %v2500_v60, %v1205_v19  ;;  %v718_v59 = vadd.f32 1.0, %v2506_v57  ;;  %v1693_v31 = vor.u32 1.1754944e-38, %v1692_v1  ;;  %vm1431_vm11 = vweird.f32 %v732_v10 }
 0x158   : > { %v1214_v32 = vsel %vm4388_vm5, %v1213_v18, %v1209_v46  ;;  %v1684_v23 = vmul.f32 %v2504_v55, %v1683_v22  ;;  %v2061_v45 = vmul.f32 -1.442695, %v4412_v5  ;;  %v4428_v49 = vadd.f32 %v4036_v42, %v410_v50 }
 0x159   : > { %v2508_v30 = vpop.eup %2507  ;;  %v1741_v11 = vmul.f32 %v1214_v32, %v4237_v24  ;;  %2511 = vrcp.f32 %v718_v59  ;;  %v1437_v15 = vand.u32 2147483648, %v732_v10  ;;  %v1435_v48 = vand.u32 2147483647, %v732_v10 }
 0x15a   : > { %v1685_v36 = vadd.f32 %v2504_v55, %v1684_v23  ;;  %v750_v29 = vadd.f32 1.0, %v2508_v30  ;;  %2513 = vpow2.f32 %v2061_v45  ;;  %v2062_v24 = vmul.f32 -1.442695, %v4428_v49 }
 0x15b   : > { %v2510_v51 = vpop.eup %2509  ;;  %1821 = vxpose.xlu1.b32.cont [15/16] (narrow) %v1741_v11, 8  ;;  %v1227_v0 = vand.u32 2147483648, %v718_v59  ;;  %v1438_v38 = vor.u32 1.1754944e-38, %v1437_v15  ;;  %vm1436_vm15 = vcmp.eq.f32.partialorder %v1435_v48, 8.507059e+37  ;;  %vm1221_vm0 = vweird.f32 %v718_v59 }
 0x15c   : > { %v1689_v58 = vsel %vm4422_vm9, %v2504_v55, %v1685_v36  ;;  %v1427_v3 = vmul.f32 %v2510_v51, %v732_v10  ;;  %2515 = vrcp.f32 %v750_v29  ;;  %vm1432_vm12 = vweird.f32 %v2510_v51 }
 0x15d   : > { %v1694_v37 = vsel %vm1691_vm10, %v1693_v31, %v1689_v58  ;;  %2517 = vpow2.f32 %v2062_v24  ;;  %vm4442_vm14 = vmor %vm1431_vm11, %vm1432_vm12  ;;  %v1225_v41 = vand.u32 2147483647, %v718_v59  ;;  %v1228_v4 = vor.u32 1.1754944e-38, %v1227_v0 }
 0x15e   : > { %v1773_v42 = vmul.f32 %v1694_v37, %v4284_v27  ;;  %v1428_v63 = vsub.f32 1.0, %v1427_v3  ;;  %vm1701_vm2 = vweird.f32 %v750_v29  ;;  %v1705_v8 = vand.u32 2147483647, %v750_v29 }
 0x15f   : > { %v2512_v43 = vpop.eup %2511  ;;  %v1707_v12 = vand.u32 2147483648, %v750_v29  ;;  %vm1226_vm8 = vcmp.eq.f32.partialorder %v1225_v41, 8.507059e+37 }
 0x160   : > { %1885 = vxpose.xlu0.b32.cont [15/16] (narrow) %v1773_v42, 8  ;;  %v1429_v21 = vmul.f32 %v2510_v51, %v1428_v63  ;;  %v2514_v60 = vpop.eup %2513  ;;  %v1217_v54 = vmul.f32 %v2512_v43, %v718_v59  ;;  %vm1222_vm1 = vweird.f32 %v2512_v43  ;;  %vm1706_vm6 = vcmp.eq.f32.partialorder %v1705_v8, 8.507059e+37 }
 0x161   : > { %v733_v27 = vadd.f32 1.0, %v2514_v60  ;;  %vm1223_vm3 = vmor %vm1221_vm0, %vm1222_vm1  ;;  %v1708_v35 = vor.u32 1.1754944e-38, %v1707_v12 }
 0x162   : > { %v1430_v7 = vadd.f32 %v2510_v51, %v1429_v21  ;;  %v2516_v25 = vpop.eup %2515  ;;  %v1218_v47 = vsub.f32 1.0, %v1217_v54 }
 0x163   : > { %v1697_v52 = vmul.f32 %v2516_v25, %v750_v29  ;;  %2519 = vrcp.f32 %v733_v27  ;;  %v2518_v14 = vpop.eup %2517  ;;  %vm1702_vm4 = vweird.f32 %v2516_v25  ;;  %v1450_v19 = vand.u32 2147483647, %v733_v27 }
 0x164   : > { %v1434_v39 = vsel %vm4442_vm14, %v2510_v51, %v1430_v7  ;;  %v1219_v20 = vmul.f32 %v2512_v43, %v1218_v47  ;;  %v734_v17 = vadd.f32 1.0, %v2518_v14  ;;  %vm1703_vm5 = vmor %vm1701_vm2, %vm1702_vm4  ;;  %v1452_v6 = vand.u32 2147483648, %v733_v27 }
 0x165   : > { %v1439_v33 = vsel %vm1436_vm15, %v1438_v38, %v1434_v39  ;;  %v1698_v18 = vsub.f32 1.0, %v1697_v52  ;;  %vm1446_vm7 = vweird.f32 %v733_v27  ;;  %vm1451_vm10 = vcmp.eq.f32.partialorder %v1450_v19, 8.507059e+37 }
 0x166   : > { %v1756_v53 = vmul.f32 %v1439_v33, %v4325_v16  ;;  %v1220_v13 = vadd.f32 %v2512_v43, %v1219_v20  ;;  %2521 = vrcp.f32 %v734_v17  ;;  %v1453_v23 = vor.u32 1.1754944e-38, %v1452_v6 }
 0x167   : > { %v1699_v55 = vmul.f32 %v2516_v25, %v1698_v18  ;;  %vm1461_vm11 = vweird.f32 %v734_v17  ;;  %v1465_v11 = vand.u32 2147483647, %v734_v17 }
 0x168   : > { %1852 = vxpose.xlu2.b32.cont [14/16] (narrow) %v1756_v53, 8  ;;  %v1224_v2 = vsel %vm1223_vm3, %v2512_v43, %v1220_v13 }
 0x169   : > { %v2520_v10 = vpop.eup %2519  ;;  %v1229_v26 = vsel %vm1226_vm8, %v1228_v4, %v1224_v2  ;;  %v1700_v62 = vadd.f32 %v2516_v25, %v1699_v55  ;;  %vm1466_vm15 = vcmp.eq.f32.partialorder %v1465_v11, 8.507059e+37 }
 0x16a   : > { %v1742_v16 = vmul.f32 %v1229_v26, %v4361_v34  ;;  %v1442_v9 = vmul.f32 %v2520_v10, %v733_v27  ;;  %vm1447_vm13 = vweird.f32 %v2520_v10  ;;  %v1467_v34 = vand.u32 2147483648, %v734_v17 }
 0x16b   : > { %v1704_v56 = vsel %vm1703_vm5, %v2516_v25, %v1700_v62  ;;  %vm1448_vm9 = vmor %vm1446_vm7, %vm1447_vm13 }
 0x16c   : > { %1822 = vxpose.xlu1.b32.end [16/16] (narrow) %v1742_v16, 8  ;;  %v1709_v1 = vsel %vm1706_vm6, %v1708_v35, %v1704_v56  ;;  %v1443_v22 = vsub.f32 1.0, %v1442_v9  ;;  %v2522_v50 = vpop.eup %2521 }
 0x16d   : > { %v1774_v57 = vmul.f32 %v1709_v1, %v4383_v40  ;;  %v1457_v32 = vmul.f32 %v2522_v50, %v734_v17  ;;  %vm1462_vm12 = vweird.f32 %v2522_v50  ;;  %v1468_v40 = vor.u32 1.1754944e-38, %v1467_v34 }
 0x16e   : > { %v1444_v46 = vmul.f32 %v2520_v10, %v1443_v22  ;;  %vm1463_vm14 = vmor %vm1461_vm11, %vm1462_vm12 }
 0x16f   : > { %1886 = vxpose.xlu0.b32.end [16/16] (narrow) %v1774_v57, 8  ;;  %v1458_v30 = vsub.f32 1.0, %v1457_v32 }
 0x170   : > { %v1445_v59 = vadd.f32 %v2520_v10, %v1444_v46 }
 0x171   : > { %v1459_v31 = vmul.f32 %v2522_v50, %v1458_v30 }
 0x172   : > { %v1449_v28 = vsel %vm1448_vm9, %v2520_v10, %v1445_v59 }
 0x173   : > { %v1454_v45 = vsel %vm1451_vm10, %v1453_v23, %v1449_v28  ;;  %v1460_v51 = vadd.f32 %v2522_v50, %v1459_v31 }
 0x174   : > { %v1757_v36 = vmul.f32 %v1454_v45, %v4412_v5 }
 0x175   : > { %v1464_v29 = vsel %vm1463_vm14, %v2522_v50, %v1460_v51 }
 0x176   : > { %1853 = vxpose.xlu2.b32.cont [15/16] (narrow) %v1757_v36, 8  ;;  %v1469_v24 = vsel %vm1466_vm15, %v1468_v40, %v1464_v29 }
 0x177   : > { %v1758_v58 = vmul.f32 %v1469_v24, %v4428_v49 }
 0x17e   : > { %1854 = vxpose.xlu2.b32.end [16/16] (narrow) %v1758_v58, 8 }
 0x198   : > { %v1823_v3 = vpop.trf.xlu1 }
 0x199   : > { %1904 = vst [vmem:[%s4437_s30 + $0x8] sm:$0xff] %v1823_v3 }
 0x19b   : > { %v1887_v37 = vpop.trf.xlu0 }
 0x19c   : > { %1906 = vst [vmem:[%s4437_s30 + $0x18] sm:$0xff] %v1887_v37 }
 0x19f   : > { %v1855_v15 = vpop.trf.xlu2 }
 0x1a0   : > { %1905 = vst [vmem:[%s4437_s30 + $0x10] sm:$0xff] %v1855_v15 }
 0x1a1 PF: > { %s13_s14 = sadd.s32 1, %s2549_s14   ;;  %s4683_s12 = smov %s2545_s13 }
 0x1a2   : > { %p10_p6 = scmp.ge.s32.totalorder %s13_s14, 4   ;;  %s4684_s13 = smov %s4686_s15 }
 0x1a4   :  { %12 = sbr.rel (!%p10_p6) target bundleno = 2 (0x2), region = 68 }

// kernel: base_block_3d.2
= control target key start
LH: loop header
LB: loop body
LE: loop exit
PB: predicated region body
PF: predicated region fallthrough
CT: control target
= control target key end

     0   :  { %s1612_s15 = smov 0   ;;  %s2027_s0 = inlined_call_operand.vmem [shape: bf16[1024,128], index: 0, kind: input, shape index: {}]   ;;  %s2028_s1 = inlined_call_operand.vmem [shape: bf16[128,128], index: 1, kind: input, shape index: {}]   ;;  %s2029_s2 = inlined_call_operand.vmem [shape: bf16[1024,128], index: 2, kind: output, shape index: {0}]   ;;  %s2030_s3 = inlined_call_operand.vmem [shape: f32[2,1,128], index: 3, kind: output, shape index: {1}]   ;;  %s2031_s4 = inlined_call_operand.vmem [shape: f32[2,1,128], index: 4, kind: output, shape index: {2}]  }
   0x1 LB: > { %s1618_s16 = sadd.s32 4294967295, %s1585_s15   ;;  %p1149_p0 = scmp.ge.s32.totalorder %s1585_s15, 1  ;;  %s1585_s15 = sphi %s1612_s15, %s15_s15  }
   0x2   : > { %p168_p1 = scmp.lt.s32.totalorder %s1585_s15, 3 }
   0x4   : > { %p169_p2 = pnand %p1149_p0, %p168_p1 }
   0x5   : > { %s1150_s25 = sshll.u32 (!%p169_p2), %s1618_s16, 6  ;;  %p212_p4 = scmp.lt.s32.totalorder (!%p169_p2), %s1618_s16, 1 }
   0x6   : > { %172 = sbr.rel (%p169_p2) target bundleno = 402 (0x192), region = 28  ;;  %p201_p3 = scmp.lt.s32.totalorder (!%p169_p2), %s1150_s25, 127 }
   0xb   : > { %v1355_v0 = vld [vmem:[%s2028_s1 + $0x38] sm:$0xff]  ;;  %v1354_v1 = vld [vmem:[%s2028_s1 + $0x30] sm:$0xff]  ;;  %v1353_v2 = vld [vmem:[%s2028_s1 + $0x28] sm:$0xff]  ;;  %s2033_s25 = smov (!%p201_p3, %s1150_s25), 127  ;;  %s2035_s16 = smov (!%p212_p4, %s1618_s16), 1 }
   0xc   : > { %538 = vmatpush.bf16.msra.mxu0 %v1355_v0  ;;  %1547 = vmatpush.bf16.msra.mxu1 %v1355_v0  ;;  %v1352_v3 = vld [vmem:[%s2028_s1 + $0x20] sm:$0xff]  ;;  %v1351_v4 = vld [vmem:[%s2028_s1 + $0x18] sm:$0xff]  ;;  %v1350_v5 = vld [vmem:[%s2028_s1 + $0x10] sm:$0xff]  ;;  %s1151_s6 = sshll.u32 %s2033_s25, 2  ;;  %s214_s19 = scalar_lea.vmem %s2030_s3, %s2035_s16 }
   0xd   : > { %1548 = vmatpush.bf16.msra.mxu2 %v1355_v0  ;;  %1549 = vmatpush.bf16.msra.mxu3 %v1355_v0  ;;  %v1349_v6 = vld [vmem:[%s2028_s1 + $0x8] sm:$0xff]  ;;  %v1348_v7 = vld [vmem:[%s2028_s1] sm:$0xff]  ;;  %s1655_s11 = scalar_lea.vmem %s2027_s0, %s1151_s6  ;;  %s1694_s14 = scalar_lea.vmem %s2029_s2, %s1151_s6 }
   0xe   : > { %v1316_v8 = vld [vmem:[%s1655_s11] sm:$0xff]  ;;  %v1317_v10 = vld [vmem:[%s1655_s11 + $0x8] sm:$0xff]  ;;  %v1318_v13 = vld [vmem:[%s1655_s11 + $0x10] sm:$0xff]  ;;  %s217_s22 = scalar_lea.vmem %s2031_s4, %s2035_s16 }
   0xf   : > { %v1324_v9 = vld [vmem:[%s1655_s11 + $0x40] sm:$0xff]  ;;  %v1325_v11 = vld [vmem:[%s1655_s11 + $0x48] sm:$0xff]  ;;  %v1326_v14 = vld [vmem:[%s1655_s11 + $0x50] sm:$0xff] }
  0x10   : > { %539 = vmatpush.bf16.msra.mxu0 %v1354_v1  ;;  %1550 = vmatpush.bf16.msra.mxu1 %v1354_v1  ;;  %v1332_v12 = vld [vmem:[%s1655_s11 + $0x80] sm:$0xff]  ;;  %v1333_v15 = vld [vmem:[%s1655_s11 + $0x88] sm:$0xff]  ;;  %v1319_v16 = vld [vmem:[%s1655_s11 + $0x18] sm:$0xff] }
  0x11   : > { %1551 = vmatpush.bf16.msra.mxu2 %v1354_v1  ;;  %1552 = vmatpush.bf16.msra.mxu3 %v1354_v1  ;;  %v1327_v17 = vld [vmem:[%s1655_s11 + $0x58] sm:$0xff]  ;;  %v1334_v18 = vld [vmem:[%s1655_s11 + $0x90] sm:$0xff]  ;;  %v1340_v19 = vld [vmem:[%s1655_s11 + $0xc0] sm:$0xff] }
  0x12   : > { %v1320_v20 = vld [vmem:[%s1655_s11 + $0x20] sm:$0xff]  ;;  %v1335_v22 = vld [vmem:[%s1655_s11 + $0x98] sm:$0xff]  ;;  %v1341_v23 = vld [vmem:[%s1655_s11 + $0xc8] sm:$0xff] }
  0x13   : > { %v1328_v21 = vld [vmem:[%s1655_s11 + $0x60] sm:$0xff]  ;;  %v1321_v24 = vld [vmem:[%s1655_s11 + $0x28] sm:$0xff]  ;;  %v1342_v27 = vld [vmem:[%s1655_s11 + $0xd0] sm:$0xff] }
  0x14   : > { %540 = vmatpush.bf16.msra.mxu0 %v1353_v2  ;;  %1553 = vmatpush.bf16.msra.mxu1 %v1353_v2  ;;  %v1329_v25 = vld [vmem:[%s1655_s11 + $0x68] sm:$0xff]  ;;  %v1336_v26 = vld [vmem:[%s1655_s11 + $0xa0] sm:$0xff]  ;;  %v1322_v28 = vld [vmem:[%s1655_s11 + $0x30] sm:$0xff] }
  0x15   : > { %1554 = vmatpush.bf16.msra.mxu2 %v1353_v2  ;;  %1555 = vmatpush.bf16.msra.mxu3 %v1353_v2  ;;  %v1330_v29 = vld [vmem:[%s1655_s11 + $0x70] sm:$0xff]  ;;  %v1337_v30 = vld [vmem:[%s1655_s11 + $0xa8] sm:$0xff]  ;;  %v1343_v31 = vld [vmem:[%s1655_s11 + $0xd8] sm:$0xff] }
  0x16   : > { %v1323_v32 = vld [vmem:[%s1655_s11 + $0x38] sm:$0xff]  ;;  %v1338_v34 = vld [vmem:[%s1655_s11 + $0xb0] sm:$0xff]  ;;  %v1344_v35 = vld [vmem:[%s1655_s11 + $0xe0] sm:$0xff] }
  0x17   : > { %v1331_v33 = vld [vmem:[%s1655_s11 + $0x78] sm:$0xff]  ;;  %v1345_v39 = vld [vmem:[%s1655_s11 + $0xe8] sm:$0xff]  ;;  %v1346_v53 = vld [vmem:[%s1655_s11 + $0xf0] sm:$0xff] }
  0x18   : > { %541 = vmatpush.bf16.msra.mxu0 %v1352_v3  ;;  %1556 = vmatpush.bf16.msra.mxu1 %v1352_v3  ;;  %v1339_v38 = vld [vmem:[%s1655_s11 + $0xb8] sm:$0xff] }
  0x19   : > { %1557 = vmatpush.bf16.msra.mxu2 %v1352_v3  ;;  %1558 = vmatpush.bf16.msra.mxu3 %v1352_v3 }
  0x1c   : > { %542 = vmatpush.bf16.msra.mxu0 %v1351_v4  ;;  %1559 = vmatpush.bf16.msra.mxu1 %v1351_v4 }
  0x1d   : > { %1560 = vmatpush.bf16.msra.mxu2 %v1351_v4  ;;  %1561 = vmatpush.bf16.msra.mxu3 %v1351_v4 }
  0x20   : > { %543 = vmatpush.bf16.msra.mxu0 %v1350_v5  ;;  %1562 = vmatpush.bf16.msra.mxu1 %v1350_v5 }
  0x21   : > { %1563 = vmatpush.bf16.msra.mxu2 %v1350_v5  ;;  %1564 = vmatpush.bf16.msra.mxu3 %v1350_v5  ;;  %v1347_v5 = vld [vmem:[%s1655_s11 + $0xf8] sm:$0xff] }
  0x24   : > { %544 = vmatpush.bf16.msra.mxu0 %v1349_v6  ;;  %1565 = vmatpush.bf16.msra.mxu1 %v1349_v6 }
  0x25   : > { %1566 = vmatpush.bf16.msra.mxu2 %v1349_v6  ;;  %1567 = vmatpush.bf16.msra.mxu3 %v1349_v6 }
  0x28   : > { %545 = vmatpush.bf16.msra.mxu0 %v1348_v7  ;;  %1568 = vmatpush.bf16.msra.mxu1 %v1348_v7 }
  0x29   : > { %1569 = vmatpush.bf16.msra.mxu2 %v1348_v7  ;;  %1570 = vmatpush.bf16.msra.mxu3 %v1348_v7 }
  0x2b   : > { %546 = vmatmul.bf16.vlgmr.msra.gmra.mxu0 %v1316_v8  ;;  %586 = vmatmul.bf16.vlgmr.msra.gmra.mxu1 %v1324_v9 }
  0x2c   : > { %626 = vmatmul.bf16.vlgmr.msra.gmra.mxu2 %v1332_v12  ;;  %666 = vmatmul.bf16.vlgmr.msra.gmra.mxu3 %v1340_v19 }
  0x3b   : > { %551 = vmatmul.bf16.gmra.mxu0 %v1317_v10  ;;  %591 = vmatmul.bf16.gmra.mxu1 %v1325_v11 }
  0x3c   : > { %631 = vmatmul.bf16.gmra.mxu2 %v1333_v15  ;;  %671 = vmatmul.bf16.gmra.mxu3 %v1341_v23 }
  0x4b   : > { %556 = vmatmul.bf16.gmra.mxu0 %v1318_v13  ;;  %596 = vmatmul.bf16.gmra.mxu1 %v1326_v14 }
  0x4c   : > { %636 = vmatmul.bf16.gmra.mxu2 %v1334_v18  ;;  %676 = vmatmul.bf16.gmra.mxu3 %v1342_v27 }
  0x5b   : > { %561 = vmatmul.bf16.gmra.mxu0 %v1319_v16  ;;  %601 = vmatmul.bf16.gmra.mxu1 %v1327_v17 }
  0x5c   : > { %641 = vmatmul.bf16.gmra.mxu2 %v1335_v22  ;;  %681 = vmatmul.bf16.gmra.mxu3 %v1343_v31 }
  0x6b   : > { %566 = vmatmul.bf16.gmra.mxu0 %v1320_v20  ;;  %606 = vmatmul.bf16.gmra.mxu1 %v1328_v21 }
  0x6c   : > { %646 = vmatmul.bf16.gmra.mxu2 %v1336_v26  ;;  %686 = vmatmul.bf16.gmra.mxu3 %v1344_v35 }
  0x7b   : > { %571 = vmatmul.bf16.gmra.mxu0 %v1321_v24  ;;  %611 = vmatmul.bf16.gmra.mxu1 %v1329_v25 }
  0x7c   : > { %651 = vmatmul.bf16.gmra.mxu2 %v1337_v30  ;;  %691 = vmatmul.bf16.gmra.mxu3 %v1345_v39 }
  0x8b   : > { %576 = vmatmul.bf16.gmra.mxu0 %v1322_v28  ;;  %616 = vmatmul.bf16.gmra.mxu1 %v1330_v29 }
  0x8c   : > { %656 = vmatmul.bf16.gmra.mxu2 %v1338_v34  ;;  %696 = vmatmul.bf16.gmra.mxu3 %v1346_v53 }
  0x9b   : > { %581 = vmatmul.bf16.gmra.mxu0 %v1323_v32  ;;  %621 = vmatmul.bf16.gmra.mxu1 %v1331_v33 }
  0x9c   : > { %661 = vmatmul.bf16.gmra.mxu2 %v1339_v38  ;;  %701 = vmatmul.bf16.gmra.mxu3 %v1347_v5 }
  0xa8   : > { %v547_v36 = vpop.f32.mrf.mxu0  ;;  %v1685_v37 = vpop.f32.mrf.mxu1 }
  0xa9   : > { %v905_v40 = vmul.f32 %v547_v36, %v547_v36 }
  0xaf   : > { %v1709_v60 = vpop.f32.mrf.mxu2  ;;  %v1746_v20 = vpop.f32.mrf.mxu3 }
  0xb0   : > { %v549_v41 = vpop.f32.mrf.mxu0  ;;  %v1696_v42 = vpop.f32.mrf.mxu1 }
  0xb1   : > { %v1359_v43 = vpack.c.bf16 %v549_v41, %v547_v36  ;;  %v835_v44 = vadd.f32 %v549_v41, %v547_v36  ;;  %v906_v45 = vmul.f32 %v549_v41, %v549_v41  ;;  %v1399_v46 = vpack.c.bf16 %v1696_v42, %v1685_v37 }
  0xb3   : > { %1360 = vst [vmem:[%s1694_s14] sm:$0xff] %v1359_v43   ;;  %v969_v47 = vadd.f32 %v906_v45, %v905_v40 }
  0xb4   : > { %1523 = vst [vmem:[%s1694_s14 + $0x40] sm:$0xff] %v1399_v46  }
  0xb7   : > { %v1717_v2 = vpop.f32.mrf.mxu2  ;;  %v1754_v24 = vpop.f32.mrf.mxu3 }
  0xb8   : > { %v552_v48 = vpop.f32.mrf.mxu0  ;;  %v1702_v49 = vpop.f32.mrf.mxu1  ;;  %v1439_v3 = vpack.c.bf16 %v1717_v2, %v1709_v60  ;;  %v1479_v26 = vpack.c.bf16 %v1754_v24, %v1746_v20 }
  0xb9   : > { %v836_v50 = vadd.f32 %v835_v44, %v552_v48  ;;  %v907_v51 = vmul.f32 %v552_v48, %v552_v48 }
  0xba   : > { %1531 = vst [vmem:[%s1694_s14 + $0x80] sm:$0xff] %v1439_v3  }
  0xbb   : > { %v970_v52 = vadd.f32 %v969_v47, %v907_v51  ;;  %1539 = vst [vmem:[%s1694_s14 + $0xc0] sm:$0xff] %v1479_v26  }
  0xbf   : > { %v1729_v10 = vpop.f32.mrf.mxu2  ;;  %v1768_v32 = vpop.f32.mrf.mxu3 }
  0xc0   : > { %v554_v54 = vpop.f32.mrf.mxu0  ;;  %v1705_v55 = vpop.f32.mrf.mxu1 }
  0xc1   : > { %v1364_v56 = vpack.c.bf16 %v554_v54, %v552_v48  ;;  %v837_v57 = vadd.f32 %v836_v50, %v554_v54  ;;  %v908_v58 = vmul.f32 %v554_v54, %v554_v54  ;;  %v1404_v59 = vpack.c.bf16 %v1705_v55, %v1702_v49 }
  0xc3   : > { %1516 = vst [vmem:[%s1694_s14 + $0x8] sm:$0xff] %v1364_v56   ;;  %v971_v61 = vadd.f32 %v970_v52, %v908_v58 }
  0xc4   : > { %1524 = vst [vmem:[%s1694_s14 + $0x48] sm:$0xff] %v1404_v59  }
  0xc7   : > { %v1735_v13 = vpop.f32.mrf.mxu2  ;;  %v1776_v36 = vpop.f32.mrf.mxu3 }
  0xc8   : > { %v557_v62 = vpop.f32.mrf.mxu0  ;;  %v1713_v63 = vpop.f32.mrf.mxu1  ;;  %v1444_v14 = vpack.c.bf16 %v1735_v13, %v1729_v10  ;;  %v1484_v39 = vpack.c.bf16 %v1776_v36, %v1768_v32 }
  0xc9   : > { %v1715_v0 = vadd.f32 %v837_v57, %v557_v62  ;;  %v909_v1 = vmul.f32 %v557_v62, %v557_v62 }
  0xca   : > { %1532 = vst [vmem:[%s1694_s14 + $0x88] sm:$0xff] %v1444_v14  }
  0xcb   : > { %v1721_v4 = vadd.f32 %v971_v61, %v909_v1  ;;  %1540 = vst [vmem:[%s1694_s14 + $0xc8] sm:$0xff] %v1484_v39  }
  0xcf   : > { %v1744_v19 = vpop.f32.mrf.mxu2  ;;  %v1790_v46 = vpop.f32.mrf.mxu3 }
  0xd0   : > { %v559_v6 = vpop.f32.mrf.mxu0  ;;  %v1725_v7 = vpop.f32.mrf.mxu1 }
  0xd1   : > { %v1369_v8 = vpack.c.bf16 %v559_v6, %v557_v62  ;;  %v1409_v9 = vpack.c.bf16 %v1725_v7, %v1713_v63  ;;  %v910_v52 = vmul.f32 %v559_v6, %v559_v6  ;;  %v839_v57 = vadd.f32 %v1715_v0, %v559_v6 }
  0xd3   : > { %1517 = vst [vmem:[%s1694_s14 + $0x10] sm:$0xff] %v1369_v8   ;;  %v973_v58 = vadd.f32 %v1721_v4, %v910_v52 }
  0xd4   : > { %1525 = vst [vmem:[%s1694_s14 + $0x50] sm:$0xff] %v1409_v9  }
  0xd7   : > { %v1752_v23 = vpop.f32.mrf.mxu2  ;;  %v1798_v51 = vpop.f32.mrf.mxu3 }
  0xd8   : > { %v562_v11 = vpop.f32.mrf.mxu0  ;;  %v1733_v12 = vpop.f32.mrf.mxu1  ;;  %v1449_v25 = vpack.c.bf16 %v1752_v23, %v1744_v19  ;;  %v1489_v54 = vpack.c.bf16 %v1798_v51, %v1790_v46 }
  0xd9   : > { %v911_v56 = vmul.f32 %v562_v11, %v562_v11  ;;  %v840_v61 = vadd.f32 %v839_v57, %v562_v11 }
  0xda   : > { %1533 = vst [vmem:[%s1694_s14 + $0x90] sm:$0xff] %v1449_v25  }
  0xdb   : > { %1541 = vst [vmem:[%s1694_s14 + $0xd0] sm:$0xff] %v1489_v54   ;;  %v974_v62 = vadd.f32 %v973_v58, %v911_v56 }
  0xdf   : > { %v1766_v31 = vpop.f32.mrf.mxu2  ;;  %v1814_v0 = vpop.f32.mrf.mxu3 }
  0xe0   : > { %v564_v15 = vpop.f32.mrf.mxu0  ;;  %v1740_v16 = vpop.f32.mrf.mxu1 }
  0xe1   : > { %v1374_v17 = vpack.c.bf16 %v564_v15, %v562_v11  ;;  %v1414_v18 = vpack.c.bf16 %v1740_v16, %v1733_v12  ;;  %v912_v59 = vmul.f32 %v564_v15, %v564_v15  ;;  %v841_v8 = vadd.f32 %v840_v61, %v564_v15 }
  0xe3   : > { %1518 = vst [vmem:[%s1694_s14 + $0x18] sm:$0xff] %v1374_v17   ;;  %v975_v6 = vadd.f32 %v974_v62, %v912_v59 }
  0xe4   : > { %1526 = vst [vmem:[%s1694_s14 + $0x58] sm:$0xff] %v1414_v18  }
  0xe7   : > { %v1774_v35 = vpop.f32.mrf.mxu2  ;;  %v1822_v54 = vpop.f32.mrf.mxu3 }
  0xe8   : > { %v567_v21 = vpop.f32.mrf.mxu0  ;;  %v1750_v22 = vpop.f32.mrf.mxu1  ;;  %v1454_v38 = vpack.c.bf16 %v1774_v35, %v1766_v31  ;;  %v1494_v57 = vpack.c.bf16 %v1822_v54, %v1814_v0 }
  0xe9   : > { %v913_v1 = vmul.f32 %v567_v21, %v567_v21  ;;  %v842_v4 = vadd.f32 %v841_v8, %v567_v21 }
  0xea   : > { %1534 = vst [vmem:[%s1694_s14 + $0x98] sm:$0xff] %v1454_v38  }
  0xeb   : > { %v976_v11 = vadd.f32 %v975_v6, %v913_v1  ;;  %1542 = vst [vmem:[%s1694_s14 + $0xd8] sm:$0xff] %v1494_v57  }
  0xef   : > { %v1788_v45 = vpop.f32.mrf.mxu2 }
  0xf0   : > { %v569_v27 = vpop.f32.mrf.mxu0  ;;  %v1762_v28 = vpop.f32.mrf.mxu1 }
  0xf1   : > { %v1379_v29 = vpack.c.bf16 %v569_v27, %v567_v21  ;;  %v1419_v30 = vpack.c.bf16 %v1762_v28, %v1750_v22  ;;  %v914_v18 = vmul.f32 %v569_v27, %v569_v27  ;;  %v843_v26 = vadd.f32 %v842_v4, %v569_v27 }
  0xf3   : > { %1519 = vst [vmem:[%s1694_s14 + $0x20] sm:$0xff] %v1379_v29   ;;  %v977_v29 = vadd.f32 %v976_v11, %v914_v18  ;;  %v1836_v11 = vpop.f32.mrf.mxu3 }
  0xf4   : > { %1527 = vst [vmem:[%s1694_s14 + $0x60] sm:$0xff] %v1419_v30  }
  0xf7   : > { %v1796_v50 = vpop.f32.mrf.mxu2 }
  0xf8   : > { %v572_v33 = vpop.f32.mrf.mxu0  ;;  %v1772_v34 = vpop.f32.mrf.mxu1  ;;  %v1459_v53 = vpack.c.bf16 %v1796_v50, %v1788_v45 }
  0xf9   : > { %v915_v25 = vmul.f32 %v572_v33, %v572_v33  ;;  %v844_v15 = vadd.f32 %v843_v26, %v572_v33 }
  0xfa   : > { %1535 = vst [vmem:[%s1694_s14 + $0xa0] sm:$0xff] %v1459_v53  }
  0xfb   : > { %v978_v38 = vadd.f32 %v977_v29, %v915_v25  ;;  %v922_v29 = vmul.f32 %v1696_v42, %v1696_v42 }
  0xff   : > { %v1812_v17 = vpop.f32.mrf.mxu2 }
 0x100   : > { %v574_v40 = vpop.f32.mrf.mxu0  ;;  %v1784_v41 = vpop.f32.mrf.mxu1 }
 0x101   : > { %v1384_v43 = vpack.c.bf16 %v574_v40, %v572_v33  ;;  %v1424_v44 = vpack.c.bf16 %v1784_v41, %v1772_v34  ;;  %v916_v30 = vmul.f32 %v574_v40, %v574_v40  ;;  %v845_v52 = vadd.f32 %v844_v15, %v574_v40 }
 0x103   : > { %1520 = vst [vmem:[%s1694_s14 + $0x28] sm:$0xff] %v1384_v43   ;;  %v979_v21 = vadd.f32 %v978_v38, %v916_v30  ;;  %v923_v38 = vmul.f32 %v1702_v49, %v1702_v49 }
 0x104   : > { %1528 = vst [vmem:[%s1694_s14 + $0x68] sm:$0xff] %v1424_v44  }
 0x107   : > { %v1820_v53 = vpop.f32.mrf.mxu2 }
 0x108   : > { %v577_v47 = vpop.f32.mrf.mxu0  ;;  %v1794_v48 = vpop.f32.mrf.mxu1  ;;  %v1464_v27 = vpack.c.bf16 %v1820_v53, %v1812_v17 }
 0x109   : > { %v917_v39 = vmul.f32 %v577_v47, %v577_v47  ;;  %v846_v33 = vadd.f32 %v845_v52, %v577_v47  ;;  %v924_v52 = vmul.f32 %v1705_v55, %v1705_v55 }
 0x10a   : > { %1536 = vst [vmem:[%s1694_s14 + $0xa8] sm:$0xff] %v1464_v27   ;;  %v1854_v27 = vpop.f32.mrf.mxu3 }
 0x10b   : > { %v980_v58 = vadd.f32 %v979_v21, %v917_v39  ;;  %v1499_v57 = vpack.c.bf16 %v1854_v27, %v1836_v11 }
 0x10d   : > { %1543 = vst [vmem:[%s1694_s14 + $0xe0] sm:$0xff] %v1499_v57  }
 0x110   : > { %v579_v3 = vpop.f32.mrf.mxu0  ;;  %v1808_v5 = vpop.f32.mrf.mxu1 }
 0x111   : > { %v1389_v9 = vpack.c.bf16 %v579_v3, %v577_v47  ;;  %v1429_v14 = vpack.c.bf16 %v1808_v5, %v1794_v48  ;;  %v918_v56 = vmul.f32 %v579_v3, %v579_v3  ;;  %v847_v61 = vadd.f32 %v846_v33, %v579_v3  ;;  %v1834_v47 = vpop.f32.mrf.mxu2 }
 0x112   : > { %v921_v3 = vmul.f32 %v1685_v37, %v1685_v37  ;;  %v934_v57 = vmul.f32 %v1808_v5, %v1808_v5 }
 0x113   : > { %1521 = vst [vmem:[%s1694_s14 + $0x30] sm:$0xff] %v1389_v9   ;;  %v981_v40 = vadd.f32 %v980_v58, %v918_v56 }
 0x114   : > { %1529 = vst [vmem:[%s1694_s14 + $0x70] sm:$0xff] %v1429_v14  }
 0x118   : > { %v582_v43 = vpop.f32.mrf.mxu0  ;;  %v1818_v44 = vpop.f32.mrf.mxu1 }
 0x119   : > { %v919_v59 = vmul.f32 %v582_v43, %v582_v43  ;;  %v848_v62 = vadd.f32 %v847_v61, %v582_v43  ;;  %v1852_v56 = vpop.f32.mrf.mxu2 }
 0x11b   : > { %v982_v1 = vadd.f32 %v981_v40, %v919_v59  ;;  %v927_v40 = vmul.f32 %v1733_v12, %v1733_v12 }
 0x120   : > { %v584_v8 = vpop.f32.mrf.mxu0  ;;  %v1830_v9 = vpop.f32.mrf.mxu1 }
 0x121   : > { %v1394_v14 = vpack.c.bf16 %v584_v8, %v582_v43  ;;  %v849_v6 = vadd.f32 %v848_v62, %v584_v8  ;;  %v920_v18 = vmul.f32 %v584_v8, %v584_v8  ;;  %v1434_v4 = vpack.c.bf16 %v1830_v9, %v1818_v44 }
 0x122   : > { %v928_v8 = vmul.f32 %v1740_v16, %v1740_v16 }
 0x123   : > { %1522 = vst [vmem:[%s1694_s14 + $0x38] sm:$0xff] %v1394_v14   ;;  %v850_v25 = vadd.f32 %v849_v6, %v1685_v37  ;;  %v983_v26 = vadd.f32 %v982_v1, %v920_v18  ;;  %v1874_v6 = vpop.f32.mrf.mxu2  ;;  %v1876_v18 = vpop.f32.mrf.mxu3 }
 0x124   : > { %1530 = vst [vmem:[%s1694_s14 + $0x78] sm:$0xff] %v1434_v4  }
 0x125   : > { %v851_v30 = vadd.f32 %v850_v25, %v1696_v42  ;;  %v984_v15 = vadd.f32 %v983_v26, %v921_v3  ;;  %v1469_v42 = vpack.c.bf16 %v1852_v56, %v1834_v47  ;;  %v930_v25 = vmul.f32 %v1762_v28, %v1762_v28 }
 0x127   : > { %v852_v39 = vadd.f32 %v851_v30, %v1702_v49  ;;  %v985_v43 = vadd.f32 %v984_v15, %v922_v29  ;;  %v925_v49 = vmul.f32 %v1713_v63, %v1713_v63  ;;  %1537 = vst [vmem:[%s1694_s14 + $0xb0] sm:$0xff] %v1469_v42   ;;  %v932_v15 = vmul.f32 %v1784_v41, %v1784_v41 }
 0x129   : > { %v853_v37 = vadd.f32 %v852_v39, %v1705_v55  ;;  %v986_v21 = vadd.f32 %v985_v43, %v923_v38  ;;  %v926_v55 = vmul.f32 %v1725_v7, %v1725_v7 }
 0x12b   : > { %v854_v33 = vadd.f32 %v853_v37, %v1713_v63  ;;  %v987_v58 = vadd.f32 %v986_v21, %v924_v52  ;;  %v1890_v39 = vpop.f32.mrf.mxu2  ;;  %v1892_v43 = vpop.f32.mrf.mxu3  ;;  %v933_v37 = vmul.f32 %v1794_v48, %v1794_v48 }
 0x12c   : > { %v1504_v52 = vpack.c.bf16 %v1892_v43, %v1876_v18 }
 0x12d   : > { %v855_v59 = vadd.f32 %v854_v33, %v1725_v7  ;;  %v988_v61 = vadd.f32 %v987_v58, %v925_v49  ;;  %v929_v7 = vmul.f32 %v1750_v22, %v1750_v22  ;;  %v935_v58 = vmul.f32 %v1818_v44, %v1818_v44 }
 0x12e   : > { %1544 = vst [vmem:[%s1694_s14 + $0xe8] sm:$0xff] %v1504_v52   ;;  %v945_v52 = vmul.f32 %v1788_v45, %v1788_v45 }
 0x12f   : > { %v989_v62 = vadd.f32 %v988_v61, %v926_v55  ;;  %v856_v1 = vadd.f32 %v855_v59, %v1733_v12 }
 0x131   : > { %v857_v63 = vadd.f32 %v856_v1, %v1740_v16  ;;  %v990_v14 = vadd.f32 %v989_v62, %v927_v40  ;;  %v931_v16 = vmul.f32 %v1772_v34, %v1772_v34  ;;  %v937_v40 = vmul.f32 %v1709_v60, %v1709_v60 }
 0x132   : > { %v938_v1 = vmul.f32 %v1717_v2, %v1717_v2 }
 0x133   : > { %v858_v4 = vadd.f32 %v857_v63, %v1750_v22  ;;  %v991_v3 = vadd.f32 %v990_v14, %v928_v8  ;;  %v1912_v61 = vpop.f32.mrf.mxu3  ;;  %v939_v63 = vmul.f32 %v1729_v10, %v1729_v10 }
 0x135   : > { %v859_v12 = vadd.f32 %v858_v4, %v1762_v28  ;;  %v992_v26 = vadd.f32 %v991_v3, %v929_v7  ;;  %v1474_v28 = vpack.c.bf16 %v1890_v39, %v1874_v6  ;;  %v940_v7 = vmul.f32 %v1735_v13, %v1735_v13 }
 0x137   : > { %v860_v29 = vadd.f32 %v859_v12, %v1772_v34  ;;  %v993_v30 = vadd.f32 %v992_v26, %v930_v25  ;;  %1538 = vst [vmem:[%s1694_s14 + $0xb8] sm:$0xff] %v1474_v28  }
 0x139   : > { %v861_v22 = vadd.f32 %v860_v29, %v1784_v41  ;;  %v994_v38 = vadd.f32 %v993_v30, %v931_v16 }
 0x13b   : > { %v862_v34 = vadd.f32 %v861_v22, %v1794_v48  ;;  %v995_v21 = vadd.f32 %v994_v38, %v932_v15  ;;  %v936_v48 = vmul.f32 %v1830_v9, %v1830_v9  ;;  %v1926_v3 = vpop.f32.mrf.mxu3  ;;  %v944_v22 = vmul.f32 %v1774_v35, %v1774_v35 }
 0x13c   : > { %v1509_v25 = vpack.c.bf16 %v1926_v3, %v1912_v61 }
 0x13d   : > { %v996_v42 = vadd.f32 %v995_v21, %v933_v37  ;;  %v863_v41 = vadd.f32 %v862_v34, %v1808_v5  ;;  %v946_v37 = vmul.f32 %v1796_v50, %v1796_v50 }
 0x13e   : > { %1545 = vst [vmem:[%s1694_s14 + $0xf0] sm:$0xff] %v1509_v25  }
 0x13f   : > { %v997_v49 = vadd.f32 %v996_v42, %v934_v57  ;;  %v864_v33 = vadd.f32 %v863_v41, %v1818_v44  ;;  %v947_v42 = vmul.f32 %v1812_v17, %v1812_v17 }
 0x141   : > { %v998_v55 = vadd.f32 %v997_v49, %v935_v58  ;;  %v865_v59 = vadd.f32 %v864_v33, %v1830_v9  ;;  %v948_v49 = vmul.f32 %v1820_v53, %v1820_v53 }
 0x143   : > { %v866_v5 = vadd.f32 %v865_v59, %v1709_v60  ;;  %v999_v62 = vadd.f32 %v998_v55, %v936_v48  ;;  %v1943_v28 = vpop.f32.mrf.mxu3 }
 0x145   : > { %v867_v44 = vadd.f32 %v866_v5, %v1717_v2  ;;  %v1000_v8 = vadd.f32 %v999_v62, %v937_v40  ;;  %v941_v2 = vmul.f32 %v1744_v19, %v1744_v19  ;;  %v950_v40 = vmul.f32 %v1852_v56, %v1852_v56 }
 0x146   : > { %v951_v62 = vmul.f32 %v1874_v6, %v1874_v6 }
 0x147   : > { %v868_v9 = vadd.f32 %v867_v44, %v1729_v10  ;;  %v1001_v14 = vadd.f32 %v1000_v8, %v938_v1  ;;  %v942_v10 = vmul.f32 %v1752_v23, %v1752_v23  ;;  %v952_v8 = vmul.f32 %v1890_v39, %v1890_v39 }
 0x149   : > { %v869_v4 = vadd.f32 %v868_v9, %v1735_v13  ;;  %v1002_v60 = vadd.f32 %v1001_v14, %v939_v63  ;;  %v943_v13 = vmul.f32 %v1766_v31, %v1766_v31 }
 0x14b   : > { %v870_v12 = vadd.f32 %v869_v4, %v1744_v19  ;;  %v1003_v26 = vadd.f32 %v1002_v60, %v940_v7  ;;  %v704_v33 = vpop.f32.mrf.mxu3 }
 0x14c   : > { %v1514_v58 = vpack.c.bf16 %v704_v33, %v1943_v28 }
 0x14d   : > { %v871_v16 = vadd.f32 %v870_v12, %v1752_v23  ;;  %v1004_v29 = vadd.f32 %v1003_v26, %v941_v2 }
 0x14e   : > { %1546 = vst [vmem:[%s1694_s14 + $0xf8] sm:$0xff] %v1514_v58   ;;  %v968_v58 = vmul.f32 %v704_v33, %v704_v33 }
 0x14f   : > { %v1005_v30 = vadd.f32 %v1004_v29, %v942_v10  ;;  %v872_v15 = vadd.f32 %v871_v16, %v1766_v31 }
 0x151   : > { %v873_v38 = vadd.f32 %v872_v15, %v1774_v35  ;;  %v1006_v19 = vadd.f32 %v1005_v30, %v943_v13 }
 0x153   : > { %v874_v23 = vadd.f32 %v873_v38, %v1788_v45  ;;  %v1007_v34 = vadd.f32 %v1006_v19, %v944_v22 }
 0x155   : > { %v875_v31 = vadd.f32 %v874_v23, %v1796_v50  ;;  %v1008_v21 = vadd.f32 %v1007_v34, %v945_v52  ;;  %v949_v50 = vmul.f32 %v1834_v47, %v1834_v47 }
 0x157   : > { %v876_v35 = vadd.f32 %v875_v31, %v1812_v17  ;;  %v1009_v41 = vadd.f32 %v1008_v21, %v946_v37  ;;  %v964_v37 = vmul.f32 %v1892_v43, %v1892_v43 }
 0x159   : > { %v877_v57 = vadd.f32 %v876_v35, %v1820_v53  ;;  %v1010_v45 = vadd.f32 %v1009_v41, %v947_v42 }
 0x15b   : > { %v1011_v55 = vadd.f32 %v1010_v45, %v948_v49  ;;  %v878_v59 = vadd.f32 %v877_v57, %v1834_v47  ;;  %v953_v47 = vmul.f32 %v1746_v20, %v1746_v20 }
 0x15d   : > { %v1012_v48 = vadd.f32 %v1011_v55, %v949_v50  ;;  %v879_v17 = vadd.f32 %v878_v59, %v1852_v56  ;;  %v954_v56 = vmul.f32 %v1754_v24, %v1754_v24 }
 0x15f   : > { %v1013_v5 = vadd.f32 %v1012_v48, %v950_v40  ;;  %v880_v53 = vadd.f32 %v879_v17, %v1874_v6  ;;  %v955_v6 = vmul.f32 %v1768_v32, %v1768_v32 }
 0x161   : > { %v1014_v1 = vadd.f32 %v1013_v5, %v951_v62  ;;  %v881_v44 = vadd.f32 %v880_v53, %v1890_v39  ;;  %v956_v39 = vmul.f32 %v1776_v36, %v1776_v36 }
 0x163   : > { %v882_v63 = vadd.f32 %v881_v44, %v1746_v20  ;;  %v1015_v9 = vadd.f32 %v1014_v1, %v952_v8  ;;  %v957_v20 = vmul.f32 %v1790_v46, %v1790_v46 }
 0x165   : > { %v883_v14 = vadd.f32 %v882_v63, %v1754_v24  ;;  %v1016_v7 = vadd.f32 %v1015_v9, %v953_v47  ;;  %v958_v24 = vmul.f32 %v1798_v51, %v1798_v51 }
 0x167   : > { %v884_v4 = vadd.f32 %v883_v14, %v1768_v32  ;;  %v1017_v60 = vadd.f32 %v1016_v7, %v954_v56  ;;  %v959_v32 = vmul.f32 %v1814_v0, %v1814_v0 }
 0x169   : > { %v885_v25 = vadd.f32 %v884_v4, %v1776_v36  ;;  %v1018_v2 = vadd.f32 %v1017_v60, %v955_v6  ;;  %v960_v36 = vmul.f32 %v1822_v54, %v1822_v54 }
 0x16b   : > { %v886_v12 = vadd.f32 %v885_v25, %v1790_v46  ;;  %v1019_v26 = vadd.f32 %v1018_v2, %v956_v39  ;;  %v961_v46 = vmul.f32 %v1836_v11, %v1836_v11 }
 0x16d   : > { %v887_v10 = vadd.f32 %v886_v12, %v1798_v51  ;;  %v1020_v16 = vadd.f32 %v1019_v26, %v957_v20  ;;  %v962_v51 = vmul.f32 %v1854_v27, %v1854_v27 }
 0x16f   : > { %v1021_v29 = vadd.f32 %v1020_v16, %v958_v24  ;;  %v888_v13 = vadd.f32 %v887_v10, %v1814_v0  ;;  %v963_v0 = vmul.f32 %v1876_v18, %v1876_v18 }
 0x171   : > { %v889_v30 = vadd.f32 %v888_v13, %v1822_v54  ;;  %v1022_v15 = vadd.f32 %v1021_v29, %v959_v32 }
 0x173   : > { %v890_v22 = vadd.f32 %v889_v30, %v1836_v11  ;;  %v1023_v38 = vadd.f32 %v1022_v15, %v960_v36 }
 0x175   : > { %v891_v19 = vadd.f32 %v890_v22, %v1854_v27  ;;  %v1024_v52 = vadd.f32 %v1023_v38, %v961_v46  ;;  %v965_v27 = vmul.f32 %v1912_v61, %v1912_v61 }
 0x177   : > { %v892_v23 = vadd.f32 %v891_v19, %v1876_v18  ;;  %v1025_v34 = vadd.f32 %v1024_v52, %v962_v51  ;;  %v966_v18 = vmul.f32 %v1926_v3, %v1926_v3 }
 0x179   : > { %v893_v54 = vadd.f32 %v892_v23, %v1892_v43  ;;  %v1026_v11 = vadd.f32 %v1025_v34, %v963_v0  ;;  %v967_v43 = vmul.f32 %v1943_v28, %v1943_v28 }
 0x17b   : > { %v1027_v31 = vadd.f32 %v1026_v11, %v964_v37  ;;  %v894_v21 = vadd.f32 %v893_v54, %v1912_v61 }
 0x17d   : > { %v1028_v42 = vadd.f32 %v1027_v31, %v965_v27  ;;  %v895_v35 = vadd.f32 %v894_v21, %v1926_v3 }
 0x17f   : > { %v1029_v41 = vadd.f32 %v1028_v42, %v966_v18  ;;  %v896_v57 = vadd.f32 %v895_v35, %v1943_v28 }
 0x181   : > { %v1030_v49 = vadd.f32 %v1029_v41, %v967_v43  ;;  %v897_v45 = vadd.f32 %v896_v57, %v704_v33 }
 0x183   : > { %v898_v55 = vrot.slane %v897_v45, 4  ;;  %v1031_v59 = vadd.f32 %v1030_v49, %v968_v58 }
 0x185   : > { %v899_v61 = vadd.f32 %v898_v55, %v897_v45  ;;  %v1032_v50 = vrot.slane %v1031_v59, 4 }
 0x187   : > { %v900_v48 = vrot.slane %v899_v61, 2  ;;  %v1033_v17 = vadd.f32 %v1032_v50, %v1031_v59 }
 0x189   : > { %v901_v40 = vadd.f32 %v900_v48, %v899_v61  ;;  %v1034_v5 = vrot.slane %v1033_v17, 2 }
 0x18b   : > { %v902_v3 = vrot.slane %v901_v40, 1  ;;  %v1035_v53 = vadd.f32 %v1034_v5, %v1033_v17 }
 0x18d   : > { %v903_v28 = vadd.f32 %v902_v3, %v901_v40  ;;  %v1036_v62 = vrot.slane %v1035_v53, 1 }
 0x18f   : > { %904 = vst [vmem:[%s214_s19] sm:$0x1] %v903_v28  ;;  %v1037_v33 = vadd.f32 %v1036_v62, %v1035_v53 }
 0x191   : > { %1038 = vst [vmem:[%s217_s22] sm:$0x1] %v1037_v33 }
 0x192 PF: > { %s15_s15 = sadd.s32 1, %s1585_s15  }
 0x193   : > { %p12_p5 = scmp.ge.s32.totalorder %s15_s15, 4  }
 0x195   :  { %14 = sbr.rel (!%p12_p5) target bundleno = 1 (0x1), region = 82 }

</bundles_post_ra>
